<compile_context>
chip_gen: v6e
topology: v6e:2x2x1
jax: 0.10.0
libtpu: 0.0.40
codegen_flags: <defaults>
</compile_context>

<pallas_src>
import functools
import math

import numpy as np
import jax
import jax.numpy as jnp
from jax.experimental import pallas as pl
from jax.experimental.pallas import tpu as pltpu

# ----------------------------- config (small synthetic shapes) -----------------------------
B = 2
NUM_TEXT = 3            # len(text)
EMBED_DIM = 64          # must equal VISUAL_WIDTH for the forward's additions
VISUAL_LENGTH = 8       # T
VISUAL_WIDTH = 64       # W
VISUAL_HEAD = 4
VISUAL_LAYERS = 2
ATTN_WINDOW = 4
HEAD_DIM = VISUAL_WIDTH // VISUAL_HEAD
HALF_WIDTH = VISUAL_WIDTH // 2

LN_EPS = 1e-5
NORM_EPS = 1e-12


# ----------------------------- small in-kernel helpers -----------------------------
def _qgelu(x):
    return x * jax.nn.sigmoid(1.702 * x)


def _ln(x, g, b):
    mu = jnp.mean(x, axis=-1, keepdims=True)
    var = jnp.mean((x - mu) ** 2, axis=-1, keepdims=True)
    return (x - mu) * jax.lax.rsqrt(var + LN_EPS) * g + b


def _softmax_last(s):
    s = s - jnp.max(s, axis=-1, keepdims=True)
    p = jnp.exp(s)
    return p * pl.reciprocal(jnp.sum(p, axis=-1, keepdims=True), approx=True)


# ----------------------------- fused per-batch-element kernel -----------------------------
def _clipvad_kernel(
    # activations / shared constants
    visual_ref, pos_ref, mask_ref, disadj_ref, text_ref,
    # temporal transformer (stacked over layers; q/k/v/out pre-split per head)
    ln1_g_ref, ln1_b_ref, wq_ref, wk_ref, wv_ref, bq_ref, bk_ref, bv_ref,
    wo_ref, bo_ref, ln2_g_ref, ln2_b_ref, wfc_ref, bfc_ref, wpr_ref, bpr_ref,
    # graph convolutions
    gc1_w_ref, gc1_rw_ref, gc1_rb_ref,
    gc2_w_ref,
    gc3_w_ref, gc3_rw_ref, gc3_rb_ref,
    gc4_w_ref,
    # final linear (pre-split so cat(x1,x2) never materializes)
    lin_w1_ref, lin_w2_ref, lin_b_ref,
    # mlp2 + classifier
    m2_wfc_ref, m2_bfc_ref, m2_wpr_ref, m2_bpr_ref, clf_w_ref, clf_b_ref,
    # mlp1 (text branch)
    m1_wfc_ref, m1_bfc_ref, m1_wpr_ref, m1_bpr_ref,
    # outputs
    logits1_ref, logits2_ref,
    *, n_layers, n_head):

    T = visual_ref.shape[1]
    W = visual_ref.shape[2]
    hd = W // n_head
    scale = 1.0 / math.sqrt(hd)

    mask = mask_ref[...]                       # (T, T) block-diagonal 0/-inf
    x = visual_ref[0] + pos_ref[...]           # (T, W)

    # ---------------- temporal transformer (ResidualAttentionBlock x L) ----------------
    for l in range(n_layers):
        xn = _ln(x, ln1_g_ref[l], ln1_b_ref[l])
        attn = jnp.zeros((T, W), jnp.float32)
        for h in range(n_head):
            qh = jnp.dot(xn, wq_ref[l, h], preferred_element_type=jnp.float32) + bq_ref[l, h]
            kh = jnp.dot(xn, wk_ref[l, h], preferred_element_type=jnp.float32) + bk_ref[l, h]
            vh = jnp.dot(xn, wv_ref[l, h], preferred_element_type=jnp.float32) + bv_ref[l, h]
            s = jnp.dot(qh * scale, kh.T, preferred_element_type=jnp.float32) + mask
            p = _softmax_last(s)
            oh = jnp.dot(p, vh, preferred_element_type=jnp.float32)
            attn = attn + jnp.dot(oh, wo_ref[l, h], preferred_element_type=jnp.float32)
        x = x + attn + bo_ref[l]

        xn2 = _ln(x, ln2_g_ref[l], ln2_b_ref[l])
        hfc = _qgelu(jnp.dot(xn2, wfc_ref[l], preferred_element_type=jnp.float32) + bfc_ref[l])
        x = x + jnp.dot(hfc, wpr_ref[l], preferred_element_type=jnp.float32) + bpr_ref[l]

    # ---------------- adj4: cosine similarity + threshold + softmax ----------------
    x2 = jnp.dot(x, x.T, preferred_element_type=jnp.float32)          # (T, T)
    n = jnp.sqrt(jnp.sum(x * x, axis=-1, keepdims=True))              # (T, 1)
    denom = n * n.T + 1e-20                                           # outer product
    c = x2 / denom
    c = jnp.where(c > 0.7, c, 0.0)                                    # F.threshold(c, 0.7, 0)
    adj = _softmax_last(c)
    disadj = disadj_ref[...]                                          # shared (T, T)

    # ---------------- GraphConvolution (+ QuickGELU) x4 ----------------
    def gcn(xin, adjm, w_ref, rw_ref=None, rb_ref=None):
        support = jnp.dot(xin, w_ref[...], preferred_element_type=jnp.float32)
        out = jnp.dot(adjm, support, preferred_element_type=jnp.float32)
        if rw_ref is None:
            res = xin                                                  # identity residual (in==out)
        else:
            res = jnp.dot(xin, rw_ref[...], preferred_element_type=jnp.float32) + rb_ref[...]
        return _qgelu(out + res)

    x1_h = gcn(x, adj, gc1_w_ref, gc1_rw_ref, gc1_rb_ref)              # (T, W/2)
    x2_h = gcn(x, disadj, gc3_w_ref, gc3_rw_ref, gc3_rb_ref)           # (T, W/2)
    x1 = gcn(x1_h, adj, gc2_w_ref)                                     # (T, W/2)
    x2 = gcn(x2_h, disadj, gc4_w_ref)                                  # (T, W/2)

    # linear(cat(x1, x2)) with pre-split weight -> no in-kernel concat
    vf = (jnp.dot(x1, lin_w1_ref[...], preferred_element_type=jnp.float32)
          + jnp.dot(x2, lin_w2_ref[...], preferred_element_type=jnp.float32)
          + lin_b_ref[...])                                            # visual_features (T, W)

    # ---------------- classifier head: logits1 = classifier(vf + mlp2(vf)) ----------------
    h2 = _qgelu(jnp.dot(vf, m2_wfc_ref[...], preferred_element_type=jnp.float32) + m2_bfc_ref[...])
    y = vf + jnp.dot(h2, m2_wpr_ref[...], preferred_element_type=jnp.float32) + m2_bpr_ref[...]
    logits1 = jnp.sum(y * clf_w_ref[...], axis=-1, keepdims=True) + clf_b_ref[...]   # (T, 1) VPU reduce
    logits1_ref[0] = logits1

    # ---------------- text branch ----------------
    va = jnp.sum(logits1 * vf, axis=0, keepdims=True)                  # logits1^T @ vf  -> (1, W)
    va = va * jax.lax.rsqrt(jnp.sum(va * va, axis=-1, keepdims=True) + NORM_EPS)
    tf = text_ref[...] + va                                            # (Nt, W), broadcast over Nt
    h1 = _qgelu(jnp.dot(tf, m1_wfc_ref[...], preferred_element_type=jnp.float32) + m1_bfc_ref[...])
    tf = tf + jnp.dot(h1, m1_wpr_ref[...], preferred_element_type=jnp.float32) + m1_bpr_ref[...]

    # ---------------- logits2 = norm(vf) @ norm(tf)^T / 0.07 ----------------
    vn = vf * jax.lax.rsqrt(jnp.sum(vf * vf, axis=-1, keepdims=True) + NORM_EPS)
    tn = tf * jax.lax.rsqrt(jnp.sum(tf * tf, axis=-1, keepdims=True) + NORM_EPS)
    logits2_ref[0] = jnp.dot(vn, tn.T, preferred_element_type=jnp.float32) * (1.0 / 0.07)


# ----------------------------- host-side glue -----------------------------
def build_attention_mask(T, attn_window):
    m = np.full((T, T), -np.inf, dtype=np.float32)
    for i in range(T // attn_window):
        lo = i * attn_window
        hi = min((i + 1) * attn_window, T)
        m[lo:hi, lo:hi] = 0.0
    return jnp.asarray(m)


def distance_adj(T):
    # shared across the batch (identical per sample) -> one (T, T) array, constant index map
    idx = np.arange(T, dtype=np.float32)
    dist = np.abs(idx[:, None] - idx[None, :])
    return jnp.asarray(np.exp(-dist / np.exp(1.0)), dtype=np.float32)


def init_params(key):
    W, T, Wh = VISUAL_WIDTH, VISUAL_LENGTH, HALF_WIDTH
    L, nh, hd = VISUAL_LAYERS, VISUAL_HEAD, HEAD_DIM
    keys = iter(jax.random.split(key, 64))

    def nrm(shape, std=0.02):
        return jax.random.normal(next(keys), shape, jnp.float32) * std

    p = {}
    p['pos_emb'] = nrm((T, W), 0.01)                     # frame_position_embeddings
    p['attn_mask'] = build_attention_mask(T, ATTN_WINDOW)
    p['disadj'] = distance_adj(T)
    # temporal transformer, stacked over layers; attention weights pre-split per head so the
    # kernel does x @ W directly (no in-kernel transpose / lane slicing / concat).
    p['temporal'] = {
        'ln1_g': jnp.ones((L, 1, W), jnp.float32), 'ln1_b': jnp.zeros((L, 1, W), jnp.float32),
        'wq': nrm((L, nh, W, hd)), 'wk': nrm((L, nh, W, hd)), 'wv': nrm((L, nh, W, hd)),
        'bq': jnp.zeros((L, nh, 1, hd), jnp.float32),
        'bk': jnp.zeros((L, nh, 1, hd), jnp.float32),
        'bv': jnp.zeros((L, nh, 1, hd), jnp.float32),
        'wo': nrm((L, nh, hd, W)), 'bo': jnp.zeros((L, 1, W), jnp.float32),
        'ln2_g': jnp.ones((L, 1, W), jnp.float32), 'ln2_b': jnp.zeros((L, 1, W), jnp.float32),
        'wfc': nrm((L, W, 4 * W)), 'bfc': jnp.zeros((L, 1, 4 * W), jnp.float32),
        'wpr': nrm((L, 4 * W, W)), 'bpr': jnp.zeros((L, 1, W), jnp.float32),
    }
    # GraphConvolution weights (in, out); linear residual when dims differ, identity otherwise.
    p['gc1'] = {'w': nrm((W, Wh)), 'rw': nrm((W, Wh)), 'rb': jnp.zeros((1, Wh), jnp.float32)}
    p['gc2'] = {'w': nrm((Wh, Wh))}
    p['gc3'] = {'w': nrm((W, Wh)), 'rw': nrm((W, Wh)), 'rb': jnp.zeros((1, Wh), jnp.float32)}
    p['gc4'] = {'w': nrm((Wh, Wh))}
    # self.linear (W -> W), pre-split into the halves that act on x1 and x2.
    p['lin_w1'] = nrm((Wh, W))
    p['lin_w2'] = nrm((Wh, W))
    p['lin_b'] = jnp.zeros((1, W), jnp.float32)
    p['mlp1'] = {'wfc': nrm((W, 4 * W)), 'bfc': jnp.zeros((1, 4 * W), jnp.float32),
                 'wpr': nrm((4 * W, W)), 'bpr': jnp.zeros((1, W), jnp.float32)}
    p['mlp2'] = {'wfc': nrm((W, 4 * W)), 'bfc': jnp.zeros((1, 4 * W), jnp.float32),
                 'wpr': nrm((4 * W, W)), 'bpr': jnp.zeros((1, W), jnp.float32)}
    p['clf_w'] = nrm((1, W))
    p['clf_b'] = jnp.zeros((1, 1), jnp.float32)
    return p


def clipvad_forward(params, visual, padding_mask, text_features_ori):
    # padding_mask unused: the reference passes None into the temporal transformer.
    del padding_mask
    Bb, T, W = visual.shape
    Nt = text_features_ori.shape[0]
    p = params
    t = p['temporal']

    args = [
        visual, p['pos_emb'], p['attn_mask'], p['disadj'], text_features_ori,
        t['ln1_g'], t['ln1_b'], t['wq'], t['wk'], t['wv'], t['bq'], t['bk'], t['bv'],
        t['wo'], t['bo'], t['ln2_g'], t['ln2_b'], t['wfc'], t['bfc'], t['wpr'], t['bpr'],
        p['gc1']['w'], p['gc1']['rw'], p['gc1']['rb'],
        p['gc2']['w'],
        p['gc3']['w'], p['gc3']['rw'], p['gc3']['rb'],
        p['gc4']['w'],
        p['lin_w1'], p['lin_w2'], p['lin_b'],
        p['mlp2']['wfc'], p['mlp2']['bfc'], p['mlp2']['wpr'], p['mlp2']['bpr'],
        p['clf_w'], p['clf_b'],
        p['mlp1']['wfc'], p['mlp1']['bfc'], p['mlp1']['wpr'], p['mlp1']['bpr'],
    ]

    def wspec(arr):
        n = arr.ndim
        return pl.BlockSpec(arr.shape, lambda b, _n=n: (0,) * _n)

    in_specs = [pl.BlockSpec((1, T, W), lambda b: (b, 0, 0))] + [wspec(a) for a in args[1:]]
    out_specs = [pl.BlockSpec((1, T, 1), lambda b: (b, 0, 0)),
                 pl.BlockSpec((1, T, Nt), lambda b: (b, 0, 0))]
    out_shape = [jax.ShapeDtypeStruct((Bb, T, 1), jnp.float32),
                 jax.ShapeDtypeStruct((Bb, T, Nt), jnp.float32)]

    logits1, logits2 = pl.pallas_call(
        functools.partial(_clipvad_kernel, n_layers=VISUAL_LAYERS, n_head=VISUAL_HEAD),
        grid=(Bb,),
        in_specs=in_specs,
        out_specs=out_specs,
        out_shape=out_shape,
        compiler_params=pltpu.CompilerParams(dimension_semantics=("parallel",)),
    )(*args)

    return text_features_ori, logits1, logits2


if __name__ == "__main__":
    key = jax.random.PRNGKey(0)
    kp, kv, kt = jax.random.split(key, 3)
    params = init_params(kp)
    visual = jax.random.normal(kv, (B, VISUAL_LENGTH, VISUAL_WIDTH), jnp.float32)
    padding_mask = jnp.zeros((B, VISUAL_LENGTH), jnp.bool_)
    text_features_ori = jax.random.normal(kt, (NUM_TEXT, EMBED_DIM), jnp.float32) * 0.02

    fwd = jax.jit(clipvad_forward)
    tf_ori, logits1, logits2 = fwd(params, visual, padding_mask, text_features_ori)
    jax.block_until_ready((tf_ori, logits1, logits2))

    assert tf_ori.shape == (NUM_TEXT, EMBED_DIM)
    assert logits1.shape == (B, VISUAL_LENGTH, 1)
    assert logits2.shape == (B, VISUAL_LENGTH, NUM_TEXT)
    assert np.isfinite(np.asarray(logits1)).all()
    assert np.isfinite(np.asarray(logits2)).all()
    print("KERNEL_OK")
</pallas_src>

<mosaic_0001>
module attributes {stable_mosaic.version = 11 : i64} {
  func.func @_clipvad_kernel(%arg0: i32, %arg1: memref<1x8x64xf32, #tpu.memory_space<vmem>>, %arg2: memref<8x64xf32, #tpu.memory_space<vmem>>, %arg3: memref<8x8xf32, #tpu.memory_space<vmem>>, %arg4: memref<8x8xf32, #tpu.memory_space<vmem>>, %arg5: memref<3x64xf32, #tpu.memory_space<vmem>>, %arg6: memref<2x1x64xf32, #tpu.memory_space<vmem>>, %arg7: memref<2x1x64xf32, #tpu.memory_space<vmem>>, %arg8: memref<2x4x64x16xf32, #tpu.memory_space<vmem>>, %arg9: memref<2x4x64x16xf32, #tpu.memory_space<vmem>>, %arg10: memref<2x4x64x16xf32, #tpu.memory_space<vmem>>, %arg11: memref<2x4x1x16xf32, #tpu.memory_space<vmem>>, %arg12: memref<2x4x1x16xf32, #tpu.memory_space<vmem>>, %arg13: memref<2x4x1x16xf32, #tpu.memory_space<vmem>>, %arg14: memref<2x4x16x64xf32, #tpu.memory_space<vmem>>, %arg15: memref<2x1x64xf32, #tpu.memory_space<vmem>>, %arg16: memref<2x1x64xf32, #tpu.memory_space<vmem>>, %arg17: memref<2x1x64xf32, #tpu.memory_space<vmem>>, %arg18: memref<2x64x256xf32, #tpu.memory_space<vmem>>, %arg19: memref<2x1x256xf32, #tpu.memory_space<vmem>>, %arg20: memref<2x256x64xf32, #tpu.memory_space<vmem>>, %arg21: memref<2x1x64xf32, #tpu.memory_space<vmem>>, %arg22: memref<64x32xf32, #tpu.memory_space<vmem>>, %arg23: memref<64x32xf32, #tpu.memory_space<vmem>>, %arg24: memref<1x32xf32, #tpu.memory_space<vmem>>, %arg25: memref<32x32xf32, #tpu.memory_space<vmem>>, %arg26: memref<64x32xf32, #tpu.memory_space<vmem>>, %arg27: memref<64x32xf32, #tpu.memory_space<vmem>>, %arg28: memref<1x32xf32, #tpu.memory_space<vmem>>, %arg29: memref<32x32xf32, #tpu.memory_space<vmem>>, %arg30: memref<32x64xf32, #tpu.memory_space<vmem>>, %arg31: memref<32x64xf32, #tpu.memory_space<vmem>>, %arg32: memref<1x64xf32, #tpu.memory_space<vmem>>, %arg33: memref<64x256xf32, #tpu.memory_space<vmem>>, %arg34: memref<1x256xf32, #tpu.memory_space<vmem>>, %arg35: memref<256x64xf32, #tpu.memory_space<vmem>>, %arg36: memref<1x64xf32, #tpu.memory_space<vmem>>, %arg37: memref<1x64xf32, #tpu.memory_space<vmem>>, %arg38: memref<1x1xf32, #tpu.memory_space<vmem>>, %arg39: memref<64x256xf32, #tpu.memory_space<vmem>>, %arg40: memref<1x256xf32, #tpu.memory_space<vmem>>, %arg41: memref<256x64xf32, #tpu.memory_space<vmem>>, %arg42: memref<1x64xf32, #tpu.memory_space<vmem>>, %arg43: memref<1x8x1xf32, #tpu.memory_space<vmem>>, %arg44: memref<1x8x3xf32, #tpu.memory_space<vmem>>) attributes {dimension_semantics = [#tpu.dimension_semantics<parallel>], iteration_bounds = array<i64: 2>, scalar_prefetch = 0 : i64, scratch_operands = 0 : i64, tpu.core_type = #tpu.core_type<tc>, window_params = [{transform_indices = @transform_0, window_bounds = array<i64: 1, 8, 64>}, {pipeline_mode = #tpu.pipeline_mode<synchronous>, transform_indices = @transform_1, window_bounds = array<i64: 8, 64>}, {pipeline_mode = #tpu.pipeline_mode<synchronous>, transform_indices = @transform_2, window_bounds = array<i64: 8, 8>}, {pipeline_mode = #tpu.pipeline_mode<synchronous>, transform_indices = @transform_3, window_bounds = array<i64: 8, 8>}, {pipeline_mode = #tpu.pipeline_mode<synchronous>, transform_indices = @transform_4, window_bounds = array<i64: 3, 64>}, {pipeline_mode = #tpu.pipeline_mode<synchronous>, transform_indices = @transform_5, window_bounds = array<i64: 2, 1, 64>}, {pipeline_mode = #tpu.pipeline_mode<synchronous>, transform_indices = @transform_6, window_bounds = array<i64: 2, 1, 64>}, {pipeline_mode = #tpu.pipeline_mode<synchronous>, transform_indices = @transform_7, window_bounds = array<i64: 2, 4, 64, 16>}, {pipeline_mode = #tpu.pipeline_mode<synchronous>, transform_indices = @transform_8, window_bounds = array<i64: 2, 4, 64, 16>}, {pipeline_mode = #tpu.pipeline_mode<synchronous>, transform_indices = @transform_9, window_bounds = array<i64: 2, 4, 64, 16>}, {pipeline_mode = #tpu.pipeline_mode<synchronous>, transform_indices = @transform_10, window_bounds = array<i64: 2, 4, 1, 16>}, {pipeline_mode = #tpu.pipeline_mode<synchronous>, transform_indices = @transform_11, window_bounds = array<i64: 2, 4, 1, 16>}, {pipeline_mode = #tpu.pipeline_mode<synchronous>, transform_indices = @transform_12, window_bounds = array<i64: 2, 4, 1, 16>}, {pipeline_mode = #tpu.pipeline_mode<synchronous>, transform_indices = @transform_13, window_bounds = array<i64: 2, 4, 16, 64>}, {pipeline_mode = #tpu.pipeline_mode<synchronous>, transform_indices = @transform_14, window_bounds = array<i64: 2, 1, 64>}, {pipeline_mode = #tpu.pipeline_mode<synchronous>, transform_indices = @transform_15, window_bounds = array<i64: 2, 1, 64>}, {pipeline_mode = #tpu.pipeline_mode<synchronous>, transform_indices = @transform_16, window_bounds = array<i64: 2, 1, 64>}, {pipeline_mode = #tpu.pipeline_mode<synchronous>, transform_indices = @transform_17, window_bounds = array<i64: 2, 64, 256>}, {pipeline_mode = #tpu.pipeline_mode<synchronous>, transform_indices = @transform_18, window_bounds = array<i64: 2, 1, 256>}, {pipeline_mode = #tpu.pipeline_mode<synchronous>, transform_indices = @transform_19, window_bounds = array<i64: 2, 256, 64>}, {pipeline_mode = #tpu.pipeline_mode<synchronous>, transform_indices = @transform_20, window_bounds = array<i64: 2, 1, 64>}, {pipeline_mode = #tpu.pipeline_mode<synchronous>, transform_indices = @transform_21, window_bounds = array<i64: 64, 32>}, {pipeline_mode = #tpu.pipeline_mode<synchronous>, transform_indices = @transform_22, window_bounds = array<i64: 64, 32>}, {pipeline_mode = #tpu.pipeline_mode<synchronous>, transform_indices = @transform_23, window_bounds = array<i64: 1, 32>}, {pipeline_mode = #tpu.pipeline_mode<synchronous>, transform_indices = @transform_24, window_bounds = array<i64: 32, 32>}, {pipeline_mode = #tpu.pipeline_mode<synchronous>, transform_indices = @transform_25, window_bounds = array<i64: 64, 32>}, {pipeline_mode = #tpu.pipeline_mode<synchronous>, transform_indices = @transform_26, window_bounds = array<i64: 64, 32>}, {pipeline_mode = #tpu.pipeline_mode<synchronous>, transform_indices = @transform_27, window_bounds = array<i64: 1, 32>}, {pipeline_mode = #tpu.pipeline_mode<synchronous>, transform_indices = @transform_28, window_bounds = array<i64: 32, 32>}, {pipeline_mode = #tpu.pipeline_mode<synchronous>, transform_indices = @transform_29, window_bounds = array<i64: 32, 64>}, {pipeline_mode = #tpu.pipeline_mode<synchronous>, transform_indices = @transform_30, window_bounds = array<i64: 32, 64>}, {pipeline_mode = #tpu.pipeline_mode<synchronous>, transform_indices = @transform_31, window_bounds = array<i64: 1, 64>}, {pipeline_mode = #tpu.pipeline_mode<synchronous>, transform_indices = @transform_32, window_bounds = array<i64: 64, 256>}, {pipeline_mode = #tpu.pipeline_mode<synchronous>, transform_indices = @transform_33, window_bounds = array<i64: 1, 256>}, {pipeline_mode = #tpu.pipeline_mode<synchronous>, transform_indices = @transform_34, window_bounds = array<i64: 256, 64>}, {pipeline_mode = #tpu.pipeline_mode<synchronous>, transform_indices = @transform_35, window_bounds = array<i64: 1, 64>}, {pipeline_mode = #tpu.pipeline_mode<synchronous>, transform_indices = @transform_36, window_bounds = array<i64: 1, 64>}, {pipeline_mode = #tpu.pipeline_mode<synchronous>, transform_indices = @transform_37, window_bounds = array<i64: 1, 1>}, {pipeline_mode = #tpu.pipeline_mode<synchronous>, transform_indices = @transform_38, window_bounds = array<i64: 64, 256>}, {pipeline_mode = #tpu.pipeline_mode<synchronous>, transform_indices = @transform_39, window_bounds = array<i64: 1, 256>}, {pipeline_mode = #tpu.pipeline_mode<synchronous>, transform_indices = @transform_40, window_bounds = array<i64: 256, 64>}, {pipeline_mode = #tpu.pipeline_mode<synchronous>, transform_indices = @transform_41, window_bounds = array<i64: 1, 64>}, {transform_indices = @transform_42, window_bounds = array<i64: 1, 8, 1>}, {transform_indices = @transform_43, window_bounds = array<i64: 1, 8, 3>}]} {
    %c0 = arith.constant 0 : index
    %c0_0 = arith.constant 0 : index
    %0 = vector.load %arg3[%c0, %c0_0] : memref<8x8xf32, #tpu.memory_space<vmem>>, vector<8x8xf32>
    %c0_1 = arith.constant 0 : index
    %c0_2 = arith.constant 0 : index
    %c0_3 = arith.constant 0 : index
    %1 = vector.load %arg1[%c0_1, %c0_2, %c0_3] : memref<1x8x64xf32, #tpu.memory_space<vmem>>, vector<1x8x64xf32>
    %2 = vector.shape_cast %1 : vector<1x8x64xf32> to vector<8x64xf32>
    %c0_4 = arith.constant 0 : index
    %c0_5 = arith.constant 0 : index
    %3 = vector.load %arg2[%c0_4, %c0_5] : memref<8x64xf32, #tpu.memory_space<vmem>>, vector<8x64xf32>
    %4 = arith.addf %2, %3 : vector<8x64xf32>
    %c0_6 = arith.constant 0 : index
    %c0_7 = arith.constant 0 : index
    %c0_8 = arith.constant 0 : index
    %5 = vector.load %arg6[%c0_6, %c0_7, %c0_8] : memref<2x1x64xf32, #tpu.memory_space<vmem>>, vector<1x1x64xf32>
    %6 = vector.shape_cast %5 : vector<1x1x64xf32> to vector<1x64xf32>
    %c0_9 = arith.constant 0 : index
    %c0_10 = arith.constant 0 : index
    %c0_11 = arith.constant 0 : index
    %7 = vector.load %arg7[%c0_9, %c0_10, %c0_11] : memref<2x1x64xf32, #tpu.memory_space<vmem>>, vector<1x1x64xf32>
    %8 = vector.shape_cast %7 : vector<1x1x64xf32> to vector<1x64xf32>
    %cst = arith.constant dense<0.000000e+00> : vector<8xf32>
    %9 = vector.multi_reduction <add>, %4, %cst [1] : vector<8x64xf32> to vector<8xf32>
    %10 = vector.shape_cast %9 : vector<8xf32> to vector<8x1xf32>
    %cst_12 = arith.constant 6.400000e+01 : f32
    %11 = vector.broadcast %cst_12 : f32 to vector<8x1xf32>
    %12 = arith.divf %10, %11 : vector<8x1xf32>
    %13 = vector.broadcast %12 : vector<8x1xf32> to vector<8x64xf32>
    %14 = arith.subf %4, %13 : vector<8x64xf32>
    %15 = arith.mulf %14, %14 : vector<8x64xf32>
    %cst_13 = arith.constant dense<0.000000e+00> : vector<8xf32>
    %16 = vector.multi_reduction <add>, %15, %cst_13 [1] : vector<8x64xf32> to vector<8xf32>
    %17 = vector.shape_cast %16 : vector<8xf32> to vector<8x1xf32>
    %cst_14 = arith.constant 6.400000e+01 : f32
    %18 = vector.broadcast %cst_14 : f32 to vector<8x1xf32>
    %19 = arith.divf %17, %18 : vector<8x1xf32>
    %20 = vector.broadcast %12 : vector<8x1xf32> to vector<8x64xf32>
    %21 = arith.subf %4, %20 : vector<8x64xf32>
    %cst_15 = arith.constant 9.99999974E-6 : f32
    %22 = vector.broadcast %cst_15 : f32 to vector<8x1xf32>
    %23 = arith.addf %19, %22 : vector<8x1xf32>
    %24 = math.rsqrt %23 : vector<8x1xf32>
    %25 = vector.broadcast %24 : vector<8x1xf32> to vector<8x64xf32>
    %26 = arith.mulf %21, %25 : vector<8x64xf32>
    %27 = vector.broadcast %6 : vector<1x64xf32> to vector<8x64xf32>
    %28 = arith.mulf %26, %27 : vector<8x64xf32>
    %29 = vector.broadcast %8 : vector<1x64xf32> to vector<8x64xf32>
    %30 = arith.addf %28, %29 : vector<8x64xf32>
    %cst_16 = arith.constant 0.000000e+00 : f32
    %31 = vector.broadcast %cst_16 : f32 to vector<8x64xf32>
    %c0_17 = arith.constant 0 : index
    %c0_18 = arith.constant 0 : index
    %c0_19 = arith.constant 0 : index
    %c0_20 = arith.constant 0 : index
    %32 = vector.load %arg8[%c0_17, %c0_18, %c0_19, %c0_20] : memref<2x4x64x16xf32, #tpu.memory_space<vmem>>, vector<1x1x64x16xf32>
    %33 = vector.shape_cast %32 : vector<1x1x64x16xf32> to vector<64x16xf32>
    %cst_21 = arith.constant dense<0.000000e+00> : vector<8x16xf32>
    %34 = tpu.matmul %30, %33, %cst_21 {dimension_numbers = #tpu.dot_dimension_numbers<[1], [0], [0], [1], [0, 0, 1, 1], [], []>} : vector<8x64xf32>, vector<64x16xf32>, vector<8x16xf32> -> vector<8x16xf32>
    %c0_22 = arith.constant 0 : index
    %c0_23 = arith.constant 0 : index
    %c0_24 = arith.constant 0 : index
    %c0_25 = arith.constant 0 : index
    %35 = vector.load %arg11[%c0_22, %c0_23, %c0_24, %c0_25] : memref<2x4x1x16xf32, #tpu.memory_space<vmem>>, vector<1x1x1x16xf32>
    %36 = vector.shape_cast %35 : vector<1x1x1x16xf32> to vector<1x16xf32>
    %37 = vector.broadcast %36 : vector<1x16xf32> to vector<8x16xf32>
    %38 = arith.addf %34, %37 : vector<8x16xf32>
    %c0_26 = arith.constant 0 : index
    %c0_27 = arith.constant 0 : index
    %c0_28 = arith.constant 0 : index
    %c0_29 = arith.constant 0 : index
    %39 = vector.load %arg9[%c0_26, %c0_27, %c0_28, %c0_29] : memref<2x4x64x16xf32, #tpu.memory_space<vmem>>, vector<1x1x64x16xf32>
    %40 = vector.shape_cast %39 : vector<1x1x64x16xf32> to vector<64x16xf32>
    %cst_30 = arith.constant dense<0.000000e+00> : vector<8x16xf32>
    %41 = tpu.matmul %30, %40, %cst_30 {dimension_numbers = #tpu.dot_dimension_numbers<[1], [0], [0], [1], [0, 0, 1, 1], [], []>} : vector<8x64xf32>, vector<64x16xf32>, vector<8x16xf32> -> vector<8x16xf32>
    %c0_31 = arith.constant 0 : index
    %c0_32 = arith.constant 0 : index
    %c0_33 = arith.constant 0 : index
    %c0_34 = arith.constant 0 : index
    %42 = vector.load %arg12[%c0_31, %c0_32, %c0_33, %c0_34] : memref<2x4x1x16xf32, #tpu.memory_space<vmem>>, vector<1x1x1x16xf32>
    %43 = vector.shape_cast %42 : vector<1x1x1x16xf32> to vector<1x16xf32>
    %44 = vector.broadcast %43 : vector<1x16xf32> to vector<8x16xf32>
    %45 = arith.addf %41, %44 : vector<8x16xf32>
    %c0_35 = arith.constant 0 : index
    %c0_36 = arith.constant 0 : index
    %c0_37 = arith.constant 0 : index
    %c0_38 = arith.constant 0 : index
    %46 = vector.load %arg10[%c0_35, %c0_36, %c0_37, %c0_38] : memref<2x4x64x16xf32, #tpu.memory_space<vmem>>, vector<1x1x64x16xf32>
    %47 = vector.shape_cast %46 : vector<1x1x64x16xf32> to vector<64x16xf32>
    %cst_39 = arith.constant dense<0.000000e+00> : vector<8x16xf32>
    %48 = tpu.matmul %30, %47, %cst_39 {dimension_numbers = #tpu.dot_dimension_numbers<[1], [0], [0], [1], [0, 0, 1, 1], [], []>} : vector<8x64xf32>, vector<64x16xf32>, vector<8x16xf32> -> vector<8x16xf32>
    %c0_40 = arith.constant 0 : index
    %c0_41 = arith.constant 0 : index
    %c0_42 = arith.constant 0 : index
    %c0_43 = arith.constant 0 : index
    %49 = vector.load %arg13[%c0_40, %c0_41, %c0_42, %c0_43] : memref<2x4x1x16xf32, #tpu.memory_space<vmem>>, vector<1x1x1x16xf32>
    %50 = vector.shape_cast %49 : vector<1x1x1x16xf32> to vector<1x16xf32>
    %51 = vector.broadcast %50 : vector<1x16xf32> to vector<8x16xf32>
    %52 = arith.addf %48, %51 : vector<8x16xf32>
    %cst_44 = arith.constant 2.500000e-01 : f32
    %53 = vector.broadcast %cst_44 : f32 to vector<8x16xf32>
    %54 = arith.mulf %38, %53 : vector<8x16xf32>
    %55 = tpu.transpose %45, [1, 0] : vector<8x16xf32> -> vector<16x8xf32>
    %cst_45 = arith.constant dense<0.000000e+00> : vector<8x8xf32>
    %56 = tpu.matmul %54, %55, %cst_45 {dimension_numbers = #tpu.dot_dimension_numbers<[1], [0], [0], [1], [0, 0, 1, 1], [], []>} : vector<8x16xf32>, vector<16x8xf32>, vector<8x8xf32> -> vector<8x8xf32>
    %57 = arith.addf %56, %0 : vector<8x8xf32>
    %cst_46 = arith.constant dense<0xFF800000> : vector<8xf32>
    %58 = vector.multi_reduction <maximumf>, %57, %cst_46 [1] : vector<8x8xf32> to vector<8xf32>
    %59 = vector.shape_cast %58 : vector<8xf32> to vector<8x1xf32>
    %60 = vector.broadcast %59 : vector<8x1xf32> to vector<8x8xf32>
    %61 = arith.subf %57, %60 : vector<8x8xf32>
    %62 = math.exp %61 : vector<8x8xf32>
    %cst_47 = arith.constant dense<0.000000e+00> : vector<8xf32>
    %63 = vector.multi_reduction <add>, %62, %cst_47 [1] : vector<8x8xf32> to vector<8xf32>
    %64 = vector.shape_cast %63 : vector<8xf32> to vector<8x1xf32>
    %65 = tpu.reciprocal %64 {approx = true} : vector<8x1xf32> -> vector<8x1xf32>
    %66 = vector.broadcast %65 : vector<8x1xf32> to vector<8x8xf32>
    %67 = arith.mulf %62, %66 : vector<8x8xf32>
    %cst_48 = arith.constant dense<0.000000e+00> : vector<8x16xf32>
    %68 = tpu.matmul %67, %52, %cst_48 {dimension_numbers = #tpu.dot_dimension_numbers<[1], [0], [0], [1], [0, 0, 1, 1], [], []>} : vector<8x8xf32>, vector<8x16xf32>, vector<8x16xf32> -> vector<8x16xf32>
    %c0_49 = arith.constant 0 : index
    %c0_50 = arith.constant 0 : index
    %c0_51 = arith.constant 0 : index
    %c0_52 = arith.constant 0 : index
    %69 = vector.load %arg14[%c0_49, %c0_50, %c0_51, %c0_52] : memref<2x4x16x64xf32, #tpu.memory_space<vmem>>, vector<1x1x16x64xf32>
    %70 = vector.shape_cast %69 : vector<1x1x16x64xf32> to vector<16x64xf32>
    %cst_53 = arith.constant dense<0.000000e+00> : vector<8x64xf32>
    %71 = tpu.matmul %68, %70, %cst_53 {dimension_numbers = #tpu.dot_dimension_numbers<[1], [0], [0], [1], [0, 0, 1, 1], [], []>} : vector<8x16xf32>, vector<16x64xf32>, vector<8x64xf32> -> vector<8x64xf32>
    %72 = arith.addf %31, %71 : vector<8x64xf32>
    %c0_54 = arith.constant 0 : index
    %c1 = arith.constant 1 : index
    %c0_55 = arith.constant 0 : index
    %c0_56 = arith.constant 0 : index
    %73 = vector.load %arg8[%c0_54, %c1, %c0_55, %c0_56] : memref<2x4x64x16xf32, #tpu.memory_space<vmem>>, vector<1x1x64x16xf32>
    %74 = vector.shape_cast %73 : vector<1x1x64x16xf32> to vector<64x16xf32>
    %cst_57 = arith.constant dense<0.000000e+00> : vector<8x16xf32>
    %75 = tpu.matmul %30, %74, %cst_57 {dimension_numbers = #tpu.dot_dimension_numbers<[1], [0], [0], [1], [0, 0, 1, 1], [], []>} : vector<8x64xf32>, vector<64x16xf32>, vector<8x16xf32> -> vector<8x16xf32>
    %c0_58 = arith.constant 0 : index
    %c1_59 = arith.constant 1 : index
    %c0_60 = arith.constant 0 : index
    %c0_61 = arith.constant 0 : index
    %76 = vector.load %arg11[%c0_58, %c1_59, %c0_60, %c0_61] : memref<2x4x1x16xf32, #tpu.memory_space<vmem>>, vector<1x1x1x16xf32>
    %77 = vector.shape_cast %76 : vector<1x1x1x16xf32> to vector<1x16xf32>
    %78 = vector.broadcast %77 : vector<1x16xf32> to vector<8x16xf32>
    %79 = arith.addf %75, %78 : vector<8x16xf32>
    %c0_62 = arith.constant 0 : index
    %c1_63 = arith.constant 1 : index
    %c0_64 = arith.constant 0 : index
    %c0_65 = arith.constant 0 : index
    %80 = vector.load %arg9[%c0_62, %c1_63, %c0_64, %c0_65] : memref<2x4x64x16xf32, #tpu.memory_space<vmem>>, vector<1x1x64x16xf32>
    %81 = vector.shape_cast %80 : vector<1x1x64x16xf32> to vector<64x16xf32>
    %cst_66 = arith.constant dense<0.000000e+00> : vector<8x16xf32>
    %82 = tpu.matmul %30, %81, %cst_66 {dimension_numbers = #tpu.dot_dimension_numbers<[1], [0], [0], [1], [0, 0, 1, 1], [], []>} : vector<8x64xf32>, vector<64x16xf32>, vector<8x16xf32> -> vector<8x16xf32>
    %c0_67 = arith.constant 0 : index
    %c1_68 = arith.constant 1 : index
    %c0_69 = arith.constant 0 : index
    %c0_70 = arith.constant 0 : index
    %83 = vector.load %arg12[%c0_67, %c1_68, %c0_69, %c0_70] : memref<2x4x1x16xf32, #tpu.memory_space<vmem>>, vector<1x1x1x16xf32>
    %84 = vector.shape_cast %83 : vector<1x1x1x16xf32> to vector<1x16xf32>
    %85 = vector.broadcast %84 : vector<1x16xf32> to vector<8x16xf32>
    %86 = arith.addf %82, %85 : vector<8x16xf32>
    %c0_71 = arith.constant 0 : index
    %c1_72 = arith.constant 1 : index
    %c0_73 = arith.constant 0 : index
    %c0_74 = arith.constant 0 : index
    %87 = vector.load %arg10[%c0_71, %c1_72, %c0_73, %c0_74] : memref<2x4x64x16xf32, #tpu.memory_space<vmem>>, vector<1x1x64x16xf32>
    %88 = vector.shape_cast %87 : vector<1x1x64x16xf32> to vector<64x16xf32>
    %cst_75 = arith.constant dense<0.000000e+00> : vector<8x16xf32>
    %89 = tpu.matmul %30, %88, %cst_75 {dimension_numbers = #tpu.dot_dimension_numbers<[1], [0], [0], [1], [0, 0, 1, 1], [], []>} : vector<8x64xf32>, vector<64x16xf32>, vector<8x16xf32> -> vector<8x16xf32>
    %c0_76 = arith.constant 0 : index
    %c1_77 = arith.constant 1 : index
    %c0_78 = arith.constant 0 : index
    %c0_79 = arith.constant 0 : index
    %90 = vector.load %arg13[%c0_76, %c1_77, %c0_78, %c0_79] : memref<2x4x1x16xf32, #tpu.memory_space<vmem>>, vector<1x1x1x16xf32>
    %91 = vector.shape_cast %90 : vector<1x1x1x16xf32> to vector<1x16xf32>
    %92 = vector.broadcast %91 : vector<1x16xf32> to vector<8x16xf32>
    %93 = arith.addf %89, %92 : vector<8x16xf32>
    %cst_80 = arith.constant 2.500000e-01 : f32
    %94 = vector.broadcast %cst_80 : f32 to vector<8x16xf32>
    %95 = arith.mulf %79, %94 : vector<8x16xf32>
    %96 = tpu.transpose %86, [1, 0] : vector<8x16xf32> -> vector<16x8xf32>
    %cst_81 = arith.constant dense<0.000000e+00> : vector<8x8xf32>
    %97 = tpu.matmul %95, %96, %cst_81 {dimension_numbers = #tpu.dot_dimension_numbers<[1], [0], [0], [1], [0, 0, 1, 1], [], []>} : vector<8x16xf32>, vector<16x8xf32>, vector<8x8xf32> -> vector<8x8xf32>
    %98 = arith.addf %97, %0 : vector<8x8xf32>
    %cst_82 = arith.constant dense<0xFF800000> : vector<8xf32>
    %99 = vector.multi_reduction <maximumf>, %98, %cst_82 [1] : vector<8x8xf32> to vector<8xf32>
    %100 = vector.shape_cast %99 : vector<8xf32> to vector<8x1xf32>
    %101 = vector.broadcast %100 : vector<8x1xf32> to vector<8x8xf32>
    %102 = arith.subf %98, %101 : vector<8x8xf32>
    %103 = math.exp %102 : vector<8x8xf32>
    %cst_83 = arith.constant dense<0.000000e+00> : vector<8xf32>
    %104 = vector.multi_reduction <add>, %103, %cst_83 [1] : vector<8x8xf32> to vector<8xf32>
    %105 = vector.shape_cast %104 : vector<8xf32> to vector<8x1xf32>
    %106 = tpu.reciprocal %105 {approx = true} : vector<8x1xf32> -> vector<8x1xf32>
    %107 = vector.broadcast %106 : vector<8x1xf32> to vector<8x8xf32>
    %108 = arith.mulf %103, %107 : vector<8x8xf32>
    %cst_84 = arith.constant dense<0.000000e+00> : vector<8x16xf32>
    %109 = tpu.matmul %108, %93, %cst_84 {dimension_numbers = #tpu.dot_dimension_numbers<[1], [0], [0], [1], [0, 0, 1, 1], [], []>} : vector<8x8xf32>, vector<8x16xf32>, vector<8x16xf32> -> vector<8x16xf32>
    %c0_85 = arith.constant 0 : index
    %c1_86 = arith.constant 1 : index
    %c0_87 = arith.constant 0 : index
    %c0_88 = arith.constant 0 : index
    %110 = vector.load %arg14[%c0_85, %c1_86, %c0_87, %c0_88] : memref<2x4x16x64xf32, #tpu.memory_space<vmem>>, vector<1x1x16x64xf32>
    %111 = vector.shape_cast %110 : vector<1x1x16x64xf32> to vector<16x64xf32>
    %cst_89 = arith.constant dense<0.000000e+00> : vector<8x64xf32>
    %112 = tpu.matmul %109, %111, %cst_89 {dimension_numbers = #tpu.dot_dimension_numbers<[1], [0], [0], [1], [0, 0, 1, 1], [], []>} : vector<8x16xf32>, vector<16x64xf32>, vector<8x64xf32> -> vector<8x64xf32>
    %113 = arith.addf %72, %112 : vector<8x64xf32>
    %c0_90 = arith.constant 0 : index
    %c2 = arith.constant 2 : index
    %c0_91 = arith.constant 0 : index
    %c0_92 = arith.constant 0 : index
    %114 = vector.load %arg8[%c0_90, %c2, %c0_91, %c0_92] : memref<2x4x64x16xf32, #tpu.memory_space<vmem>>, vector<1x1x64x16xf32>
    %115 = vector.shape_cast %114 : vector<1x1x64x16xf32> to vector<64x16xf32>
    %cst_93 = arith.constant dense<0.000000e+00> : vector<8x16xf32>
    %116 = tpu.matmul %30, %115, %cst_93 {dimension_numbers = #tpu.dot_dimension_numbers<[1], [0], [0], [1], [0, 0, 1, 1], [], []>} : vector<8x64xf32>, vector<64x16xf32>, vector<8x16xf32> -> vector<8x16xf32>
    %c0_94 = arith.constant 0 : index
    %c2_95 = arith.constant 2 : index
    %c0_96 = arith.constant 0 : index
    %c0_97 = arith.constant 0 : index
    %117 = vector.load %arg11[%c0_94, %c2_95, %c0_96, %c0_97] : memref<2x4x1x16xf32, #tpu.memory_space<vmem>>, vector<1x1x1x16xf32>
    %118 = vector.shape_cast %117 : vector<1x1x1x16xf32> to vector<1x16xf32>
    %119 = vector.broadcast %118 : vector<1x16xf32> to vector<8x16xf32>
    %120 = arith.addf %116, %119 : vector<8x16xf32>
    %c0_98 = arith.constant 0 : index
    %c2_99 = arith.constant 2 : index
    %c0_100 = arith.constant 0 : index
    %c0_101 = arith.constant 0 : index
    %121 = vector.load %arg9[%c0_98, %c2_99, %c0_100, %c0_101] : memref<2x4x64x16xf32, #tpu.memory_space<vmem>>, vector<1x1x64x16xf32>
    %122 = vector.shape_cast %121 : vector<1x1x64x16xf32> to vector<64x16xf32>
    %cst_102 = arith.constant dense<0.000000e+00> : vector<8x16xf32>
    %123 = tpu.matmul %30, %122, %cst_102 {dimension_numbers = #tpu.dot_dimension_numbers<[1], [0], [0], [1], [0, 0, 1, 1], [], []>} : vector<8x64xf32>, vector<64x16xf32>, vector<8x16xf32> -> vector<8x16xf32>
    %c0_103 = arith.constant 0 : index
    %c2_104 = arith.constant 2 : index
    %c0_105 = arith.constant 0 : index
    %c0_106 = arith.constant 0 : index
    %124 = vector.load %arg12[%c0_103, %c2_104, %c0_105, %c0_106] : memref<2x4x1x16xf32, #tpu.memory_space<vmem>>, vector<1x1x1x16xf32>
    %125 = vector.shape_cast %124 : vector<1x1x1x16xf32> to vector<1x16xf32>
    %126 = vector.broadcast %125 : vector<1x16xf32> to vector<8x16xf32>
    %127 = arith.addf %123, %126 : vector<8x16xf32>
    %c0_107 = arith.constant 0 : index
    %c2_108 = arith.constant 2 : index
    %c0_109 = arith.constant 0 : index
    %c0_110 = arith.constant 0 : index
    %128 = vector.load %arg10[%c0_107, %c2_108, %c0_109, %c0_110] : memref<2x4x64x16xf32, #tpu.memory_space<vmem>>, vector<1x1x64x16xf32>
    %129 = vector.shape_cast %128 : vector<1x1x64x16xf32> to vector<64x16xf32>
    %cst_111 = arith.constant dense<0.000000e+00> : vector<8x16xf32>
    %130 = tpu.matmul %30, %129, %cst_111 {dimension_numbers = #tpu.dot_dimension_numbers<[1], [0], [0], [1], [0, 0, 1, 1], [], []>} : vector<8x64xf32>, vector<64x16xf32>, vector<8x16xf32> -> vector<8x16xf32>
    %c0_112 = arith.constant 0 : index
    %c2_113 = arith.constant 2 : index
    %c0_114 = arith.constant 0 : index
    %c0_115 = arith.constant 0 : index
    %131 = vector.load %arg13[%c0_112, %c2_113, %c0_114, %c0_115] : memref<2x4x1x16xf32, #tpu.memory_space<vmem>>, vector<1x1x1x16xf32>
    %132 = vector.shape_cast %131 : vector<1x1x1x16xf32> to vector<1x16xf32>
    %133 = vector.broadcast %132 : vector<1x16xf32> to vector<8x16xf32>
    %134 = arith.addf %130, %133 : vector<8x16xf32>
    %cst_116 = arith.constant 2.500000e-01 : f32
    %135 = vector.broadcast %cst_116 : f32 to vector<8x16xf32>
    %136 = arith.mulf %120, %135 : vector<8x16xf32>
    %137 = tpu.transpose %127, [1, 0] : vector<8x16xf32> -> vector<16x8xf32>
    %cst_117 = arith.constant dense<0.000000e+00> : vector<8x8xf32>
    %138 = tpu.matmul %136, %137, %cst_117 {dimension_numbers = #tpu.dot_dimension_numbers<[1], [0], [0], [1], [0, 0, 1, 1], [], []>} : vector<8x16xf32>, vector<16x8xf32>, vector<8x8xf32> -> vector<8x8xf32>
    %139 = arith.addf %138, %0 : vector<8x8xf32>
    %cst_118 = arith.constant dense<0xFF800000> : vector<8xf32>
    %140 = vector.multi_reduction <maximumf>, %139, %cst_118 [1] : vector<8x8xf32> to vector<8xf32>
    %141 = vector.shape_cast %140 : vector<8xf32> to vector<8x1xf32>
    %142 = vector.broadcast %141 : vector<8x1xf32> to vector<8x8xf32>
    %143 = arith.subf %139, %142 : vector<8x8xf32>
    %144 = math.exp %143 : vector<8x8xf32>
    %cst_119 = arith.constant dense<0.000000e+00> : vector<8xf32>
    %145 = vector.multi_reduction <add>, %144, %cst_119 [1] : vector<8x8xf32> to vector<8xf32>
    %146 = vector.shape_cast %145 : vector<8xf32> to vector<8x1xf32>
    %147 = tpu.reciprocal %146 {approx = true} : vector<8x1xf32> -> vector<8x1xf32>
    %148 = vector.broadcast %147 : vector<8x1xf32> to vector<8x8xf32>
    %149 = arith.mulf %144, %148 : vector<8x8xf32>
    %cst_120 = arith.constant dense<0.000000e+00> : vector<8x16xf32>
    %150 = tpu.matmul %149, %134, %cst_120 {dimension_numbers = #tpu.dot_dimension_numbers<[1], [0], [0], [1], [0, 0, 1, 1], [], []>} : vector<8x8xf32>, vector<8x16xf32>, vector<8x16xf32> -> vector<8x16xf32>
    %c0_121 = arith.constant 0 : index
    %c2_122 = arith.constant 2 : index
    %c0_123 = arith.constant 0 : index
    %c0_124 = arith.constant 0 : index
    %151 = vector.load %arg14[%c0_121, %c2_122, %c0_123, %c0_124] : memref<2x4x16x64xf32, #tpu.memory_space<vmem>>, vector<1x1x16x64xf32>
    %152 = vector.shape_cast %151 : vector<1x1x16x64xf32> to vector<16x64xf32>
    %cst_125 = arith.constant dense<0.000000e+00> : vector<8x64xf32>
    %153 = tpu.matmul %150, %152, %cst_125 {dimension_numbers = #tpu.dot_dimension_numbers<[1], [0], [0], [1], [0, 0, 1, 1], [], []>} : vector<8x16xf32>, vector<16x64xf32>, vector<8x64xf32> -> vector<8x64xf32>
    %154 = arith.addf %113, %153 : vector<8x64xf32>
    %c0_126 = arith.constant 0 : index
    %c3 = arith.constant 3 : index
    %c0_127 = arith.constant 0 : index
    %c0_128 = arith.constant 0 : index
    %155 = vector.load %arg8[%c0_126, %c3, %c0_127, %c0_128] : memref<2x4x64x16xf32, #tpu.memory_space<vmem>>, vector<1x1x64x16xf32>
    %156 = vector.shape_cast %155 : vector<1x1x64x16xf32> to vector<64x16xf32>
    %cst_129 = arith.constant dense<0.000000e+00> : vector<8x16xf32>
    %157 = tpu.matmul %30, %156, %cst_129 {dimension_numbers = #tpu.dot_dimension_numbers<[1], [0], [0], [1], [0, 0, 1, 1], [], []>} : vector<8x64xf32>, vector<64x16xf32>, vector<8x16xf32> -> vector<8x16xf32>
    %c0_130 = arith.constant 0 : index
    %c3_131 = arith.constant 3 : index
    %c0_132 = arith.constant 0 : index
    %c0_133 = arith.constant 0 : index
    %158 = vector.load %arg11[%c0_130, %c3_131, %c0_132, %c0_133] : memref<2x4x1x16xf32, #tpu.memory_space<vmem>>, vector<1x1x1x16xf32>
    %159 = vector.shape_cast %158 : vector<1x1x1x16xf32> to vector<1x16xf32>
    %160 = vector.broadcast %159 : vector<1x16xf32> to vector<8x16xf32>
    %161 = arith.addf %157, %160 : vector<8x16xf32>
    %c0_134 = arith.constant 0 : index
    %c3_135 = arith.constant 3 : index
    %c0_136 = arith.constant 0 : index
    %c0_137 = arith.constant 0 : index
    %162 = vector.load %arg9[%c0_134, %c3_135, %c0_136, %c0_137] : memref<2x4x64x16xf32, #tpu.memory_space<vmem>>, vector<1x1x64x16xf32>
    %163 = vector.shape_cast %162 : vector<1x1x64x16xf32> to vector<64x16xf32>
    %cst_138 = arith.constant dense<0.000000e+00> : vector<8x16xf32>
    %164 = tpu.matmul %30, %163, %cst_138 {dimension_numbers = #tpu.dot_dimension_numbers<[1], [0], [0], [1], [0, 0, 1, 1], [], []>} : vector<8x64xf32>, vector<64x16xf32>, vector<8x16xf32> -> vector<8x16xf32>
    %c0_139 = arith.constant 0 : index
    %c3_140 = arith.constant 3 : index
    %c0_141 = arith.constant 0 : index
    %c0_142 = arith.constant 0 : index
    %165 = vector.load %arg12[%c0_139, %c3_140, %c0_141, %c0_142] : memref<2x4x1x16xf32, #tpu.memory_space<vmem>>, vector<1x1x1x16xf32>
    %166 = vector.shape_cast %165 : vector<1x1x1x16xf32> to vector<1x16xf32>
    %167 = vector.broadcast %166 : vector<1x16xf32> to vector<8x16xf32>
    %168 = arith.addf %164, %167 : vector<8x16xf32>
    %c0_143 = arith.constant 0 : index
    %c3_144 = arith.constant 3 : index
    %c0_145 = arith.constant 0 : index
    %c0_146 = arith.constant 0 : index
    %169 = vector.load %arg10[%c0_143, %c3_144, %c0_145, %c0_146] : memref<2x4x64x16xf32, #tpu.memory_space<vmem>>, vector<1x1x64x16xf32>
    %170 = vector.shape_cast %169 : vector<1x1x64x16xf32> to vector<64x16xf32>
    %cst_147 = arith.constant dense<0.000000e+00> : vector<8x16xf32>
    %171 = tpu.matmul %30, %170, %cst_147 {dimension_numbers = #tpu.dot_dimension_numbers<[1], [0], [0], [1], [0, 0, 1, 1], [], []>} : vector<8x64xf32>, vector<64x16xf32>, vector<8x16xf32> -> vector<8x16xf32>
    %c0_148 = arith.constant 0 : index
    %c3_149 = arith.constant 3 : index
    %c0_150 = arith.constant 0 : index
    %c0_151 = arith.constant 0 : index
    %172 = vector.load %arg13[%c0_148, %c3_149, %c0_150, %c0_151] : memref<2x4x1x16xf32, #tpu.memory_space<vmem>>, vector<1x1x1x16xf32>
    %173 = vector.shape_cast %172 : vector<1x1x1x16xf32> to vector<1x16xf32>
    %174 = vector.broadcast %173 : vector<1x16xf32> to vector<8x16xf32>
    %175 = arith.addf %171, %174 : vector<8x16xf32>
    %cst_152 = arith.constant 2.500000e-01 : f32
    %176 = vector.broadcast %cst_152 : f32 to vector<8x16xf32>
    %177 = arith.mulf %161, %176 : vector<8x16xf32>
    %178 = tpu.transpose %168, [1, 0] : vector<8x16xf32> -> vector<16x8xf32>
    %cst_153 = arith.constant dense<0.000000e+00> : vector<8x8xf32>
    %179 = tpu.matmul %177, %178, %cst_153 {dimension_numbers = #tpu.dot_dimension_numbers<[1], [0], [0], [1], [0, 0, 1, 1], [], []>} : vector<8x16xf32>, vector<16x8xf32>, vector<8x8xf32> -> vector<8x8xf32>
    %180 = arith.addf %179, %0 : vector<8x8xf32>
    %cst_154 = arith.constant dense<0xFF800000> : vector<8xf32>
    %181 = vector.multi_reduction <maximumf>, %180, %cst_154 [1] : vector<8x8xf32> to vector<8xf32>
    %182 = vector.shape_cast %181 : vector<8xf32> to vector<8x1xf32>
    %183 = vector.broadcast %182 : vector<8x1xf32> to vector<8x8xf32>
    %184 = arith.subf %180, %183 : vector<8x8xf32>
    %185 = math.exp %184 : vector<8x8xf32>
    %cst_155 = arith.constant dense<0.000000e+00> : vector<8xf32>
    %186 = vector.multi_reduction <add>, %185, %cst_155 [1] : vector<8x8xf32> to vector<8xf32>
    %187 = vector.shape_cast %186 : vector<8xf32> to vector<8x1xf32>
    %188 = tpu.reciprocal %187 {approx = true} : vector<8x1xf32> -> vector<8x1xf32>
    %189 = vector.broadcast %188 : vector<8x1xf32> to vector<8x8xf32>
    %190 = arith.mulf %185, %189 : vector<8x8xf32>
    %cst_156 = arith.constant dense<0.000000e+00> : vector<8x16xf32>
    %191 = tpu.matmul %190, %175, %cst_156 {dimension_numbers = #tpu.dot_dimension_numbers<[1], [0], [0], [1], [0, 0, 1, 1], [], []>} : vector<8x8xf32>, vector<8x16xf32>, vector<8x16xf32> -> vector<8x16xf32>
    %c0_157 = arith.constant 0 : index
    %c3_158 = arith.constant 3 : index
    %c0_159 = arith.constant 0 : index
    %c0_160 = arith.constant 0 : index
    %192 = vector.load %arg14[%c0_157, %c3_158, %c0_159, %c0_160] : memref<2x4x16x64xf32, #tpu.memory_space<vmem>>, vector<1x1x16x64xf32>
    %193 = vector.shape_cast %192 : vector<1x1x16x64xf32> to vector<16x64xf32>
    %cst_161 = arith.constant dense<0.000000e+00> : vector<8x64xf32>
    %194 = tpu.matmul %191, %193, %cst_161 {dimension_numbers = #tpu.dot_dimension_numbers<[1], [0], [0], [1], [0, 0, 1, 1], [], []>} : vector<8x16xf32>, vector<16x64xf32>, vector<8x64xf32> -> vector<8x64xf32>
    %195 = arith.addf %154, %194 : vector<8x64xf32>
    %196 = arith.addf %4, %195 : vector<8x64xf32>
    %c0_162 = arith.constant 0 : index
    %c0_163 = arith.constant 0 : index
    %c0_164 = arith.constant 0 : index
    %197 = vector.load %arg15[%c0_162, %c0_163, %c0_164] : memref<2x1x64xf32, #tpu.memory_space<vmem>>, vector<1x1x64xf32>
    %198 = vector.shape_cast %197 : vector<1x1x64xf32> to vector<1x64xf32>
    %199 = vector.broadcast %198 : vector<1x64xf32> to vector<8x64xf32>
    %200 = arith.addf %196, %199 : vector<8x64xf32>
    %c0_165 = arith.constant 0 : index
    %c0_166 = arith.constant 0 : index
    %c0_167 = arith.constant 0 : index
    %201 = vector.load %arg16[%c0_165, %c0_166, %c0_167] : memref<2x1x64xf32, #tpu.memory_space<vmem>>, vector<1x1x64xf32>
    %202 = vector.shape_cast %201 : vector<1x1x64xf32> to vector<1x64xf32>
    %c0_168 = arith.constant 0 : index
    %c0_169 = arith.constant 0 : index
    %c0_170 = arith.constant 0 : index
    %203 = vector.load %arg17[%c0_168, %c0_169, %c0_170] : memref<2x1x64xf32, #tpu.memory_space<vmem>>, vector<1x1x64xf32>
    %204 = vector.shape_cast %203 : vector<1x1x64xf32> to vector<1x64xf32>
    %cst_171 = arith.constant dense<0.000000e+00> : vector<8xf32>
    %205 = vector.multi_reduction <add>, %200, %cst_171 [1] : vector<8x64xf32> to vector<8xf32>
    %206 = vector.shape_cast %205 : vector<8xf32> to vector<8x1xf32>
    %cst_172 = arith.constant 6.400000e+01 : f32
    %207 = vector.broadcast %cst_172 : f32 to vector<8x1xf32>
    %208 = arith.divf %206, %207 : vector<8x1xf32>
    %209 = vector.broadcast %208 : vector<8x1xf32> to vector<8x64xf32>
    %210 = arith.subf %200, %209 : vector<8x64xf32>
    %211 = arith.mulf %210, %210 : vector<8x64xf32>
    %cst_173 = arith.constant dense<0.000000e+00> : vector<8xf32>
    %212 = vector.multi_reduction <add>, %211, %cst_173 [1] : vector<8x64xf32> to vector<8xf32>
    %213 = vector.shape_cast %212 : vector<8xf32> to vector<8x1xf32>
    %cst_174 = arith.constant 6.400000e+01 : f32
    %214 = vector.broadcast %cst_174 : f32 to vector<8x1xf32>
    %215 = arith.divf %213, %214 : vector<8x1xf32>
    %216 = vector.broadcast %208 : vector<8x1xf32> to vector<8x64xf32>
    %217 = arith.subf %200, %216 : vector<8x64xf32>
    %cst_175 = arith.constant 9.99999974E-6 : f32
    %218 = vector.broadcast %cst_175 : f32 to vector<8x1xf32>
    %219 = arith.addf %215, %218 : vector<8x1xf32>
    %220 = math.rsqrt %219 : vector<8x1xf32>
    %221 = vector.broadcast %220 : vector<8x1xf32> to vector<8x64xf32>
    %222 = arith.mulf %217, %221 : vector<8x64xf32>
    %223 = vector.broadcast %202 : vector<1x64xf32> to vector<8x64xf32>
    %224 = arith.mulf %222, %223 : vector<8x64xf32>
    %225 = vector.broadcast %204 : vector<1x64xf32> to vector<8x64xf32>
    %226 = arith.addf %224, %225 : vector<8x64xf32>
    %c0_176 = arith.constant 0 : index
    %c0_177 = arith.constant 0 : index
    %c0_178 = arith.constant 0 : index
    %227 = vector.load %arg18[%c0_176, %c0_177, %c0_178] : memref<2x64x256xf32, #tpu.memory_space<vmem>>, vector<1x64x256xf32>
    %228 = vector.shape_cast %227 : vector<1x64x256xf32> to vector<64x256xf32>
    %cst_179 = arith.constant dense<0.000000e+00> : vector<8x256xf32>
    %229 = tpu.matmul %226, %228, %cst_179 {dimension_numbers = #tpu.dot_dimension_numbers<[1], [0], [0], [1], [0, 0, 1, 1], [], []>} : vector<8x64xf32>, vector<64x256xf32>, vector<8x256xf32> -> vector<8x256xf32>
    %c0_180 = arith.constant 0 : index
    %c0_181 = arith.constant 0 : index
    %c0_182 = arith.constant 0 : index
    %230 = vector.load %arg19[%c0_180, %c0_181, %c0_182] : memref<2x1x256xf32, #tpu.memory_space<vmem>>, vector<1x1x256xf32>
    %231 = vector.shape_cast %230 : vector<1x1x256xf32> to vector<1x256xf32>
    %232 = vector.broadcast %231 : vector<1x256xf32> to vector<8x256xf32>
    %233 = arith.addf %229, %232 : vector<8x256xf32>
    %cst_183 = arith.constant 1.702000e+00 : f32
    %234 = vector.broadcast %cst_183 : f32 to vector<8x256xf32>
    %235 = arith.mulf %234, %233 : vector<8x256xf32>
    %236 = arith.negf %235 : vector<8x256xf32>
    %237 = math.exp %236 : vector<8x256xf32>
    %cst_184 = arith.constant 1.000000e+00 : f32
    %238 = vector.broadcast %cst_184 : f32 to vector<8x256xf32>
    %239 = arith.addf %238, %237 : vector<8x256xf32>
    %240 = arith.divf %238, %239 : vector<8x256xf32>
    %241 = arith.mulf %233, %240 : vector<8x256xf32>
    %c0_185 = arith.constant 0 : index
    %c0_186 = arith.constant 0 : index
    %c0_187 = arith.constant 0 : index
    %242 = vector.load %arg20[%c0_185, %c0_186, %c0_187] : memref<2x256x64xf32, #tpu.memory_space<vmem>>, vector<1x256x64xf32>
    %243 = vector.shape_cast %242 : vector<1x256x64xf32> to vector<256x64xf32>
    %cst_188 = arith.constant dense<0.000000e+00> : vector<8x64xf32>
    %244 = tpu.matmul %241, %243, %cst_188 {dimension_numbers = #tpu.dot_dimension_numbers<[1], [0], [0], [1], [0, 0, 1, 1], [], []>} : vector<8x256xf32>, vector<256x64xf32>, vector<8x64xf32> -> vector<8x64xf32>
    %245 = arith.addf %200, %244 : vector<8x64xf32>
    %c0_189 = arith.constant 0 : index
    %c0_190 = arith.constant 0 : index
    %c0_191 = arith.constant 0 : index
    %246 = vector.load %arg21[%c0_189, %c0_190, %c0_191] : memref<2x1x64xf32, #tpu.memory_space<vmem>>, vector<1x1x64xf32>
    %247 = vector.shape_cast %246 : vector<1x1x64xf32> to vector<1x64xf32>
    %248 = vector.broadcast %247 : vector<1x64xf32> to vector<8x64xf32>
    %249 = arith.addf %245, %248 : vector<8x64xf32>
    %c1_192 = arith.constant 1 : index
    %c0_193 = arith.constant 0 : index
    %c0_194 = arith.constant 0 : index
    %250 = vector.load %arg6[%c1_192, %c0_193, %c0_194] : memref<2x1x64xf32, #tpu.memory_space<vmem>>, vector<1x1x64xf32>
    %251 = vector.shape_cast %250 : vector<1x1x64xf32> to vector<1x64xf32>
    %c1_195 = arith.constant 1 : index
    %c0_196 = arith.constant 0 : index
    %c0_197 = arith.constant 0 : index
    %252 = vector.load %arg7[%c1_195, %c0_196, %c0_197] : memref<2x1x64xf32, #tpu.memory_space<vmem>>, vector<1x1x64xf32>
    %253 = vector.shape_cast %252 : vector<1x1x64xf32> to vector<1x64xf32>
    %cst_198 = arith.constant dense<0.000000e+00> : vector<8xf32>
    %254 = vector.multi_reduction <add>, %249, %cst_198 [1] : vector<8x64xf32> to vector<8xf32>
    %255 = vector.shape_cast %254 : vector<8xf32> to vector<8x1xf32>
    %cst_199 = arith.constant 6.400000e+01 : f32
    %256 = vector.broadcast %cst_199 : f32 to vector<8x1xf32>
    %257 = arith.divf %255, %256 : vector<8x1xf32>
    %258 = vector.broadcast %257 : vector<8x1xf32> to vector<8x64xf32>
    %259 = arith.subf %249, %258 : vector<8x64xf32>
    %260 = arith.mulf %259, %259 : vector<8x64xf32>
    %cst_200 = arith.constant dense<0.000000e+00> : vector<8xf32>
    %261 = vector.multi_reduction <add>, %260, %cst_200 [1] : vector<8x64xf32> to vector<8xf32>
    %262 = vector.shape_cast %261 : vector<8xf32> to vector<8x1xf32>
    %cst_201 = arith.constant 6.400000e+01 : f32
    %263 = vector.broadcast %cst_201 : f32 to vector<8x1xf32>
    %264 = arith.divf %262, %263 : vector<8x1xf32>
    %265 = vector.broadcast %257 : vector<8x1xf32> to vector<8x64xf32>
    %266 = arith.subf %249, %265 : vector<8x64xf32>
    %cst_202 = arith.constant 9.99999974E-6 : f32
    %267 = vector.broadcast %cst_202 : f32 to vector<8x1xf32>
    %268 = arith.addf %264, %267 : vector<8x1xf32>
    %269 = math.rsqrt %268 : vector<8x1xf32>
    %270 = vector.broadcast %269 : vector<8x1xf32> to vector<8x64xf32>
    %271 = arith.mulf %266, %270 : vector<8x64xf32>
    %272 = vector.broadcast %251 : vector<1x64xf32> to vector<8x64xf32>
    %273 = arith.mulf %271, %272 : vector<8x64xf32>
    %274 = vector.broadcast %253 : vector<1x64xf32> to vector<8x64xf32>
    %275 = arith.addf %273, %274 : vector<8x64xf32>
    %cst_203 = arith.constant 0.000000e+00 : f32
    %276 = vector.broadcast %cst_203 : f32 to vector<8x64xf32>
    %c1_204 = arith.constant 1 : index
    %c0_205 = arith.constant 0 : index
    %c0_206 = arith.constant 0 : index
    %c0_207 = arith.constant 0 : index
    %277 = vector.load %arg8[%c1_204, %c0_205, %c0_206, %c0_207] : memref<2x4x64x16xf32, #tpu.memory_space<vmem>>, vector<1x1x64x16xf32>
    %278 = vector.shape_cast %277 : vector<1x1x64x16xf32> to vector<64x16xf32>
    %cst_208 = arith.constant dense<0.000000e+00> : vector<8x16xf32>
    %279 = tpu.matmul %275, %278, %cst_208 {dimension_numbers = #tpu.dot_dimension_numbers<[1], [0], [0], [1], [0, 0, 1, 1], [], []>} : vector<8x64xf32>, vector<64x16xf32>, vector<8x16xf32> -> vector<8x16xf32>
    %c1_209 = arith.constant 1 : index
    %c0_210 = arith.constant 0 : index
    %c0_211 = arith.constant 0 : index
    %c0_212 = arith.constant 0 : index
    %280 = vector.load %arg11[%c1_209, %c0_210, %c0_211, %c0_212] : memref<2x4x1x16xf32, #tpu.memory_space<vmem>>, vector<1x1x1x16xf32>
    %281 = vector.shape_cast %280 : vector<1x1x1x16xf32> to vector<1x16xf32>
    %282 = vector.broadcast %281 : vector<1x16xf32> to vector<8x16xf32>
    %283 = arith.addf %279, %282 : vector<8x16xf32>
    %c1_213 = arith.constant 1 : index
    %c0_214 = arith.constant 0 : index
    %c0_215 = arith.constant 0 : index
    %c0_216 = arith.constant 0 : index
    %284 = vector.load %arg9[%c1_213, %c0_214, %c0_215, %c0_216] : memref<2x4x64x16xf32, #tpu.memory_space<vmem>>, vector<1x1x64x16xf32>
    %285 = vector.shape_cast %284 : vector<1x1x64x16xf32> to vector<64x16xf32>
    %cst_217 = arith.constant dense<0.000000e+00> : vector<8x16xf32>
    %286 = tpu.matmul %275, %285, %cst_217 {dimension_numbers = #tpu.dot_dimension_numbers<[1], [0], [0], [1], [0, 0, 1, 1], [], []>} : vector<8x64xf32>, vector<64x16xf32>, vector<8x16xf32> -> vector<8x16xf32>
    %c1_218 = arith.constant 1 : index
    %c0_219 = arith.constant 0 : index
    %c0_220 = arith.constant 0 : index
    %c0_221 = arith.constant 0 : index
    %287 = vector.load %arg12[%c1_218, %c0_219, %c0_220, %c0_221] : memref<2x4x1x16xf32, #tpu.memory_space<vmem>>, vector<1x1x1x16xf32>
    %288 = vector.shape_cast %287 : vector<1x1x1x16xf32> to vector<1x16xf32>
    %289 = vector.broadcast %288 : vector<1x16xf32> to vector<8x16xf32>
    %290 = arith.addf %286, %289 : vector<8x16xf32>
    %c1_222 = arith.constant 1 : index
    %c0_223 = arith.constant 0 : index
    %c0_224 = arith.constant 0 : index
    %c0_225 = arith.constant 0 : index
    %291 = vector.load %arg10[%c1_222, %c0_223, %c0_224, %c0_225] : memref<2x4x64x16xf32, #tpu.memory_space<vmem>>, vector<1x1x64x16xf32>
    %292 = vector.shape_cast %291 : vector<1x1x64x16xf32> to vector<64x16xf32>
    %cst_226 = arith.constant dense<0.000000e+00> : vector<8x16xf32>
    %293 = tpu.matmul %275, %292, %cst_226 {dimension_numbers = #tpu.dot_dimension_numbers<[1], [0], [0], [1], [0, 0, 1, 1], [], []>} : vector<8x64xf32>, vector<64x16xf32>, vector<8x16xf32> -> vector<8x16xf32>
    %c1_227 = arith.constant 1 : index
    %c0_228 = arith.constant 0 : index
    %c0_229 = arith.constant 0 : index
    %c0_230 = arith.constant 0 : index
    %294 = vector.load %arg13[%c1_227, %c0_228, %c0_229, %c0_230] : memref<2x4x1x16xf32, #tpu.memory_space<vmem>>, vector<1x1x1x16xf32>
    %295 = vector.shape_cast %294 : vector<1x1x1x16xf32> to vector<1x16xf32>
    %296 = vector.broadcast %295 : vector<1x16xf32> to vector<8x16xf32>
    %297 = arith.addf %293, %296 : vector<8x16xf32>
    %cst_231 = arith.constant 2.500000e-01 : f32
    %298 = vector.broadcast %cst_231 : f32 to vector<8x16xf32>
    %299 = arith.mulf %283, %298 : vector<8x16xf32>
    %300 = tpu.transpose %290, [1, 0] : vector<8x16xf32> -> vector<16x8xf32>
    %cst_232 = arith.constant dense<0.000000e+00> : vector<8x8xf32>
    %301 = tpu.matmul %299, %300, %cst_232 {dimension_numbers = #tpu.dot_dimension_numbers<[1], [0], [0], [1], [0, 0, 1, 1], [], []>} : vector<8x16xf32>, vector<16x8xf32>, vector<8x8xf32> -> vector<8x8xf32>
    %302 = arith.addf %301, %0 : vector<8x8xf32>
    %cst_233 = arith.constant dense<0xFF800000> : vector<8xf32>
    %303 = vector.multi_reduction <maximumf>, %302, %cst_233 [1] : vector<8x8xf32> to vector<8xf32>
    %304 = vector.shape_cast %303 : vector<8xf32> to vector<8x1xf32>
    %305 = vector.broadcast %304 : vector<8x1xf32> to vector<8x8xf32>
    %306 = arith.subf %302, %305 : vector<8x8xf32>
    %307 = math.exp %306 : vector<8x8xf32>
    %cst_234 = arith.constant dense<0.000000e+00> : vector<8xf32>
    %308 = vector.multi_reduction <add>, %307, %cst_234 [1] : vector<8x8xf32> to vector<8xf32>
    %309 = vector.shape_cast %308 : vector<8xf32> to vector<8x1xf32>
    %310 = tpu.reciprocal %309 {approx = true} : vector<8x1xf32> -> vector<8x1xf32>
    %311 = vector.broadcast %310 : vector<8x1xf32> to vector<8x8xf32>
    %312 = arith.mulf %307, %311 : vector<8x8xf32>
    %cst_235 = arith.constant dense<0.000000e+00> : vector<8x16xf32>
    %313 = tpu.matmul %312, %297, %cst_235 {dimension_numbers = #tpu.dot_dimension_numbers<[1], [0], [0], [1], [0, 0, 1, 1], [], []>} : vector<8x8xf32>, vector<8x16xf32>, vector<8x16xf32> -> vector<8x16xf32>
    %c1_236 = arith.constant 1 : index
    %c0_237 = arith.constant 0 : index
    %c0_238 = arith.constant 0 : index
    %c0_239 = arith.constant 0 : index
    %314 = vector.load %arg14[%c1_236, %c0_237, %c0_238, %c0_239] : memref<2x4x16x64xf32, #tpu.memory_space<vmem>>, vector<1x1x16x64xf32>
    %315 = vector.shape_cast %314 : vector<1x1x16x64xf32> to vector<16x64xf32>
    %cst_240 = arith.constant dense<0.000000e+00> : vector<8x64xf32>
    %316 = tpu.matmul %313, %315, %cst_240 {dimension_numbers = #tpu.dot_dimension_numbers<[1], [0], [0], [1], [0, 0, 1, 1], [], []>} : vector<8x16xf32>, vector<16x64xf32>, vector<8x64xf32> -> vector<8x64xf32>
    %317 = arith.addf %276, %316 : vector<8x64xf32>
    %c1_241 = arith.constant 1 : index
    %c1_242 = arith.constant 1 : index
    %c0_243 = arith.constant 0 : index
    %c0_244 = arith.constant 0 : index
    %318 = vector.load %arg8[%c1_241, %c1_242, %c0_243, %c0_244] : memref<2x4x64x16xf32, #tpu.memory_space<vmem>>, vector<1x1x64x16xf32>
    %319 = vector.shape_cast %318 : vector<1x1x64x16xf32> to vector<64x16xf32>
    %cst_245 = arith.constant dense<0.000000e+00> : vector<8x16xf32>
    %320 = tpu.matmul %275, %319, %cst_245 {dimension_numbers = #tpu.dot_dimension_numbers<[1], [0], [0], [1], [0, 0, 1, 1], [], []>} : vector<8x64xf32>, vector<64x16xf32>, vector<8x16xf32> -> vector<8x16xf32>
    %c1_246 = arith.constant 1 : index
    %c1_247 = arith.constant 1 : index
    %c0_248 = arith.constant 0 : index
    %c0_249 = arith.constant 0 : index
    %321 = vector.load %arg11[%c1_246, %c1_247, %c0_248, %c0_249] : memref<2x4x1x16xf32, #tpu.memory_space<vmem>>, vector<1x1x1x16xf32>
    %322 = vector.shape_cast %321 : vector<1x1x1x16xf32> to vector<1x16xf32>
    %323 = vector.broadcast %322 : vector<1x16xf32> to vector<8x16xf32>
    %324 = arith.addf %320, %323 : vector<8x16xf32>
    %c1_250 = arith.constant 1 : index
    %c1_251 = arith.constant 1 : index
    %c0_252 = arith.constant 0 : index
    %c0_253 = arith.constant 0 : index
    %325 = vector.load %arg9[%c1_250, %c1_251, %c0_252, %c0_253] : memref<2x4x64x16xf32, #tpu.memory_space<vmem>>, vector<1x1x64x16xf32>
    %326 = vector.shape_cast %325 : vector<1x1x64x16xf32> to vector<64x16xf32>
    %cst_254 = arith.constant dense<0.000000e+00> : vector<8x16xf32>
    %327 = tpu.matmul %275, %326, %cst_254 {dimension_numbers = #tpu.dot_dimension_numbers<[1], [0], [0], [1], [0, 0, 1, 1], [], []>} : vector<8x64xf32>, vector<64x16xf32>, vector<8x16xf32> -> vector<8x16xf32>
    %c1_255 = arith.constant 1 : index
    %c1_256 = arith.constant 1 : index
    %c0_257 = arith.constant 0 : index
    %c0_258 = arith.constant 0 : index
    %328 = vector.load %arg12[%c1_255, %c1_256, %c0_257, %c0_258] : memref<2x4x1x16xf32, #tpu.memory_space<vmem>>, vector<1x1x1x16xf32>
    %329 = vector.shape_cast %328 : vector<1x1x1x16xf32> to vector<1x16xf32>
    %330 = vector.broadcast %329 : vector<1x16xf32> to vector<8x16xf32>
    %331 = arith.addf %327, %330 : vector<8x16xf32>
    %c1_259 = arith.constant 1 : index
    %c1_260 = arith.constant 1 : index
    %c0_261 = arith.constant 0 : index
    %c0_262 = arith.constant 0 : index
    %332 = vector.load %arg10[%c1_259, %c1_260, %c0_261, %c0_262] : memref<2x4x64x16xf32, #tpu.memory_space<vmem>>, vector<1x1x64x16xf32>
    %333 = vector.shape_cast %332 : vector<1x1x64x16xf32> to vector<64x16xf32>
    %cst_263 = arith.constant dense<0.000000e+00> : vector<8x16xf32>
    %334 = tpu.matmul %275, %333, %cst_263 {dimension_numbers = #tpu.dot_dimension_numbers<[1], [0], [0], [1], [0, 0, 1, 1], [], []>} : vector<8x64xf32>, vector<64x16xf32>, vector<8x16xf32> -> vector<8x16xf32>
    %c1_264 = arith.constant 1 : index
    %c1_265 = arith.constant 1 : index
    %c0_266 = arith.constant 0 : index
    %c0_267 = arith.constant 0 : index
    %335 = vector.load %arg13[%c1_264, %c1_265, %c0_266, %c0_267] : memref<2x4x1x16xf32, #tpu.memory_space<vmem>>, vector<1x1x1x16xf32>
    %336 = vector.shape_cast %335 : vector<1x1x1x16xf32> to vector<1x16xf32>
    %337 = vector.broadcast %336 : vector<1x16xf32> to vector<8x16xf32>
    %338 = arith.addf %334, %337 : vector<8x16xf32>
    %cst_268 = arith.constant 2.500000e-01 : f32
    %339 = vector.broadcast %cst_268 : f32 to vector<8x16xf32>
    %340 = arith.mulf %324, %339 : vector<8x16xf32>
    %341 = tpu.transpose %331, [1, 0] : vector<8x16xf32> -> vector<16x8xf32>
    %cst_269 = arith.constant dense<0.000000e+00> : vector<8x8xf32>
    %342 = tpu.matmul %340, %341, %cst_269 {dimension_numbers = #tpu.dot_dimension_numbers<[1], [0], [0], [1], [0, 0, 1, 1], [], []>} : vector<8x16xf32>, vector<16x8xf32>, vector<8x8xf32> -> vector<8x8xf32>
    %343 = arith.addf %342, %0 : vector<8x8xf32>
    %cst_270 = arith.constant dense<0xFF800000> : vector<8xf32>
    %344 = vector.multi_reduction <maximumf>, %343, %cst_270 [1] : vector<8x8xf32> to vector<8xf32>
    %345 = vector.shape_cast %344 : vector<8xf32> to vector<8x1xf32>
    %346 = vector.broadcast %345 : vector<8x1xf32> to vector<8x8xf32>
    %347 = arith.subf %343, %346 : vector<8x8xf32>
    %348 = math.exp %347 : vector<8x8xf32>
    %cst_271 = arith.constant dense<0.000000e+00> : vector<8xf32>
    %349 = vector.multi_reduction <add>, %348, %cst_271 [1] : vector<8x8xf32> to vector<8xf32>
    %350 = vector.shape_cast %349 : vector<8xf32> to vector<8x1xf32>
    %351 = tpu.reciprocal %350 {approx = true} : vector<8x1xf32> -> vector<8x1xf32>
    %352 = vector.broadcast %351 : vector<8x1xf32> to vector<8x8xf32>
    %353 = arith.mulf %348, %352 : vector<8x8xf32>
    %cst_272 = arith.constant dense<0.000000e+00> : vector<8x16xf32>
    %354 = tpu.matmul %353, %338, %cst_272 {dimension_numbers = #tpu.dot_dimension_numbers<[1], [0], [0], [1], [0, 0, 1, 1], [], []>} : vector<8x8xf32>, vector<8x16xf32>, vector<8x16xf32> -> vector<8x16xf32>
    %c1_273 = arith.constant 1 : index
    %c1_274 = arith.constant 1 : index
    %c0_275 = arith.constant 0 : index
    %c0_276 = arith.constant 0 : index
    %355 = vector.load %arg14[%c1_273, %c1_274, %c0_275, %c0_276] : memref<2x4x16x64xf32, #tpu.memory_space<vmem>>, vector<1x1x16x64xf32>
    %356 = vector.shape_cast %355 : vector<1x1x16x64xf32> to vector<16x64xf32>
    %cst_277 = arith.constant dense<0.000000e+00> : vector<8x64xf32>
    %357 = tpu.matmul %354, %356, %cst_277 {dimension_numbers = #tpu.dot_dimension_numbers<[1], [0], [0], [1], [0, 0, 1, 1], [], []>} : vector<8x16xf32>, vector<16x64xf32>, vector<8x64xf32> -> vector<8x64xf32>
    %358 = arith.addf %317, %357 : vector<8x64xf32>
    %c1_278 = arith.constant 1 : index
    %c2_279 = arith.constant 2 : index
    %c0_280 = arith.constant 0 : index
    %c0_281 = arith.constant 0 : index
    %359 = vector.load %arg8[%c1_278, %c2_279, %c0_280, %c0_281] : memref<2x4x64x16xf32, #tpu.memory_space<vmem>>, vector<1x1x64x16xf32>
    %360 = vector.shape_cast %359 : vector<1x1x64x16xf32> to vector<64x16xf32>
    %cst_282 = arith.constant dense<0.000000e+00> : vector<8x16xf32>
    %361 = tpu.matmul %275, %360, %cst_282 {dimension_numbers = #tpu.dot_dimension_numbers<[1], [0], [0], [1], [0, 0, 1, 1], [], []>} : vector<8x64xf32>, vector<64x16xf32>, vector<8x16xf32> -> vector<8x16xf32>
    %c1_283 = arith.constant 1 : index
    %c2_284 = arith.constant 2 : index
    %c0_285 = arith.constant 0 : index
    %c0_286 = arith.constant 0 : index
    %362 = vector.load %arg11[%c1_283, %c2_284, %c0_285, %c0_286] : memref<2x4x1x16xf32, #tpu.memory_space<vmem>>, vector<1x1x1x16xf32>
    %363 = vector.shape_cast %362 : vector<1x1x1x16xf32> to vector<1x16xf32>
    %364 = vector.broadcast %363 : vector<1x16xf32> to vector<8x16xf32>
    %365 = arith.addf %361, %364 : vector<8x16xf32>
    %c1_287 = arith.constant 1 : index
    %c2_288 = arith.constant 2 : index
    %c0_289 = arith.constant 0 : index
    %c0_290 = arith.constant 0 : index
    %366 = vector.load %arg9[%c1_287, %c2_288, %c0_289, %c0_290] : memref<2x4x64x16xf32, #tpu.memory_space<vmem>>, vector<1x1x64x16xf32>
    %367 = vector.shape_cast %366 : vector<1x1x64x16xf32> to vector<64x16xf32>
    %cst_291 = arith.constant dense<0.000000e+00> : vector<8x16xf32>
    %368 = tpu.matmul %275, %367, %cst_291 {dimension_numbers = #tpu.dot_dimension_numbers<[1], [0], [0], [1], [0, 0, 1, 1], [], []>} : vector<8x64xf32>, vector<64x16xf32>, vector<8x16xf32> -> vector<8x16xf32>
    %c1_292 = arith.constant 1 : index
    %c2_293 = arith.constant 2 : index
    %c0_294 = arith.constant 0 : index
    %c0_295 = arith.constant 0 : index
    %369 = vector.load %arg12[%c1_292, %c2_293, %c0_294, %c0_295] : memref<2x4x1x16xf32, #tpu.memory_space<vmem>>, vector<1x1x1x16xf32>
    %370 = vector.shape_cast %369 : vector<1x1x1x16xf32> to vector<1x16xf32>
    %371 = vector.broadcast %370 : vector<1x16xf32> to vector<8x16xf32>
    %372 = arith.addf %368, %371 : vector<8x16xf32>
    %c1_296 = arith.constant 1 : index
    %c2_297 = arith.constant 2 : index
    %c0_298 = arith.constant 0 : index
    %c0_299 = arith.constant 0 : index
    %373 = vector.load %arg10[%c1_296, %c2_297, %c0_298, %c0_299] : memref<2x4x64x16xf32, #tpu.memory_space<vmem>>, vector<1x1x64x16xf32>
    %374 = vector.shape_cast %373 : vector<1x1x64x16xf32> to vector<64x16xf32>
    %cst_300 = arith.constant dense<0.000000e+00> : vector<8x16xf32>
    %375 = tpu.matmul %275, %374, %cst_300 {dimension_numbers = #tpu.dot_dimension_numbers<[1], [0], [0], [1], [0, 0, 1, 1], [], []>} : vector<8x64xf32>, vector<64x16xf32>, vector<8x16xf32> -> vector<8x16xf32>
    %c1_301 = arith.constant 1 : index
    %c2_302 = arith.constant 2 : index
    %c0_303 = arith.constant 0 : index
    %c0_304 = arith.constant 0 : index
    %376 = vector.load %arg13[%c1_301, %c2_302, %c0_303, %c0_304] : memref<2x4x1x16xf32, #tpu.memory_space<vmem>>, vector<1x1x1x16xf32>
    %377 = vector.shape_cast %376 : vector<1x1x1x16xf32> to vector<1x16xf32>
    %378 = vector.broadcast %377 : vector<1x16xf32> to vector<8x16xf32>
    %379 = arith.addf %375, %378 : vector<8x16xf32>
    %cst_305 = arith.constant 2.500000e-01 : f32
    %380 = vector.broadcast %cst_305 : f32 to vector<8x16xf32>
    %381 = arith.mulf %365, %380 : vector<8x16xf32>
    %382 = tpu.transpose %372, [1, 0] : vector<8x16xf32> -> vector<16x8xf32>
    %cst_306 = arith.constant dense<0.000000e+00> : vector<8x8xf32>
    %383 = tpu.matmul %381, %382, %cst_306 {dimension_numbers = #tpu.dot_dimension_numbers<[1], [0], [0], [1], [0, 0, 1, 1], [], []>} : vector<8x16xf32>, vector<16x8xf32>, vector<8x8xf32> -> vector<8x8xf32>
    %384 = arith.addf %383, %0 : vector<8x8xf32>
    %cst_307 = arith.constant dense<0xFF800000> : vector<8xf32>
    %385 = vector.multi_reduction <maximumf>, %384, %cst_307 [1] : vector<8x8xf32> to vector<8xf32>
    %386 = vector.shape_cast %385 : vector<8xf32> to vector<8x1xf32>
    %387 = vector.broadcast %386 : vector<8x1xf32> to vector<8x8xf32>
    %388 = arith.subf %384, %387 : vector<8x8xf32>
    %389 = math.exp %388 : vector<8x8xf32>
    %cst_308 = arith.constant dense<0.000000e+00> : vector<8xf32>
    %390 = vector.multi_reduction <add>, %389, %cst_308 [1] : vector<8x8xf32> to vector<8xf32>
    %391 = vector.shape_cast %390 : vector<8xf32> to vector<8x1xf32>
    %392 = tpu.reciprocal %391 {approx = true} : vector<8x1xf32> -> vector<8x1xf32>
    %393 = vector.broadcast %392 : vector<8x1xf32> to vector<8x8xf32>
    %394 = arith.mulf %389, %393 : vector<8x8xf32>
    %cst_309 = arith.constant dense<0.000000e+00> : vector<8x16xf32>
    %395 = tpu.matmul %394, %379, %cst_309 {dimension_numbers = #tpu.dot_dimension_numbers<[1], [0], [0], [1], [0, 0, 1, 1], [], []>} : vector<8x8xf32>, vector<8x16xf32>, vector<8x16xf32> -> vector<8x16xf32>
    %c1_310 = arith.constant 1 : index
    %c2_311 = arith.constant 2 : index
    %c0_312 = arith.constant 0 : index
    %c0_313 = arith.constant 0 : index
    %396 = vector.load %arg14[%c1_310, %c2_311, %c0_312, %c0_313] : memref<2x4x16x64xf32, #tpu.memory_space<vmem>>, vector<1x1x16x64xf32>
    %397 = vector.shape_cast %396 : vector<1x1x16x64xf32> to vector<16x64xf32>
    %cst_314 = arith.constant dense<0.000000e+00> : vector<8x64xf32>
    %398 = tpu.matmul %395, %397, %cst_314 {dimension_numbers = #tpu.dot_dimension_numbers<[1], [0], [0], [1], [0, 0, 1, 1], [], []>} : vector<8x16xf32>, vector<16x64xf32>, vector<8x64xf32> -> vector<8x64xf32>
    %399 = arith.addf %358, %398 : vector<8x64xf32>
    %c1_315 = arith.constant 1 : index
    %c3_316 = arith.constant 3 : index
    %c0_317 = arith.constant 0 : index
    %c0_318 = arith.constant 0 : index
    %400 = vector.load %arg8[%c1_315, %c3_316, %c0_317, %c0_318] : memref<2x4x64x16xf32, #tpu.memory_space<vmem>>, vector<1x1x64x16xf32>
    %401 = vector.shape_cast %400 : vector<1x1x64x16xf32> to vector<64x16xf32>
    %cst_319 = arith.constant dense<0.000000e+00> : vector<8x16xf32>
    %402 = tpu.matmul %275, %401, %cst_319 {dimension_numbers = #tpu.dot_dimension_numbers<[1], [0], [0], [1], [0, 0, 1, 1], [], []>} : vector<8x64xf32>, vector<64x16xf32>, vector<8x16xf32> -> vector<8x16xf32>
    %c1_320 = arith.constant 1 : index
    %c3_321 = arith.constant 3 : index
    %c0_322 = arith.constant 0 : index
    %c0_323 = arith.constant 0 : index
    %403 = vector.load %arg11[%c1_320, %c3_321, %c0_322, %c0_323] : memref<2x4x1x16xf32, #tpu.memory_space<vmem>>, vector<1x1x1x16xf32>
    %404 = vector.shape_cast %403 : vector<1x1x1x16xf32> to vector<1x16xf32>
    %405 = vector.broadcast %404 : vector<1x16xf32> to vector<8x16xf32>
    %406 = arith.addf %402, %405 : vector<8x16xf32>
    %c1_324 = arith.constant 1 : index
    %c3_325 = arith.constant 3 : index
    %c0_326 = arith.constant 0 : index
    %c0_327 = arith.constant 0 : index
    %407 = vector.load %arg9[%c1_324, %c3_325, %c0_326, %c0_327] : memref<2x4x64x16xf32, #tpu.memory_space<vmem>>, vector<1x1x64x16xf32>
    %408 = vector.shape_cast %407 : vector<1x1x64x16xf32> to vector<64x16xf32>
    %cst_328 = arith.constant dense<0.000000e+00> : vector<8x16xf32>
    %409 = tpu.matmul %275, %408, %cst_328 {dimension_numbers = #tpu.dot_dimension_numbers<[1], [0], [0], [1], [0, 0, 1, 1], [], []>} : vector<8x64xf32>, vector<64x16xf32>, vector<8x16xf32> -> vector<8x16xf32>
    %c1_329 = arith.constant 1 : index
    %c3_330 = arith.constant 3 : index
    %c0_331 = arith.constant 0 : index
    %c0_332 = arith.constant 0 : index
    %410 = vector.load %arg12[%c1_329, %c3_330, %c0_331, %c0_332] : memref<2x4x1x16xf32, #tpu.memory_space<vmem>>, vector<1x1x1x16xf32>
    %411 = vector.shape_cast %410 : vector<1x1x1x16xf32> to vector<1x16xf32>
    %412 = vector.broadcast %411 : vector<1x16xf32> to vector<8x16xf32>
    %413 = arith.addf %409, %412 : vector<8x16xf32>
    %c1_333 = arith.constant 1 : index
    %c3_334 = arith.constant 3 : index
    %c0_335 = arith.constant 0 : index
    %c0_336 = arith.constant 0 : index
    %414 = vector.load %arg10[%c1_333, %c3_334, %c0_335, %c0_336] : memref<2x4x64x16xf32, #tpu.memory_space<vmem>>, vector<1x1x64x16xf32>
    %415 = vector.shape_cast %414 : vector<1x1x64x16xf32> to vector<64x16xf32>
    %cst_337 = arith.constant dense<0.000000e+00> : vector<8x16xf32>
    %416 = tpu.matmul %275, %415, %cst_337 {dimension_numbers = #tpu.dot_dimension_numbers<[1], [0], [0], [1], [0, 0, 1, 1], [], []>} : vector<8x64xf32>, vector<64x16xf32>, vector<8x16xf32> -> vector<8x16xf32>
    %c1_338 = arith.constant 1 : index
    %c3_339 = arith.constant 3 : index
    %c0_340 = arith.constant 0 : index
    %c0_341 = arith.constant 0 : index
    %417 = vector.load %arg13[%c1_338, %c3_339, %c0_340, %c0_341] : memref<2x4x1x16xf32, #tpu.memory_space<vmem>>, vector<1x1x1x16xf32>
    %418 = vector.shape_cast %417 : vector<1x1x1x16xf32> to vector<1x16xf32>
    %419 = vector.broadcast %418 : vector<1x16xf32> to vector<8x16xf32>
    %420 = arith.addf %416, %419 : vector<8x16xf32>
    %cst_342 = arith.constant 2.500000e-01 : f32
    %421 = vector.broadcast %cst_342 : f32 to vector<8x16xf32>
    %422 = arith.mulf %406, %421 : vector<8x16xf32>
    %423 = tpu.transpose %413, [1, 0] : vector<8x16xf32> -> vector<16x8xf32>
    %cst_343 = arith.constant dense<0.000000e+00> : vector<8x8xf32>
    %424 = tpu.matmul %422, %423, %cst_343 {dimension_numbers = #tpu.dot_dimension_numbers<[1], [0], [0], [1], [0, 0, 1, 1], [], []>} : vector<8x16xf32>, vector<16x8xf32>, vector<8x8xf32> -> vector<8x8xf32>
    %425 = arith.addf %424, %0 : vector<8x8xf32>
    %cst_344 = arith.constant dense<0xFF800000> : vector<8xf32>
    %426 = vector.multi_reduction <maximumf>, %425, %cst_344 [1] : vector<8x8xf32> to vector<8xf32>
    %427 = vector.shape_cast %426 : vector<8xf32> to vector<8x1xf32>
    %428 = vector.broadcast %427 : vector<8x1xf32> to vector<8x8xf32>
    %429 = arith.subf %425, %428 : vector<8x8xf32>
    %430 = math.exp %429 : vector<8x8xf32>
    %cst_345 = arith.constant dense<0.000000e+00> : vector<8xf32>
    %431 = vector.multi_reduction <add>, %430, %cst_345 [1] : vector<8x8xf32> to vector<8xf32>
    %432 = vector.shape_cast %431 : vector<8xf32> to vector<8x1xf32>
    %433 = tpu.reciprocal %432 {approx = true} : vector<8x1xf32> -> vector<8x1xf32>
    %434 = vector.broadcast %433 : vector<8x1xf32> to vector<8x8xf32>
    %435 = arith.mulf %430, %434 : vector<8x8xf32>
    %cst_346 = arith.constant dense<0.000000e+00> : vector<8x16xf32>
    %436 = tpu.matmul %435, %420, %cst_346 {dimension_numbers = #tpu.dot_dimension_numbers<[1], [0], [0], [1], [0, 0, 1, 1], [], []>} : vector<8x8xf32>, vector<8x16xf32>, vector<8x16xf32> -> vector<8x16xf32>
    %c1_347 = arith.constant 1 : index
    %c3_348 = arith.constant 3 : index
    %c0_349 = arith.constant 0 : index
    %c0_350 = arith.constant 0 : index
    %437 = vector.load %arg14[%c1_347, %c3_348, %c0_349, %c0_350] : memref<2x4x16x64xf32, #tpu.memory_space<vmem>>, vector<1x1x16x64xf32>
    %438 = vector.shape_cast %437 : vector<1x1x16x64xf32> to vector<16x64xf32>
    %cst_351 = arith.constant dense<0.000000e+00> : vector<8x64xf32>
    %439 = tpu.matmul %436, %438, %cst_351 {dimension_numbers = #tpu.dot_dimension_numbers<[1], [0], [0], [1], [0, 0, 1, 1], [], []>} : vector<8x16xf32>, vector<16x64xf32>, vector<8x64xf32> -> vector<8x64xf32>
    %440 = arith.addf %399, %439 : vector<8x64xf32>
    %441 = arith.addf %249, %440 : vector<8x64xf32>
    %c1_352 = arith.constant 1 : index
    %c0_353 = arith.constant 0 : index
    %c0_354 = arith.constant 0 : index
    %442 = vector.load %arg15[%c1_352, %c0_353, %c0_354] : memref<2x1x64xf32, #tpu.memory_space<vmem>>, vector<1x1x64xf32>
    %443 = vector.shape_cast %442 : vector<1x1x64xf32> to vector<1x64xf32>
    %444 = vector.broadcast %443 : vector<1x64xf32> to vector<8x64xf32>
    %445 = arith.addf %441, %444 : vector<8x64xf32>
    %c1_355 = arith.constant 1 : index
    %c0_356 = arith.constant 0 : index
    %c0_357 = arith.constant 0 : index
    %446 = vector.load %arg16[%c1_355, %c0_356, %c0_357] : memref<2x1x64xf32, #tpu.memory_space<vmem>>, vector<1x1x64xf32>
    %447 = vector.shape_cast %446 : vector<1x1x64xf32> to vector<1x64xf32>
    %c1_358 = arith.constant 1 : index
    %c0_359 = arith.constant 0 : index
    %c0_360 = arith.constant 0 : index
    %448 = vector.load %arg17[%c1_358, %c0_359, %c0_360] : memref<2x1x64xf32, #tpu.memory_space<vmem>>, vector<1x1x64xf32>
    %449 = vector.shape_cast %448 : vector<1x1x64xf32> to vector<1x64xf32>
    %cst_361 = arith.constant dense<0.000000e+00> : vector<8xf32>
    %450 = vector.multi_reduction <add>, %445, %cst_361 [1] : vector<8x64xf32> to vector<8xf32>
    %451 = vector.shape_cast %450 : vector<8xf32> to vector<8x1xf32>
    %cst_362 = arith.constant 6.400000e+01 : f32
    %452 = vector.broadcast %cst_362 : f32 to vector<8x1xf32>
    %453 = arith.divf %451, %452 : vector<8x1xf32>
    %454 = vector.broadcast %453 : vector<8x1xf32> to vector<8x64xf32>
    %455 = arith.subf %445, %454 : vector<8x64xf32>
    %456 = arith.mulf %455, %455 : vector<8x64xf32>
    %cst_363 = arith.constant dense<0.000000e+00> : vector<8xf32>
    %457 = vector.multi_reduction <add>, %456, %cst_363 [1] : vector<8x64xf32> to vector<8xf32>
    %458 = vector.shape_cast %457 : vector<8xf32> to vector<8x1xf32>
    %cst_364 = arith.constant 6.400000e+01 : f32
    %459 = vector.broadcast %cst_364 : f32 to vector<8x1xf32>
    %460 = arith.divf %458, %459 : vector<8x1xf32>
    %461 = vector.broadcast %453 : vector<8x1xf32> to vector<8x64xf32>
    %462 = arith.subf %445, %461 : vector<8x64xf32>
    %cst_365 = arith.constant 9.99999974E-6 : f32
    %463 = vector.broadcast %cst_365 : f32 to vector<8x1xf32>
    %464 = arith.addf %460, %463 : vector<8x1xf32>
    %465 = math.rsqrt %464 : vector<8x1xf32>
    %466 = vector.broadcast %465 : vector<8x1xf32> to vector<8x64xf32>
    %467 = arith.mulf %462, %466 : vector<8x64xf32>
    %468 = vector.broadcast %447 : vector<1x64xf32> to vector<8x64xf32>
    %469 = arith.mulf %467, %468 : vector<8x64xf32>
    %470 = vector.broadcast %449 : vector<1x64xf32> to vector<8x64xf32>
    %471 = arith.addf %469, %470 : vector<8x64xf32>
    %c1_366 = arith.constant 1 : index
    %c0_367 = arith.constant 0 : index
    %c0_368 = arith.constant 0 : index
    %472 = vector.load %arg18[%c1_366, %c0_367, %c0_368] : memref<2x64x256xf32, #tpu.memory_space<vmem>>, vector<1x64x256xf32>
    %473 = vector.shape_cast %472 : vector<1x64x256xf32> to vector<64x256xf32>
    %cst_369 = arith.constant dense<0.000000e+00> : vector<8x256xf32>
    %474 = tpu.matmul %471, %473, %cst_369 {dimension_numbers = #tpu.dot_dimension_numbers<[1], [0], [0], [1], [0, 0, 1, 1], [], []>} : vector<8x64xf32>, vector<64x256xf32>, vector<8x256xf32> -> vector<8x256xf32>
    %c1_370 = arith.constant 1 : index
    %c0_371 = arith.constant 0 : index
    %c0_372 = arith.constant 0 : index
    %475 = vector.load %arg19[%c1_370, %c0_371, %c0_372] : memref<2x1x256xf32, #tpu.memory_space<vmem>>, vector<1x1x256xf32>
    %476 = vector.shape_cast %475 : vector<1x1x256xf32> to vector<1x256xf32>
    %477 = vector.broadcast %476 : vector<1x256xf32> to vector<8x256xf32>
    %478 = arith.addf %474, %477 : vector<8x256xf32>
    %cst_373 = arith.constant 1.702000e+00 : f32
    %479 = vector.broadcast %cst_373 : f32 to vector<8x256xf32>
    %480 = arith.mulf %479, %478 : vector<8x256xf32>
    %481 = arith.negf %480 : vector<8x256xf32>
    %482 = math.exp %481 : vector<8x256xf32>
    %cst_374 = arith.constant 1.000000e+00 : f32
    %483 = vector.broadcast %cst_374 : f32 to vector<8x256xf32>
    %484 = arith.addf %483, %482 : vector<8x256xf32>
    %485 = arith.divf %483, %484 : vector<8x256xf32>
    %486 = arith.mulf %478, %485 : vector<8x256xf32>
    %c1_375 = arith.constant 1 : index
    %c0_376 = arith.constant 0 : index
    %c0_377 = arith.constant 0 : index
    %487 = vector.load %arg20[%c1_375, %c0_376, %c0_377] : memref<2x256x64xf32, #tpu.memory_space<vmem>>, vector<1x256x64xf32>
    %488 = vector.shape_cast %487 : vector<1x256x64xf32> to vector<256x64xf32>
    %cst_378 = arith.constant dense<0.000000e+00> : vector<8x64xf32>
    %489 = tpu.matmul %486, %488, %cst_378 {dimension_numbers = #tpu.dot_dimension_numbers<[1], [0], [0], [1], [0, 0, 1, 1], [], []>} : vector<8x256xf32>, vector<256x64xf32>, vector<8x64xf32> -> vector<8x64xf32>
    %490 = arith.addf %445, %489 : vector<8x64xf32>
    %c1_379 = arith.constant 1 : index
    %c0_380 = arith.constant 0 : index
    %c0_381 = arith.constant 0 : index
    %491 = vector.load %arg21[%c1_379, %c0_380, %c0_381] : memref<2x1x64xf32, #tpu.memory_space<vmem>>, vector<1x1x64xf32>
    %492 = vector.shape_cast %491 : vector<1x1x64xf32> to vector<1x64xf32>
    %493 = vector.broadcast %492 : vector<1x64xf32> to vector<8x64xf32>
    %494 = arith.addf %490, %493 : vector<8x64xf32>
    %495 = tpu.transpose %494, [1, 0] : vector<8x64xf32> -> vector<64x8xf32>
    %cst_382 = arith.constant dense<0.000000e+00> : vector<8x8xf32>
    %496 = tpu.matmul %494, %495, %cst_382 {dimension_numbers = #tpu.dot_dimension_numbers<[1], [0], [0], [1], [0, 0, 1, 1], [], []>} : vector<8x64xf32>, vector<64x8xf32>, vector<8x8xf32> -> vector<8x8xf32>
    %497 = arith.mulf %494, %494 : vector<8x64xf32>
    %cst_383 = arith.constant dense<0.000000e+00> : vector<8xf32>
    %498 = vector.multi_reduction <add>, %497, %cst_383 [1] : vector<8x64xf32> to vector<8xf32>
    %499 = vector.shape_cast %498 : vector<8xf32> to vector<8x1xf32>
    %500 = math.sqrt %499 : vector<8x1xf32>
    %501 = tpu.transpose %500, [1, 0] : vector<8x1xf32> -> vector<1x8xf32>
    %502 = vector.broadcast %500 : vector<8x1xf32> to vector<8x8xf32>
    %503 = vector.broadcast %501 : vector<1x8xf32> to vector<8x8xf32>
    %504 = arith.mulf %502, %503 : vector<8x8xf32>
    %cst_384 = arith.constant 9.99999968E-21 : f32
    %505 = vector.broadcast %cst_384 : f32 to vector<8x8xf32>
    %506 = arith.addf %504, %505 : vector<8x8xf32>
    %507 = arith.divf %496, %506 : vector<8x8xf32>
    %cst_385 = arith.constant 0.699999988 : f32
    %508 = vector.broadcast %cst_385 : f32 to vector<8x8xf32>
    %509 = arith.cmpf ogt, %507, %508 : vector<8x8xf32>
    %cst_386 = arith.constant 0.000000e+00 : f32
    %510 = vector.broadcast %cst_386 : f32 to vector<8x8xf32>
    %511 = arith.select %509, %507, %510 : vector<8x8xi1>, vector<8x8xf32>
    %cst_387 = arith.constant dense<0xFF800000> : vector<8xf32>
    %512 = vector.multi_reduction <maximumf>, %511, %cst_387 [1] : vector<8x8xf32> to vector<8xf32>
    %513 = vector.shape_cast %512 : vector<8xf32> to vector<8x1xf32>
    %514 = vector.broadcast %513 : vector<8x1xf32> to vector<8x8xf32>
    %515 = arith.subf %511, %514 : vector<8x8xf32>
    %516 = math.exp %515 : vector<8x8xf32>
    %cst_388 = arith.constant dense<0.000000e+00> : vector<8xf32>
    %517 = vector.multi_reduction <add>, %516, %cst_388 [1] : vector<8x8xf32> to vector<8xf32>
    %518 = vector.shape_cast %517 : vector<8xf32> to vector<8x1xf32>
    %519 = tpu.reciprocal %518 {approx = true} : vector<8x1xf32> -> vector<8x1xf32>
    %520 = vector.broadcast %519 : vector<8x1xf32> to vector<8x8xf32>
    %521 = arith.mulf %516, %520 : vector<8x8xf32>
    %c0_389 = arith.constant 0 : index
    %c0_390 = arith.constant 0 : index
    %522 = vector.load %arg4[%c0_389, %c0_390] : memref<8x8xf32, #tpu.memory_space<vmem>>, vector<8x8xf32>
    %c0_391 = arith.constant 0 : index
    %c0_392 = arith.constant 0 : index
    %523 = vector.load %arg22[%c0_391, %c0_392] : memref<64x32xf32, #tpu.memory_space<vmem>>, vector<64x32xf32>
    %cst_393 = arith.constant dense<0.000000e+00> : vector<8x32xf32>
    %524 = tpu.matmul %494, %523, %cst_393 {dimension_numbers = #tpu.dot_dimension_numbers<[1], [0], [0], [1], [0, 0, 1, 1], [], []>} : vector<8x64xf32>, vector<64x32xf32>, vector<8x32xf32> -> vector<8x32xf32>
    %cst_394 = arith.constant dense<0.000000e+00> : vector<8x32xf32>
    %525 = tpu.matmul %521, %524, %cst_394 {dimension_numbers = #tpu.dot_dimension_numbers<[1], [0], [0], [1], [0, 0, 1, 1], [], []>} : vector<8x8xf32>, vector<8x32xf32>, vector<8x32xf32> -> vector<8x32xf32>
    %c0_395 = arith.constant 0 : index
    %c0_396 = arith.constant 0 : index
    %526 = vector.load %arg23[%c0_395, %c0_396] : memref<64x32xf32, #tpu.memory_space<vmem>>, vector<64x32xf32>
    %cst_397 = arith.constant dense<0.000000e+00> : vector<8x32xf32>
    %527 = tpu.matmul %494, %526, %cst_397 {dimension_numbers = #tpu.dot_dimension_numbers<[1], [0], [0], [1], [0, 0, 1, 1], [], []>} : vector<8x64xf32>, vector<64x32xf32>, vector<8x32xf32> -> vector<8x32xf32>
    %c0_398 = arith.constant 0 : index
    %c0_399 = arith.constant 0 : index
    %528 = vector.load %arg24[%c0_398, %c0_399] : memref<1x32xf32, #tpu.memory_space<vmem>>, vector<1x32xf32>
    %529 = vector.broadcast %528 : vector<1x32xf32> to vector<8x32xf32>
    %530 = arith.addf %527, %529 : vector<8x32xf32>
    %531 = arith.addf %525, %530 : vector<8x32xf32>
    %cst_400 = arith.constant 1.702000e+00 : f32
    %532 = vector.broadcast %cst_400 : f32 to vector<8x32xf32>
    %533 = arith.mulf %532, %531 : vector<8x32xf32>
    %534 = arith.negf %533 : vector<8x32xf32>
    %535 = math.exp %534 : vector<8x32xf32>
    %cst_401 = arith.constant 1.000000e+00 : f32
    %536 = vector.broadcast %cst_401 : f32 to vector<8x32xf32>
    %537 = arith.addf %536, %535 : vector<8x32xf32>
    %538 = arith.divf %536, %537 : vector<8x32xf32>
    %539 = arith.mulf %531, %538 : vector<8x32xf32>
    %c0_402 = arith.constant 0 : index
    %c0_403 = arith.constant 0 : index
    %540 = vector.load %arg26[%c0_402, %c0_403] : memref<64x32xf32, #tpu.memory_space<vmem>>, vector<64x32xf32>
    %cst_404 = arith.constant dense<0.000000e+00> : vector<8x32xf32>
    %541 = tpu.matmul %494, %540, %cst_404 {dimension_numbers = #tpu.dot_dimension_numbers<[1], [0], [0], [1], [0, 0, 1, 1], [], []>} : vector<8x64xf32>, vector<64x32xf32>, vector<8x32xf32> -> vector<8x32xf32>
    %cst_405 = arith.constant dense<0.000000e+00> : vector<8x32xf32>
    %542 = tpu.matmul %522, %541, %cst_405 {dimension_numbers = #tpu.dot_dimension_numbers<[1], [0], [0], [1], [0, 0, 1, 1], [], []>} : vector<8x8xf32>, vector<8x32xf32>, vector<8x32xf32> -> vector<8x32xf32>
    %c0_406 = arith.constant 0 : index
    %c0_407 = arith.constant 0 : index
    %543 = vector.load %arg27[%c0_406, %c0_407] : memref<64x32xf32, #tpu.memory_space<vmem>>, vector<64x32xf32>
    %cst_408 = arith.constant dense<0.000000e+00> : vector<8x32xf32>
    %544 = tpu.matmul %494, %543, %cst_408 {dimension_numbers = #tpu.dot_dimension_numbers<[1], [0], [0], [1], [0, 0, 1, 1], [], []>} : vector<8x64xf32>, vector<64x32xf32>, vector<8x32xf32> -> vector<8x32xf32>
    %c0_409 = arith.constant 0 : index
    %c0_410 = arith.constant 0 : index
    %545 = vector.load %arg28[%c0_409, %c0_410] : memref<1x32xf32, #tpu.memory_space<vmem>>, vector<1x32xf32>
    %546 = vector.broadcast %545 : vector<1x32xf32> to vector<8x32xf32>
    %547 = arith.addf %544, %546 : vector<8x32xf32>
    %548 = arith.addf %542, %547 : vector<8x32xf32>
    %cst_411 = arith.constant 1.702000e+00 : f32
    %549 = vector.broadcast %cst_411 : f32 to vector<8x32xf32>
    %550 = arith.mulf %549, %548 : vector<8x32xf32>
    %551 = arith.negf %550 : vector<8x32xf32>
    %552 = math.exp %551 : vector<8x32xf32>
    %cst_412 = arith.constant 1.000000e+00 : f32
    %553 = vector.broadcast %cst_412 : f32 to vector<8x32xf32>
    %554 = arith.addf %553, %552 : vector<8x32xf32>
    %555 = arith.divf %553, %554 : vector<8x32xf32>
    %556 = arith.mulf %548, %555 : vector<8x32xf32>
    %c0_413 = arith.constant 0 : index
    %c0_414 = arith.constant 0 : index
    %557 = vector.load %arg25[%c0_413, %c0_414] : memref<32x32xf32, #tpu.memory_space<vmem>>, vector<32x32xf32>
    %cst_415 = arith.constant dense<0.000000e+00> : vector<8x32xf32>
    %558 = tpu.matmul %539, %557, %cst_415 {dimension_numbers = #tpu.dot_dimension_numbers<[1], [0], [0], [1], [0, 0, 1, 1], [], []>} : vector<8x32xf32>, vector<32x32xf32>, vector<8x32xf32> -> vector<8x32xf32>
    %cst_416 = arith.constant dense<0.000000e+00> : vector<8x32xf32>
    %559 = tpu.matmul %521, %558, %cst_416 {dimension_numbers = #tpu.dot_dimension_numbers<[1], [0], [0], [1], [0, 0, 1, 1], [], []>} : vector<8x8xf32>, vector<8x32xf32>, vector<8x32xf32> -> vector<8x32xf32>
    %560 = arith.addf %559, %539 : vector<8x32xf32>
    %cst_417 = arith.constant 1.702000e+00 : f32
    %561 = vector.broadcast %cst_417 : f32 to vector<8x32xf32>
    %562 = arith.mulf %561, %560 : vector<8x32xf32>
    %563 = arith.negf %562 : vector<8x32xf32>
    %564 = math.exp %563 : vector<8x32xf32>
    %cst_418 = arith.constant 1.000000e+00 : f32
    %565 = vector.broadcast %cst_418 : f32 to vector<8x32xf32>
    %566 = arith.addf %565, %564 : vector<8x32xf32>
    %567 = arith.divf %565, %566 : vector<8x32xf32>
    %568 = arith.mulf %560, %567 : vector<8x32xf32>
    %c0_419 = arith.constant 0 : index
    %c0_420 = arith.constant 0 : index
    %569 = vector.load %arg29[%c0_419, %c0_420] : memref<32x32xf32, #tpu.memory_space<vmem>>, vector<32x32xf32>
    %cst_421 = arith.constant dense<0.000000e+00> : vector<8x32xf32>
    %570 = tpu.matmul %556, %569, %cst_421 {dimension_numbers = #tpu.dot_dimension_numbers<[1], [0], [0], [1], [0, 0, 1, 1], [], []>} : vector<8x32xf32>, vector<32x32xf32>, vector<8x32xf32> -> vector<8x32xf32>
    %cst_422 = arith.constant dense<0.000000e+00> : vector<8x32xf32>
    %571 = tpu.matmul %522, %570, %cst_422 {dimension_numbers = #tpu.dot_dimension_numbers<[1], [0], [0], [1], [0, 0, 1, 1], [], []>} : vector<8x8xf32>, vector<8x32xf32>, vector<8x32xf32> -> vector<8x32xf32>
    %572 = arith.addf %571, %556 : vector<8x32xf32>
    %cst_423 = arith.constant 1.702000e+00 : f32
    %573 = vector.broadcast %cst_423 : f32 to vector<8x32xf32>
    %574 = arith.mulf %573, %572 : vector<8x32xf32>
    %575 = arith.negf %574 : vector<8x32xf32>
    %576 = math.exp %575 : vector<8x32xf32>
    %cst_424 = arith.constant 1.000000e+00 : f32
    %577 = vector.broadcast %cst_424 : f32 to vector<8x32xf32>
    %578 = arith.addf %577, %576 : vector<8x32xf32>
    %579 = arith.divf %577, %578 : vector<8x32xf32>
    %580 = arith.mulf %572, %579 : vector<8x32xf32>
    %c0_425 = arith.constant 0 : index
    %c0_426 = arith.constant 0 : index
    %581 = vector.load %arg30[%c0_425, %c0_426] : memref<32x64xf32, #tpu.memory_space<vmem>>, vector<32x64xf32>
    %cst_427 = arith.constant dense<0.000000e+00> : vector<8x64xf32>
    %582 = tpu.matmul %568, %581, %cst_427 {dimension_numbers = #tpu.dot_dimension_numbers<[1], [0], [0], [1], [0, 0, 1, 1], [], []>} : vector<8x32xf32>, vector<32x64xf32>, vector<8x64xf32> -> vector<8x64xf32>
    %c0_428 = arith.constant 0 : index
    %c0_429 = arith.constant 0 : index
    %583 = vector.load %arg31[%c0_428, %c0_429] : memref<32x64xf32, #tpu.memory_space<vmem>>, vector<32x64xf32>
    %cst_430 = arith.constant dense<0.000000e+00> : vector<8x64xf32>
    %584 = tpu.matmul %580, %583, %cst_430 {dimension_numbers = #tpu.dot_dimension_numbers<[1], [0], [0], [1], [0, 0, 1, 1], [], []>} : vector<8x32xf32>, vector<32x64xf32>, vector<8x64xf32> -> vector<8x64xf32>
    %585 = arith.addf %582, %584 : vector<8x64xf32>
    %c0_431 = arith.constant 0 : index
    %c0_432 = arith.constant 0 : index
    %586 = vector.load %arg32[%c0_431, %c0_432] : memref<1x64xf32, #tpu.memory_space<vmem>>, vector<1x64xf32>
    %587 = vector.broadcast %586 : vector<1x64xf32> to vector<8x64xf32>
    %588 = arith.addf %585, %587 : vector<8x64xf32>
    %c0_433 = arith.constant 0 : index
    %c0_434 = arith.constant 0 : index
    %589 = vector.load %arg33[%c0_433, %c0_434] : memref<64x256xf32, #tpu.memory_space<vmem>>, vector<64x256xf32>
    %cst_435 = arith.constant dense<0.000000e+00> : vector<8x256xf32>
    %590 = tpu.matmul %588, %589, %cst_435 {dimension_numbers = #tpu.dot_dimension_numbers<[1], [0], [0], [1], [0, 0, 1, 1], [], []>} : vector<8x64xf32>, vector<64x256xf32>, vector<8x256xf32> -> vector<8x256xf32>
    %c0_436 = arith.constant 0 : index
    %c0_437 = arith.constant 0 : index
    %591 = vector.load %arg34[%c0_436, %c0_437] : memref<1x256xf32, #tpu.memory_space<vmem>>, vector<1x256xf32>
    %592 = vector.broadcast %591 : vector<1x256xf32> to vector<8x256xf32>
    %593 = arith.addf %590, %592 : vector<8x256xf32>
    %cst_438 = arith.constant 1.702000e+00 : f32
    %594 = vector.broadcast %cst_438 : f32 to vector<8x256xf32>
    %595 = arith.mulf %594, %593 : vector<8x256xf32>
    %596 = arith.negf %595 : vector<8x256xf32>
    %597 = math.exp %596 : vector<8x256xf32>
    %cst_439 = arith.constant 1.000000e+00 : f32
    %598 = vector.broadcast %cst_439 : f32 to vector<8x256xf32>
    %599 = arith.addf %598, %597 : vector<8x256xf32>
    %600 = arith.divf %598, %599 : vector<8x256xf32>
    %601 = arith.mulf %593, %600 : vector<8x256xf32>
    %c0_440 = arith.constant 0 : index
    %c0_441 = arith.constant 0 : index
    %602 = vector.load %arg35[%c0_440, %c0_441] : memref<256x64xf32, #tpu.memory_space<vmem>>, vector<256x64xf32>
    %cst_442 = arith.constant dense<0.000000e+00> : vector<8x64xf32>
    %603 = tpu.matmul %601, %602, %cst_442 {dimension_numbers = #tpu.dot_dimension_numbers<[1], [0], [0], [1], [0, 0, 1, 1], [], []>} : vector<8x256xf32>, vector<256x64xf32>, vector<8x64xf32> -> vector<8x64xf32>
    %604 = arith.addf %588, %603 : vector<8x64xf32>
    %c0_443 = arith.constant 0 : index
    %c0_444 = arith.constant 0 : index
    %605 = vector.load %arg36[%c0_443, %c0_444] : memref<1x64xf32, #tpu.memory_space<vmem>>, vector<1x64xf32>
    %606 = vector.broadcast %605 : vector<1x64xf32> to vector<8x64xf32>
    %607 = arith.addf %604, %606 : vector<8x64xf32>
    %c0_445 = arith.constant 0 : index
    %c0_446 = arith.constant 0 : index
    %608 = vector.load %arg37[%c0_445, %c0_446] : memref<1x64xf32, #tpu.memory_space<vmem>>, vector<1x64xf32>
    %609 = vector.broadcast %608 : vector<1x64xf32> to vector<8x64xf32>
    %610 = arith.mulf %607, %609 : vector<8x64xf32>
    %cst_447 = arith.constant dense<0.000000e+00> : vector<8xf32>
    %611 = vector.multi_reduction <add>, %610, %cst_447 [1] : vector<8x64xf32> to vector<8xf32>
    %612 = vector.shape_cast %611 : vector<8xf32> to vector<8x1xf32>
    %c0_448 = arith.constant 0 : index
    %c0_449 = arith.constant 0 : index
    %613 = vector.load %arg38[%c0_448, %c0_449] : memref<1x1xf32, #tpu.memory_space<vmem>>, vector<1x1xf32>
    %614 = vector.broadcast %613 : vector<1x1xf32> to vector<8x1xf32>
    %615 = arith.addf %612, %614 : vector<8x1xf32>
    %c0_450 = arith.constant 0 : index
    %c0_451 = arith.constant 0 : index
    %c0_452 = arith.constant 0 : index
    %616 = vector.load %arg43[%c0_450, %c0_451, %c0_452] : memref<1x8x1xf32, #tpu.memory_space<vmem>>, vector<1x8x1xf32>
    %617 = vector.shape_cast %616 : vector<1x8x1xf32> to vector<8x1xf32>
    %618 = vector.shape_cast %615 : vector<8x1xf32> to vector<1x8x1xf32>
    tpu.vector_store %arg43[%c0_450, %c0_451, %c0_452], %618 {strides = array<i32>} : memref<1x8x1xf32, #tpu.memory_space<vmem>>, vector<1x8x1xf32>,
    %619 = vector.broadcast %615 : vector<8x1xf32> to vector<8x64xf32>
    %620 = arith.mulf %619, %588 : vector<8x64xf32>
    %cst_453 = arith.constant dense<0.000000e+00> : vector<64xf32>
    %621 = vector.multi_reduction <add>, %620, %cst_453 [0] : vector<8x64xf32> to vector<64xf32>
    %622 = vector.shape_cast %621 : vector<64xf32> to vector<1x64xf32>
    %623 = arith.mulf %622, %622 : vector<1x64xf32>
    %cst_454 = arith.constant dense<0.000000e+00> : vector<1xf32>
    %624 = vector.multi_reduction <add>, %623, %cst_454 [1] : vector<1x64xf32> to vector<1xf32>
    %625 = vector.shape_cast %624 : vector<1xf32> to vector<1x1xf32>
    %cst_455 = arith.constant 9.99999996E-13 : f32
    %626 = vector.broadcast %cst_455 : f32 to vector<1x1xf32>
    %627 = arith.addf %625, %626 : vector<1x1xf32>
    %628 = math.rsqrt %627 : vector<1x1xf32>
    %629 = vector.broadcast %628 : vector<1x1xf32> to vector<1x64xf32>
    %630 = arith.mulf %622, %629 : vector<1x64xf32>
    %c0_456 = arith.constant 0 : index
    %c0_457 = arith.constant 0 : index
    %631 = vector.load %arg5[%c0_456, %c0_457] : memref<3x64xf32, #tpu.memory_space<vmem>>, vector<3x64xf32>
    %632 = vector.broadcast %630 : vector<1x64xf32> to vector<3x64xf32>
    %633 = arith.addf %631, %632 : vector<3x64xf32>
    %c0_458 = arith.constant 0 : index
    %c0_459 = arith.constant 0 : index
    %634 = vector.load %arg39[%c0_458, %c0_459] : memref<64x256xf32, #tpu.memory_space<vmem>>, vector<64x256xf32>
    %cst_460 = arith.constant dense<0.000000e+00> : vector<3x256xf32>
    %635 = tpu.matmul %633, %634, %cst_460 {dimension_numbers = #tpu.dot_dimension_numbers<[1], [0], [0], [1], [0, 0, 1, 1], [], []>} : vector<3x64xf32>, vector<64x256xf32>, vector<3x256xf32> -> vector<3x256xf32>
    %c0_461 = arith.constant 0 : index
    %c0_462 = arith.constant 0 : index
    %636 = vector.load %arg40[%c0_461, %c0_462] : memref<1x256xf32, #tpu.memory_space<vmem>>, vector<1x256xf32>
    %637 = vector.broadcast %636 : vector<1x256xf32> to vector<3x256xf32>
    %638 = arith.addf %635, %637 : vector<3x256xf32>
    %cst_463 = arith.constant 1.702000e+00 : f32
    %639 = vector.broadcast %cst_463 : f32 to vector<3x256xf32>
    %640 = arith.mulf %639, %638 : vector<3x256xf32>
    %641 = arith.negf %640 : vector<3x256xf32>
    %642 = math.exp %641 : vector<3x256xf32>
    %cst_464 = arith.constant 1.000000e+00 : f32
    %643 = vector.broadcast %cst_464 : f32 to vector<3x256xf32>
    %644 = arith.addf %643, %642 : vector<3x256xf32>
    %645 = arith.divf %643, %644 : vector<3x256xf32>
    %646 = arith.mulf %638, %645 : vector<3x256xf32>
    %c0_465 = arith.constant 0 : index
    %c0_466 = arith.constant 0 : index
    %647 = vector.load %arg41[%c0_465, %c0_466] : memref<256x64xf32, #tpu.memory_space<vmem>>, vector<256x64xf32>
    %cst_467 = arith.constant dense<0.000000e+00> : vector<3x64xf32>
    %648 = tpu.matmul %646, %647, %cst_467 {dimension_numbers = #tpu.dot_dimension_numbers<[1], [0], [0], [1], [0, 0, 1, 1], [], []>} : vector<3x256xf32>, vector<256x64xf32>, vector<3x64xf32> -> vector<3x64xf32>
    %649 = arith.addf %633, %648 : vector<3x64xf32>
    %c0_468 = arith.constant 0 : index
    %c0_469 = arith.constant 0 : index
    %650 = vector.load %arg42[%c0_468, %c0_469] : memref<1x64xf32, #tpu.memory_space<vmem>>, vector<1x64xf32>
    %651 = vector.broadcast %650 : vector<1x64xf32> to vector<3x64xf32>
    %652 = arith.addf %649, %651 : vector<3x64xf32>
    %653 = arith.mulf %588, %588 : vector<8x64xf32>
    %cst_470 = arith.constant dense<0.000000e+00> : vector<8xf32>
    %654 = vector.multi_reduction <add>, %653, %cst_470 [1] : vector<8x64xf32> to vector<8xf32>
    %655 = vector.shape_cast %654 : vector<8xf32> to vector<8x1xf32>
    %cst_471 = arith.constant 9.99999996E-13 : f32
    %656 = vector.broadcast %cst_471 : f32 to vector<8x1xf32>
    %657 = arith.addf %655, %656 : vector<8x1xf32>
    %658 = math.rsqrt %657 : vector<8x1xf32>
    %659 = vector.broadcast %658 : vector<8x1xf32> to vector<8x64xf32>
    %660 = arith.mulf %588, %659 : vector<8x64xf32>
    %661 = arith.mulf %652, %652 : vector<3x64xf32>
    %cst_472 = arith.constant dense<0.000000e+00> : vector<3xf32>
    %662 = vector.multi_reduction <add>, %661, %cst_472 [1] : vector<3x64xf32> to vector<3xf32>
    %663 = vector.shape_cast %662 : vector<3xf32> to vector<3x1xf32>
    %cst_473 = arith.constant 9.99999996E-13 : f32
    %664 = vector.broadcast %cst_473 : f32 to vector<3x1xf32>
    %665 = arith.addf %663, %664 : vector<3x1xf32>
    %666 = math.rsqrt %665 : vector<3x1xf32>
    %667 = vector.broadcast %666 : vector<3x1xf32> to vector<3x64xf32>
    %668 = arith.mulf %652, %667 : vector<3x64xf32>
    %669 = tpu.transpose %668, [1, 0] : vector<3x64xf32> -> vector<64x3xf32>
    %cst_474 = arith.constant dense<0.000000e+00> : vector<8x3xf32>
    %670 = tpu.matmul %660, %669, %cst_474 {dimension_numbers = #tpu.dot_dimension_numbers<[1], [0], [0], [1], [0, 0, 1, 1], [], []>} : vector<8x64xf32>, vector<64x3xf32>, vector<8x3xf32> -> vector<8x3xf32>
    %cst_475 = arith.constant 14.2857141 : f32
    %671 = vector.broadcast %cst_475 : f32 to vector<8x3xf32>
    %672 = arith.mulf %670, %671 : vector<8x3xf32>
    %c0_476 = arith.constant 0 : index
    %c0_477 = arith.constant 0 : index
    %c0_478 = arith.constant 0 : index
    %673 = vector.load %arg44[%c0_476, %c0_477, %c0_478] : memref<1x8x3xf32, #tpu.memory_space<vmem>>, vector<1x8x3xf32>
    %674 = vector.shape_cast %673 : vector<1x8x3xf32> to vector<8x3xf32>
    %675 = vector.shape_cast %672 : vector<8x3xf32> to vector<1x8x3xf32>
    tpu.vector_store %arg44[%c0_476, %c0_477, %c0_478], %675 {strides = array<i32>} : memref<1x8x3xf32, #tpu.memory_space<vmem>>, vector<1x8x3xf32>,
    return
  }
  func.func @transform_0(%arg0: i32) -> (i32, i32, i32) {
    %c0_i32 = arith.constant 0 : i32
    %c0_i32_0 = arith.constant 0 : i32
    %c0_i32_1 = arith.constant 0 : i32
    return %arg0, %c0_i32, %c0_i32_0 : i32, i32, i32
  }
  func.func @transform_1(%arg0: i32) -> (i32, i32) {
    %c0_i32 = arith.constant 0 : i32
    %c0_i32_0 = arith.constant 0 : i32
    %c0_i32_1 = arith.constant 0 : i32
    return %c0_i32, %c0_i32_0 : i32, i32
  }
  func.func @transform_2(%arg0: i32) -> (i32, i32) {
    %c0_i32 = arith.constant 0 : i32
    %c0_i32_0 = arith.constant 0 : i32
    %c0_i32_1 = arith.constant 0 : i32
    return %c0_i32, %c0_i32_0 : i32, i32
  }
  func.func @transform_3(%arg0: i32) -> (i32, i32) {
    %c0_i32 = arith.constant 0 : i32
    %c0_i32_0 = arith.constant 0 : i32
    %c0_i32_1 = arith.constant 0 : i32
    return %c0_i32, %c0_i32_0 : i32, i32
  }
  func.func @transform_4(%arg0: i32) -> (i32, i32) {
    %c0_i32 = arith.constant 0 : i32
    %c0_i32_0 = arith.constant 0 : i32
    %c0_i32_1 = arith.constant 0 : i32
    return %c0_i32, %c0_i32_0 : i32, i32
  }
  func.func @transform_5(%arg0: i32) -> (i32, i32, i32) {
    %c0_i32 = arith.constant 0 : i32
    %c0_i32_0 = arith.constant 0 : i32
    %c0_i32_1 = arith.constant 0 : i32
    %c0_i32_2 = arith.constant 0 : i32
    return %c0_i32, %c0_i32_0, %c0_i32_1 : i32, i32, i32
  }
  func.func @transform_6(%arg0: i32) -> (i32, i32, i32) {
    %c0_i32 = arith.constant 0 : i32
    %c0_i32_0 = arith.constant 0 : i32
    %c0_i32_1 = arith.constant 0 : i32
    %c0_i32_2 = arith.constant 0 : i32
    return %c0_i32, %c0_i32_0, %c0_i32_1 : i32, i32, i32
  }
  func.func @transform_7(%arg0: i32) -> (i32, i32, i32, i32) {
    %c0_i32 = arith.constant 0 : i32
    %c0_i32_0 = arith.constant 0 : i32
    %c0_i32_1 = arith.constant 0 : i32
    %c0_i32_2 = arith.constant 0 : i32
    %c0_i32_3 = arith.constant 0 : i32
    return %c0_i32, %c0_i32_0, %c0_i32_1, %c0_i32_2 : i32, i32, i32, i32
  }
  func.func @transform_8(%arg0: i32) -> (i32, i32, i32, i32) {
    %c0_i32 = arith.constant 0 : i32
    %c0_i32_0 = arith.constant 0 : i32
    %c0_i32_1 = arith.constant 0 : i32
    %c0_i32_2 = arith.constant 0 : i32
    %c0_i32_3 = arith.constant 0 : i32
    return %c0_i32, %c0_i32_0, %c0_i32_1, %c0_i32_2 : i32, i32, i32, i32
  }
  func.func @transform_9(%arg0: i32) -> (i32, i32, i32, i32) {
    %c0_i32 = arith.constant 0 : i32
    %c0_i32_0 = arith.constant 0 : i32
    %c0_i32_1 = arith.constant 0 : i32
    %c0_i32_2 = arith.constant 0 : i32
    %c0_i32_3 = arith.constant 0 : i32
    return %c0_i32, %c0_i32_0, %c0_i32_1, %c0_i32_2 : i32, i32, i32, i32
  }
  func.func @transform_10(%arg0: i32) -> (i32, i32, i32, i32) {
    %c0_i32 = arith.constant 0 : i32
    %c0_i32_0 = arith.constant 0 : i32
    %c0_i32_1 = arith.constant 0 : i32
    %c0_i32_2 = arith.constant 0 : i32
    %c0_i32_3 = arith.constant 0 : i32
    return %c0_i32, %c0_i32_0, %c0_i32_1, %c0_i32_2 : i32, i32, i32, i32
  }
  func.func @transform_11(%arg0: i32) -> (i32, i32, i32, i32) {
    %c0_i32 = arith.constant 0 : i32
    %c0_i32_0 = arith.constant 0 : i32
    %c0_i32_1 = arith.constant 0 : i32
    %c0_i32_2 = arith.constant 0 : i32
    %c0_i32_3 = arith.constant 0 : i32
    return %c0_i32, %c0_i32_0, %c0_i32_1, %c0_i32_2 : i32, i32, i32, i32
  }
  func.func @transform_12(%arg0: i32) -> (i32, i32, i32, i32) {
    %c0_i32 = arith.constant 0 : i32
    %c0_i32_0 = arith.constant 0 : i32
    %c0_i32_1 = arith.constant 0 : i32
    %c0_i32_2 = arith.constant 0 : i32
    %c0_i32_3 = arith.constant 0 : i32
    return %c0_i32, %c0_i32_0, %c0_i32_1, %c0_i32_2 : i32, i32, i32, i32
  }
  func.func @transform_13(%arg0: i32) -> (i32, i32, i32, i32) {
    %c0_i32 = arith.constant 0 : i32
    %c0_i32_0 = arith.constant 0 : i32
    %c0_i32_1 = arith.constant 0 : i32
    %c0_i32_2 = arith.constant 0 : i32
    %c0_i32_3 = arith.constant 0 : i32
    return %c0_i32, %c0_i32_0, %c0_i32_1, %c0_i32_2 : i32, i32, i32, i32
  }
  func.func @transform_14(%arg0: i32) -> (i32, i32, i32) {
    %c0_i32 = arith.constant 0 : i32
    %c0_i32_0 = arith.constant 0 : i32
    %c0_i32_1 = arith.constant 0 : i32
    %c0_i32_2 = arith.constant 0 : i32
    return %c0_i32, %c0_i32_0, %c0_i32_1 : i32, i32, i32
  }
  func.func @transform_15(%arg0: i32) -> (i32, i32, i32) {
    %c0_i32 = arith.constant 0 : i32
    %c0_i32_0 = arith.constant 0 : i32
    %c0_i32_1 = arith.constant 0 : i32
    %c0_i32_2 = arith.constant 0 : i32
    return %c0_i32, %c0_i32_0, %c0_i32_1 : i32, i32, i32
  }
  func.func @transform_16(%arg0: i32) -> (i32, i32, i32) {
    %c0_i32 = arith.constant 0 : i32
    %c0_i32_0 = arith.constant 0 : i32
    %c0_i32_1 = arith.constant 0 : i32
    %c0_i32_2 = arith.constant 0 : i32
    return %c0_i32, %c0_i32_0, %c0_i32_1 : i32, i32, i32
  }
  func.func @transform_17(%arg0: i32) -> (i32, i32, i32) {
    %c0_i32 = arith.constant 0 : i32
    %c0_i32_0 = arith.constant 0 : i32
    %c0_i32_1 = arith.constant 0 : i32
    %c0_i32_2 = arith.constant 0 : i32
    return %c0_i32, %c0_i32_0, %c0_i32_1 : i32, i32, i32
  }
  func.func @transform_18(%arg0: i32) -> (i32, i32, i32) {
    %c0_i32 = arith.constant 0 : i32
    %c0_i32_0 = arith.constant 0 : i32
    %c0_i32_1 = arith.constant 0 : i32
    %c0_i32_2 = arith.constant 0 : i32
    return %c0_i32, %c0_i32_0, %c0_i32_1 : i32, i32, i32
  }
  func.func @transform_19(%arg0: i32) -> (i32, i32, i32) {
    %c0_i32 = arith.constant 0 : i32
    %c0_i32_0 = arith.constant 0 : i32
    %c0_i32_1 = arith.constant 0 : i32
    %c0_i32_2 = arith.constant 0 : i32
    return %c0_i32, %c0_i32_0, %c0_i32_1 : i32, i32, i32
  }
  func.func @transform_20(%arg0: i32) -> (i32, i32, i32) {
    %c0_i32 = arith.constant 0 : i32
    %c0_i32_0 = arith.constant 0 : i32
    %c0_i32_1 = arith.constant 0 : i32
    %c0_i32_2 = arith.constant 0 : i32
    return %c0_i32, %c0_i32_0, %c0_i32_1 : i32, i32, i32
  }
  func.func @transform_21(%arg0: i32) -> (i32, i32) {
    %c0_i32 = arith.constant 0 : i32
    %c0_i32_0 = arith.constant 0 : i32
    %c0_i32_1 = arith.constant 0 : i32
    return %c0_i32, %c0_i32_0 : i32, i32
  }
  func.func @transform_22(%arg0: i32) -> (i32, i32) {
    %c0_i32 = arith.constant 0 : i32
    %c0_i32_0 = arith.constant 0 : i32
    %c0_i32_1 = arith.constant 0 : i32
    return %c0_i32, %c0_i32_0 : i32, i32
  }
  func.func @transform_23(%arg0: i32) -> (i32, i32) {
    %c0_i32 = arith.constant 0 : i32
    %c0_i32_0 = arith.constant 0 : i32
    %c0_i32_1 = arith.constant 0 : i32
    return %c0_i32, %c0_i32_0 : i32, i32
  }
  func.func @transform_24(%arg0: i32) -> (i32, i32) {
    %c0_i32 = arith.constant 0 : i32
    %c0_i32_0 = arith.constant 0 : i32
    %c0_i32_1 = arith.constant 0 : i32
    return %c0_i32, %c0_i32_0 : i32, i32
  }
  func.func @transform_25(%arg0: i32) -> (i32, i32) {
    %c0_i32 = arith.constant 0 : i32
    %c0_i32_0 = arith.constant 0 : i32
    %c0_i32_1 = arith.constant 0 : i32
    return %c0_i32, %c0_i32_0 : i32, i32
  }
  func.func @transform_26(%arg0: i32) -> (i32, i32) {
    %c0_i32 = arith.constant 0 : i32
    %c0_i32_0 = arith.constant 0 : i32
    %c0_i32_1 = arith.constant 0 : i32
    return %c0_i32, %c0_i32_0 : i32, i32
  }
  func.func @transform_27(%arg0: i32) -> (i32, i32) {
    %c0_i32 = arith.constant 0 : i32
    %c0_i32_0 = arith.constant 0 : i32
    %c0_i32_1 = arith.constant 0 : i32
    return %c0_i32, %c0_i32_0 : i32, i32
  }
  func.func @transform_28(%arg0: i32) -> (i32, i32) {
    %c0_i32 = arith.constant 0 : i32
    %c0_i32_0 = arith.constant 0 : i32
    %c0_i32_1 = arith.constant 0 : i32
    return %c0_i32, %c0_i32_0 : i32, i32
  }
  func.func @transform_29(%arg0: i32) -> (i32, i32) {
    %c0_i32 = arith.constant 0 : i32
    %c0_i32_0 = arith.constant 0 : i32
    %c0_i32_1 = arith.constant 0 : i32
    return %c0_i32, %c0_i32_0 : i32, i32
  }
  func.func @transform_30(%arg0: i32) -> (i32, i32) {
    %c0_i32 = arith.constant 0 : i32
    %c0_i32_0 = arith.constant 0 : i32
    %c0_i32_1 = arith.constant 0 : i32
    return %c0_i32, %c0_i32_0 : i32, i32
  }
  func.func @transform_31(%arg0: i32) -> (i32, i32) {
    %c0_i32 = arith.constant 0 : i32
    %c0_i32_0 = arith.constant 0 : i32
    %c0_i32_1 = arith.constant 0 : i32
    return %c0_i32, %c0_i32_0 : i32, i32
  }
  func.func @transform_32(%arg0: i32) -> (i32, i32) {
    %c0_i32 = arith.constant 0 : i32
    %c0_i32_0 = arith.constant 0 : i32
    %c0_i32_1 = arith.constant 0 : i32
    return %c0_i32, %c0_i32_0 : i32, i32
  }
  func.func @transform_33(%arg0: i32) -> (i32, i32) {
    %c0_i32 = arith.constant 0 : i32
    %c0_i32_0 = arith.constant 0 : i32
    %c0_i32_1 = arith.constant 0 : i32
    return %c0_i32, %c0_i32_0 : i32, i32
  }
  func.func @transform_34(%arg0: i32) -> (i32, i32) {
    %c0_i32 = arith.constant 0 : i32
    %c0_i32_0 = arith.constant 0 : i32
    %c0_i32_1 = arith.constant 0 : i32
    return %c0_i32, %c0_i32_0 : i32, i32
  }
  func.func @transform_35(%arg0: i32) -> (i32, i32) {
    %c0_i32 = arith.constant 0 : i32
    %c0_i32_0 = arith.constant 0 : i32
    %c0_i32_1 = arith.constant 0 : i32
    return %c0_i32, %c0_i32_0 : i32, i32
  }
  func.func @transform_36(%arg0: i32) -> (i32, i32) {
    %c0_i32 = arith.constant 0 : i32
    %c0_i32_0 = arith.constant 0 : i32
    %c0_i32_1 = arith.constant 0 : i32
    return %c0_i32, %c0_i32_0 : i32, i32
  }
  func.func @transform_37(%arg0: i32) -> (i32, i32) {
    %c0_i32 = arith.constant 0 : i32
    %c0_i32_0 = arith.constant 0 : i32
    %c0_i32_1 = arith.constant 0 : i32
    return %c0_i32, %c0_i32_0 : i32, i32
  }
  func.func @transform_38(%arg0: i32) -> (i32, i32) {
    %c0_i32 = arith.constant 0 : i32
    %c0_i32_0 = arith.constant 0 : i32
    %c0_i32_1 = arith.constant 0 : i32
    return %c0_i32, %c0_i32_0 : i32, i32
  }
  func.func @transform_39(%arg0: i32) -> (i32, i32) {
    %c0_i32 = arith.constant 0 : i32
    %c0_i32_0 = arith.constant 0 : i32
    %c0_i32_1 = arith.constant 0 : i32
    return %c0_i32, %c0_i32_0 : i32, i32
  }
  func.func @transform_40(%arg0: i32) -> (i32, i32) {
    %c0_i32 = arith.constant 0 : i32
    %c0_i32_0 = arith.constant 0 : i32
    %c0_i32_1 = arith.constant 0 : i32
    return %c0_i32, %c0_i32_0 : i32, i32
  }
  func.func @transform_41(%arg0: i32) -> (i32, i32) {
    %c0_i32 = arith.constant 0 : i32
    %c0_i32_0 = arith.constant 0 : i32
    %c0_i32_1 = arith.constant 0 : i32
    return %c0_i32, %c0_i32_0 : i32, i32
  }
  func.func @transform_42(%arg0: i32) -> (i32, i32, i32) {
    %c0_i32 = arith.constant 0 : i32
    %c0_i32_0 = arith.constant 0 : i32
    %c0_i32_1 = arith.constant 0 : i32
    return %arg0, %c0_i32, %c0_i32_0 : i32, i32, i32
  }
  func.func @transform_43(%arg0: i32) -> (i32, i32, i32) {
    %c0_i32 = arith.constant 0 : i32
    %c0_i32_0 = arith.constant 0 : i32
    %c0_i32_1 = arith.constant 0 : i32
    return %arg0, %c0_i32, %c0_i32_0 : i32, i32, i32
  }
}

</mosaic_0001>

<bundles_post_ra>
// kernel: clipvad_forward.1
= control target key start
LH: loop header
LB: loop body
LE: loop exit
PB: predicated region body
PF: predicated region fallthrough
CT: control target
= control target key end

     0   :  { %s9507_s6 = smov 1   ;;  %s9508_s10 = smov 2   ;;  %s10934_s0 = inlined_call_operand.smem [shape: u32[44], index: -1, kind: input, shape index: {}] }
   0x1   :  { %s9561_s5 = sld [smem:[%s10934_s0]]   ;;  %s9509_s14 = smov 3  }
   0x2   :  { %s9566_s9 = sld [smem:[%s10934_s0 + %s9507_s6]]   ;;  %s9510_s18 = smov 4  }
   0x3   :  { %s9571_s13 = sld [smem:[%s10934_s0 + %s9508_s10]]   ;;  %s9511_s22 = smov 5  }
   0x4   :  { %s9576_s17 = sld [smem:[%s10934_s0 + %s9509_s14]]   ;;  %s9512_s26 = smov 6  }
   0x5   :  { %s9581_s21 = sld [smem:[%s10934_s0 + %s9510_s18]]   ;;  %s9513_s30 = smov 7  }
   0x6   :  { %s9586_s25 = sld [smem:[%s10934_s0 + %s9511_s22]]   ;;  %s9514_s4 = smov 8  }
   0x7   :  { %10959 = sst [smem:[#allocation3_spill]] %s9561_s5  ;;  %s9515_s10 = smov 9  }
   0x8   :  { %s9591_s29 = sld [smem:[%s10934_s0 + %s9512_s26]]   ;;  %s9516_s15 = smov 10  }
   0x9   :  { %s9596_s3 = sld [smem:[%s10934_s0 + %s9513_s30]]   ;;  %s9517_s20 = smov 11  }
   0xa   :  { %10960 = sst [smem:[#allocation4_spill]] %s9576_s17  ;;  %s9518_s26 = smov 12  }
   0xb   :  { %10961 = sst [smem:[#allocation5_spill]] %s9581_s21  ;;  %s9519_s1 = smov 13  }
   0xc   :  { %s9601_s8 = sld [smem:[%s10934_s0 + %s9514_s4]]   ;;  %s9520_s7 = smov 14  }
   0xd   :  { %s9606_s14 = sld [smem:[%s10934_s0 + %s9515_s10]]   ;;  %s9522_s22 = smov 16  }
   0xe   :  { %s9611_s19 = sld [smem:[%s10934_s0 + %s9516_s15]]   ;;  %s9521_s15 = smov 15  }
   0xf   :  { %10962 = sst [smem:[#allocation6_spill]] %s9596_s3  ;;  %s9523_s28 = smov 17  }
  0x10   :  { %s9616_s24 = sld [smem:[%s10934_s0 + %s9517_s20]]   ;;  %s9544_s10 = smov 38  }
  0x11   :  { %s9621_s30 = sld [smem:[%s10934_s0 + %s9518_s26]]   ;;  %s9545_s16 = smov 39  }
  0x12   :  { %s9626_s6 = sld [smem:[%s10934_s0 + %s9519_s1]]   ;;  %s9546_s23 = smov 40  }
  0x13   :  { %s9631_s12 = sld [smem:[%s10934_s0 + %s9520_s7]]   ;;  %s9524_s7 = smov 18  }
  0x14   :  { %s9636_s20 = sld [smem:[%s10934_s0 + %s9521_s15]]   ;;  %s9525_s15 = smov 19  }
  0x15   :  { %s9641_s27 = sld [smem:[%s10934_s0 + %s9522_s22]]   ;;  %s9526_s22 = smov 20  }
  0x16   :  { %s9646_s4 = sld [smem:[%s10934_s0 + %s9523_s28]]   ;;  %s9527_s28 = smov 21  }
  0x17   :  { %s9651_s21 = sld [smem:[%s10934_s0 + %s9524_s7]]   ;;  %s9528_s7 = smov 22  }
  0x18   :  { %s9656_s17 = sld [smem:[%s10934_s0 + %s9525_s15]]   ;;  %s9529_s15 = smov 23  }
  0x19   :  { %s9547_s1 = smov 41  }
  0x1a   :  { %10963 = sst [smem:[#allocation7_spill]] %s9636_s20 }
  0x1b   :  { %10964 = sst [smem:[#allocation8_spill]] %s9641_s27 }
  0x1c   :  { %10965 = sst [smem:[#allocation9_spill]] %s9646_s4 }
  0x1d   :  { %10966 = sst [smem:[#allocation10_spill]] %s9651_s21 }
  0x1e   :  { %10967 = sst [smem:[#allocation11_spill]] %s9656_s17 }
  0x1f   :  { %s9661_s27 = sld [smem:[%s10934_s0 + %s9526_s22]]   ;;  %s9530_s22 = smov 24  }
  0x20   :  { %s9666_s20 = sld [smem:[%s10934_s0 + %s9527_s28]]   ;;  %s9531_s28 = smov 25  }
  0x21   :  { %s9671_s21 = sld [smem:[%s10934_s0 + %s9528_s7]]   ;;  %s9532_s7 = smov 26  }
  0x22   :  { %s9676_s17 = sld [smem:[%s10934_s0 + %s9529_s15]]   ;;  %s9533_s15 = smov 27  }
  0x23   :  { %s9764_s4 = sld [smem:[%s10934_s0 + %s9547_s1]]  }
  0x25   :  { %10968 = sst [smem:[#allocation12_spill]] %s9661_s27 }
  0x26   :  { %10969 = sst [smem:[#allocation13_spill]] %s9666_s20 }
  0x27   :  { %10970 = sst [smem:[#allocation14_spill]] %s9671_s21 }
  0x28   :  { %10971 = sst [smem:[#allocation15_spill]] %s9676_s17 }
  0x29   :  { %s9681_s27 = sld [smem:[%s10934_s0 + %s9530_s22]]   ;;  %s9534_s22 = smov 28  }
  0x2a   :  { %s9686_s20 = sld [smem:[%s10934_s0 + %s9531_s28]]   ;;  %s9535_s28 = smov 29  }
  0x2b   :  { %s9691_s21 = sld [smem:[%s10934_s0 + %s9532_s7]]   ;;  %s9536_s7 = smov 30  }
  0x2c   :  { %s9696_s17 = sld [smem:[%s10934_s0 + %s9533_s15]]   ;;  %s9537_s15 = smov 31  }
  0x2f   :  { %10972 = sst [smem:[#allocation16_spill]] %s9681_s27 }
  0x30   :  { %10973 = sst [smem:[#allocation17_spill]] %s9686_s20 }
  0x31   :  { %10974 = sst [smem:[#allocation18_spill]] %s9691_s21 }
  0x32   :  { %10975 = sst [smem:[#allocation19_spill]] %s9696_s17 }
  0x33   :  { %s9701_s27 = sld [smem:[%s10934_s0 + %s9534_s22]]   ;;  %s9538_s22 = smov 32  }
  0x34   :  { %s9706_s20 = sld [smem:[%s10934_s0 + %s9535_s28]]   ;;  %s9539_s28 = smov 33  }
  0x35   :  { %s9711_s21 = sld [smem:[%s10934_s0 + %s9536_s7]]   ;;  %s9540_s7 = smov 34  }
  0x36   :  { %s9716_s17 = sld [smem:[%s10934_s0 + %s9537_s15]]   ;;  %s9541_s15 = smov 35  }
  0x39   :  { %10976 = sst [smem:[#allocation20_spill]] %s9701_s27 }
  0x3a   :  { %10977 = sst [smem:[#allocation21_spill]] %s9706_s20 }
  0x3b   :  { %10978 = sst [smem:[#allocation22_spill]] %s9711_s21 }
  0x3c   :  { %10979 = sst [smem:[#allocation23_spill]] %s9716_s17 }
  0x3d   :  { %s9721_s27 = sld [smem:[%s10934_s0 + %s9538_s22]]   ;;  %s9542_s22 = smov 36  }
  0x3e   :  { %s9726_s20 = sld [smem:[%s10934_s0 + %s9539_s28]]   ;;  %s9543_s28 = smov 37  }
  0x3f   :  { %s9731_s21 = sld [smem:[%s10934_s0 + %s9540_s7]]  }
  0x40   :  { %s9736_s17 = sld [smem:[%s10934_s0 + %s9541_s15]]  }
  0x43   :  { %10980 = sst [smem:[#allocation24_spill]] %s9721_s27 }
  0x44   :  { %10981 = sst [smem:[#allocation25_spill]] %s9726_s20 }
  0x45   :  { %10982 = sst [smem:[#allocation26_spill]] %s9731_s21 }
  0x46   :  { %10983 = sst [smem:[#allocation27_spill]] %s9736_s17 }
  0x47   :  { %s9741_s27 = sld [smem:[%s10934_s0 + %s9542_s22]]  }
  0x48   :  { %s7713_s20 = sld [smem:[%s10934_s0 + %s9543_s28]]  }
  0x49   :  { %s9749_s21 = sld [smem:[%s10934_s0 + %s9544_s10]]   ;;  %s9548_s10 = smov 42  }
  0x4a   :  { %s9754_s17 = sld [smem:[%s10934_s0 + %s9545_s16]]   ;;  %s9549_s16 = smov 43  }
  0x4d   :  { %10984 = sst [smem:[#allocation28_spill]] %s9741_s27 }
  0x4e   :  { %s9759_s27 = sld [smem:[%s10934_s0 + %s9546_s23]]   ;;  %v93_v0 = vstv %s7713_s20  ;;  %s9776_s23 = smov 0  }
  0x4f   :  { %10985 = sst [smem:[#allocation29_spill]] %s9749_s21  ;;  %94 = vst [vmem:[#allocation2] sm:$0x1] %v93_v0 }
  0x50   :  { %10986 = sst [smem:[#allocation30_spill]] %s9754_s17 }
  0x51   :  { %s9769_s21 = sld [smem:[%s10934_s0 + %s9548_s10]]  }
  0x52   :  { %s9774_s17 = sld [smem:[%s10934_s0 + %s9549_s16]]  }
  0x53 LB: > { %s10987_s3 = sld [smem:[#allocation6_spill]]  ;;  %s7720_s22 = sadd.s32 4294967295, %s9505_s23   ;;  %s9505_s23 = sphi %s9776_s23, %s100_s23  }
  0x54   : > { %p7724_p0 = scmp.ge.s32.totalorder %s9505_s23, 1  ;;  %p1185_p1 = scmp.lt.s32.totalorder %s9505_s23, 3 }
  0x56   : > { %p1186_p2 = pnand %p7724_p0, %p1185_p1 }
  0x57   : > { %p1291_p3 = scmp.lt.s32.totalorder (!%p1186_p2), %s7720_s22, 1  ;;  %s10988_s5 = sld [smem:[#allocation3_spill]] (!%p1186_p2) }
  0x58   : > { %1189 = sbr.rel (%p1186_p2) target bundleno = 12879 (0x324f), region = 188  ;;  %s10989_s26 = sld [smem:[#allocation9_spill]] (!%p1186_p2) }
  0x59   : > { %s10990_s1 = sld [smem:[#allocation7_spill]] (!%p1186_p2) }
  0x5a   : > { %s10991_s28 = sld [smem:[#allocation8_spill]] (!%p1186_p2) }
  0x5b   : > { %s10992_s2 = sld [smem:[#allocation11_spill]] (!%p1186_p2) }
  0x5c   : > { %s10993_s10 = sld [smem:[#allocation10_spill]] (!%p1186_p2) }
  0x5d   : > { %s11016_s22 = smov (!%p1291_p3, %s7720_s22), 1  ;;  %v1305_v1 = vld [vmem:[%s9566_s9] sm:$0xff]  ;;  %vm1309_vm0 = vcmask 523264   ;;  %v9550_v10 = vmov 0.0   ;;  %v1345_v11 = vld [vmem:[%s10987_s3 + $0x38] sm:$0xff]  ;;  %v1344_v12 = vld [vmem:[%s10987_s3 + $0x30] sm:$0xff] }
  0x5e   : > { %s9784_s0 = sshll.u32 %s11016_s22, 3  ;;  %8599 = vmatprep.subr.mxu0 %v9550_v10  ;;  %8656 = vmatprep.subr.mxu1 %v9550_v10  ;;  %v1343_v13 = vld [vmem:[%s10987_s3 + $0x28] sm:$0xff]  ;;  %v1342_v14 = vld [vmem:[%s10987_s3 + $0x20] sm:$0xff]  ;;  %v1341_v15 = vld [vmem:[%s10987_s3 + $0x18] sm:$0xff]  ;;  %vm9551_vm1 = vmmov 0   ;;  %vm1597_vm2 = vcmask 130048  }
  0x5f   : > { %s1294_s20 = scalar_lea.vmem %s10988_s5, %s9784_s0  ;;  %8600 = vmatpush3.msra.mxu0 %v1345_v11  ;;  %v1340_v16 = vld [vmem:[%s10987_s3 + $0x10] sm:$0xff]  ;;  %v1339_v17 = vld [vmem:[%s10987_s3 + $0x8] sm:$0xff]  ;;  %v1338_v18 = vld [vmem:[%s10987_s3] sm:$0xff]  ;;  %8615 = vmatprep.mubr.msk.f32.mxu0 %vm9551_vm1, %v9550_v10  ;;  %vm1674_vm3 = vcmask 64512   ;;  %s10994_s7 = sld [smem:[#allocation12_spill]]  ;;  %vm6529_vm7 = vcmask 261120  }
  0x60   : > { %v1304_v2 = vld [vmem:[%s1294_s20] sm:$0xff]  ;;  %8601 = vmatprep.subr.mxu0 %v9550_v10  ;;  %8658 = vmatprep.mubr.msk.f32.mxu1 %vm9551_vm1, %v9550_v10  ;;  %v1433_v28 = vld [vmem:[%s9601_s8 + $0x38] sm:$0xff]  ;;  %v1432_v29 = vld [vmem:[%s9601_s8 + $0x30] sm:$0xff]  ;;  %s10995_s11 = sld [smem:[#allocation14_spill]]  ;;  %vm7246_vm8 = vcmask 7168   ;;  %vm7507_vm9 = vcmask 518144  }
  0x61   : > { %v9789_v3 = vadd.f32 %v1305_v1, %v1304_v2  ;;  %8602 = vmatpush3.msra.mxu0 %v1344_v12  ;;  %v7728_v23 = vld [vmem:[%s9586_s25] ss:$0 sm:$0xff]  ;;  %v1431_v30 = vld [vmem:[%s9601_s8 + $0x28] sm:$0xff]  ;;  %v1429_v32 = vld [vmem:[%s9601_s8 + $0x18] sm:$0xff]  ;;  %s10996_s16 = sld [smem:[#allocation18_spill]]  ;;  %vm7591_vm10 = vcmask 23552  }
  0x62   : > { %8603 = vmatprep.subr.mxu0 %v9550_v10  ;;  %v7729_v25 = vld [vmem:[%s9591_s29] ss:$0 sm:$0xff]  ;;  %v1428_v33 = vld [vmem:[%s9601_s8 + $0x10] sm:$0xff]  ;;  %v1427_v34 = vld [vmem:[%s9601_s8 + $0x8] sm:$0xff]  ;;  %s10997_s15 = sld [smem:[#allocation13_spill]] }
  0x63   : > { %v1310_v4 = vsel %vm1309_vm0, %v9789_v3, 0.0  ;;  %8604 = vmatpush3.msra.mxu0 %v1343_v13  ;;  %v1430_v31 = vld [vmem:[%s9601_s8 + $0x20] sm:$0xff]  ;;  %v1518_v36 = vld [vmem:[%s9606_s14 + $0x38] sm:$0xff]  ;;  %v1517_v37 = vld [vmem:[%s9606_s14 + $0x30] sm:$0xff]  ;;  %s10998_s18 = sld [smem:[#allocation17_spill]] }
  0x64   : > { %1311 = vadd.xlane.f32.xlu0 %v1310_v4  ;;  %8605 = vmatprep.subr.mxu0 %v9550_v10  ;;  %v1426_v35 = vld [vmem:[%s9601_s8] sm:$0xff]  ;;  %v1516_v38 = vld [vmem:[%s9606_s14 + $0x28] sm:$0xff]  ;;  %v1514_v40 = vld [vmem:[%s9606_s14 + $0x18] sm:$0xff]  ;;  %s10999_s22 = sld [smem:[#allocation15_spill]] }
  0x65   : > { %8606 = vmatpush3.msra.mxu0 %v1342_v14  ;;  %v1515_v39 = vld [vmem:[%s9606_s14 + $0x20] sm:$0xff]  ;;  %v1513_v41 = vld [vmem:[%s9606_s14 + $0x10] sm:$0xff]  ;;  %v1512_v42 = vld [vmem:[%s9606_s14 + $0x8] sm:$0xff]  ;;  %s11000_s20 = sld [smem:[#allocation4_spill]] }
  0x66   : > { %8607 = vmatprep.subr.mxu0 %v9550_v10  ;;  %v1511_v43 = vld [vmem:[%s9606_s14] sm:$0xff]  ;;  %v7757_v44 = vld [vmem:[%s9601_s8 + $0x78] sm:$0xff]  ;;  %v7756_v45 = vld [vmem:[%s9601_s8 + $0x70] sm:$0xff]  ;;  %s11012_s5 = sld [smem:[#allocation29_spill]] }
  0x67   : > { %8608 = vmatpush3.msra.mxu0 %v1341_v15  ;;  %v7755_v46 = vld [vmem:[%s9601_s8 + $0x68] sm:$0xff]  ;;  %v7754_v47 = vld [vmem:[%s9601_s8 + $0x60] sm:$0xff]  ;;  %v7753_v48 = vld [vmem:[%s9601_s8 + $0x58] sm:$0xff] }
  0x68   : > { %8609 = vmatprep.subr.mxu0 %v9550_v10  ;;  %v7752_v49 = vld [vmem:[%s9601_s8 + $0x50] sm:$0xff]  ;;  %v7751_v50 = vld [vmem:[%s9601_s8 + $0x48] sm:$0xff]  ;;  %v7750_v51 = vld [vmem:[%s9601_s8 + $0x40] sm:$0xff] }
  0x69   : > { %8610 = vmatpush3.msra.mxu0 %v1340_v16  ;;  %v7730_v54 = vld [vmem:[%s9611_s19] ss:$0 sm:$0xff] }
  0x6a   : > { %8611 = vmatprep.subr.mxu0 %v9550_v10  ;;  %v7732_v55 = vld [vmem:[%s9616_s24] ss:$0 sm:$0xff] }
  0x6b   : > { %8612 = vmatpush3.msra.mxu0 %v1339_v17  ;;  %v7734_v61 = vld [vmem:[%s9621_s30] ss:$0 sm:$0xff] }
  0x6c   : > { %8613 = vmatprep.subr.mxu0 %v9550_v10  ;;  %v9897_v4 = vld [vmem:[%s9571_s13] sm:$0xff] }
  0x6d   : > { %8614 = vmatpush3.msra.mxu0 %v1338_v18  ;;  %v7746_v18 = vld [vmem:[%s10987_s3 + $0x78] sm:$0xff] }
  0x6e   : > { %8618 = vmatprep.subr.mxu0 %v9550_v10 }
  0xed   : > { %v1312_v5 = vpop.xlane.xlu0 %1311 }
  0xee   : > { %v1314_v6 = vmul.f32 0.015625, %v1312_v5 }
  0xf0   : > { %v1315_v7 = vsub.f32 %v9789_v3, %v1314_v6 }
  0xf2   : > { %v1316_v8 = vmul.f32 %v1315_v7, %v1315_v7 }
  0xf4   : > { %v1317_v9 = vsel %vm1309_vm0, %v1316_v8, 0.0 }
  0xf5   : > { %1318 = vadd.xlane.f32.xlu0 %v1317_v9 }
 0x17e   : > { %v1319_v19 = vpop.xlane.xlu0 %1318 }
 0x17f   : > { %v1320_v20 = vmul.f32 0.015625, %v1319_v19  ;;  %v7745_v19 = vld [vmem:[%s10987_s3 + $0x70] sm:$0xff] }
 0x181   : > { %v1321_v21 = vadd.f32 1e-05, %v1320_v20  ;;  %v7744_v20 = vld [vmem:[%s10987_s3 + $0x68] sm:$0xff] }
 0x183   : > { %9396 = vrsqrt.f32 %v1321_v21  ;;  %v7743_v21 = vld [vmem:[%s10987_s3 + $0x60] sm:$0xff] }
 0x190   : > { %v9397_v22 = vpop.eup %9396 }
 0x191   : > { %v1323_v24 = vmul.f32 %v9397_v22, %v1315_v7  ;;  %v7742_v22 = vld [vmem:[%s10987_s3 + $0x58] sm:$0xff] }
 0x193   : > { %v1330_v26 = vmul.f32 %v7728_v23, %v1323_v24  ;;  %v7741_v23 = vld [vmem:[%s10987_s3 + $0x50] sm:$0xff]  ;;  %v7740_v24 = vld [vmem:[%s10987_s3 + $0x48] sm:$0xff] }
 0x195   : > { %v9819_v27 = vadd.f32 %v7729_v25, %v1330_v26  ;;  %v7739_v25 = vld [vmem:[%s10987_s3 + $0x40] sm:$0xff]  ;;  %v7768_v26 = vld [vmem:[%s9606_s14 + $0x78] sm:$0xff] }
 0x197   : > { %8616 = vmatmul.mubr.msk.f32.vlgmr.msra.gmra.mxu0 %vm1309_vm0, %v9819_v27 }
 0x198   : > { %8619 = vmatpush3.msra.mxu0 %v1433_v28  ;;  %8634 = vmatprep.mubr.msk.f32.mxu0 %vm9551_vm1, %v9550_v10  ;;  %v7767_v28 = vld [vmem:[%s9606_s14 + $0x70] sm:$0xff] }
 0x199   : > { %8620 = vmatprep.subr.mxu0 %v9550_v10 }
 0x19a   : > { %8621 = vmatpush3.msra.mxu0 %v1432_v29  ;;  %v7766_v29 = vld [vmem:[%s9606_s14 + $0x68] sm:$0xff] }
 0x19b   : > { %8622 = vmatprep.subr.mxu0 %v9550_v10 }
 0x19c   : > { %8623 = vmatpush3.msra.mxu0 %v1431_v30  ;;  %v7765_v30 = vld [vmem:[%s9606_s14 + $0x60] sm:$0xff] }
 0x19d   : > { %8624 = vmatprep.subr.mxu0 %v9550_v10 }
 0x19e   : > { %8625 = vmatpush3.msra.mxu0 %v1430_v31  ;;  %v7764_v31 = vld [vmem:[%s9606_s14 + $0x58] sm:$0xff] }
 0x19f   : > { %8626 = vmatprep.subr.mxu0 %v9550_v10 }
 0x1a0   : > { %8627 = vmatpush3.msra.mxu0 %v1429_v32  ;;  %v7763_v32 = vld [vmem:[%s9606_s14 + $0x50] sm:$0xff] }
 0x1a1   : > { %8628 = vmatprep.subr.mxu0 %v9550_v10 }
 0x1a2   : > { %8629 = vmatpush3.msra.mxu0 %v1428_v33  ;;  %v7762_v33 = vld [vmem:[%s9606_s14 + $0x48] sm:$0xff] }
 0x1a3   : > { %8630 = vmatprep.subr.mxu0 %v9550_v10 }
 0x1a4   : > { %8631 = vmatpush3.msra.mxu0 %v1427_v34  ;;  %v7759_v34 = vld [vmem:[%s9616_s24 + $0x1] ss:$0 sm:$0xff] }
 0x1a5   : > { %8632 = vmatprep.subr.mxu0 %v9550_v10 }
 0x1a6   : > { %8633 = vmatpush3.msra.mxu0 %v1426_v35  ;;  %v7761_v35 = vld [vmem:[%s9606_s14 + $0x40] sm:$0xff] }
 0x1a7   : > { %8635 = vmatmul.mubr.msk.f32.vlgmr.msra.gmra.mxu0 %vm1309_vm0, %v9819_v27  ;;  %8637 = vmatprep.subr.mxu0 %v9550_v10 }
 0x1a8   : > { %8638 = vmatpush3.msra.mxu0 %v1518_v36  ;;  %8653 = vmatprep.mubr.msk.f32.mxu0 %vm9551_vm1, %v9550_v10 }
 0x1a9   : > { %8639 = vmatprep.subr.mxu0 %v9550_v10 }
 0x1aa   : > { %8640 = vmatpush3.msra.mxu0 %v1517_v37 }
 0x1ab   : > { %8641 = vmatprep.subr.mxu0 %v9550_v10 }
 0x1ac   : > { %8642 = vmatpush3.msra.mxu0 %v1516_v38 }
 0x1ad   : > { %8643 = vmatprep.subr.mxu0 %v9550_v10 }
 0x1ae   : > { %8644 = vmatpush3.msra.mxu0 %v1515_v39  ;;  %v7748_v39 = vld [vmem:[%s9611_s19 + $0x1] ss:$0 sm:$0xff] }
 0x1af   : > { %8645 = vmatprep.subr.mxu0 %v9550_v10 }
 0x1b0   : > { %8646 = vmatpush3.msra.mxu0 %v1514_v40 }
 0x1b1   : > { %8647 = vmatprep.subr.mxu0 %v9550_v10 }
 0x1b2   : > { %8648 = vmatpush3.msra.mxu0 %v1513_v41 }
 0x1b3   : > { %8649 = vmatprep.subr.mxu0 %v9550_v10 }
 0x1b4   : > { %8650 = vmatpush3.msra.mxu0 %v1512_v42 }
 0x1b5   : > { %8651 = vmatprep.subr.mxu0 %v9550_v10 }
 0x1b6   : > { %8652 = vmatpush3.msra.mxu0 %v1511_v43 }
 0x1b7   : > { %8654 = vmatmul.mubr.msk.f32.vlgmr.msra.gmra.mxu0 %vm1309_vm0, %v9819_v27  ;;  %8685 = vmatprep.subr.mxu0 %v9550_v10 }
 0x1b8   : > { %8686 = vmatpush3.msra.mxu0 %v7757_v44  ;;  %8701 = vmatprep.mubr.msk.f32.mxu0 %vm9551_vm1, %v9550_v10  ;;  %v1760_v44 = vld [vmem:[%s9626_s6 + $0x8] sm:$0xff] }
 0x1b9   : > { %8687 = vmatprep.subr.mxu0 %v9550_v10 }
 0x1ba   : > { %8688 = vmatpush3.msra.mxu0 %v7756_v45  ;;  %v1759_v45 = vld [vmem:[%s9626_s6] sm:$0xff] }
 0x1bb   : > { %8689 = vmatprep.subr.mxu0 %v9550_v10 }
 0x1bc   : > { %8690 = vmatpush3.msra.mxu0 %v7755_v46  ;;  %v7797_v46 = vld [vmem:[%s9601_s8 + $0xb8] sm:$0xff] }
 0x1bd   : > { %8691 = vmatprep.subr.mxu0 %v9550_v10 }
 0x1be   : > { %8692 = vmatpush3.msra.mxu0 %v7754_v47  ;;  %v7796_v47 = vld [vmem:[%s9601_s8 + $0xb0] sm:$0xff] }
 0x1bf   : > { %8693 = vmatprep.subr.mxu0 %v9550_v10 }
 0x1c0   : > { %8694 = vmatpush3.msra.mxu0 %v7753_v48  ;;  %v7795_v48 = vld [vmem:[%s9601_s8 + $0xa8] sm:$0xff] }
 0x1c1   : > { %8695 = vmatprep.subr.mxu0 %v9550_v10 }
 0x1c2   : > { %8696 = vmatpush3.msra.mxu0 %v7752_v49  ;;  %v7794_v49 = vld [vmem:[%s9601_s8 + $0xa0] sm:$0xff] }
 0x1c3   : > { %8697 = vmatprep.subr.mxu0 %v9550_v10 }
 0x1c4   : > { %8698 = vmatpush3.msra.mxu0 %v7751_v50  ;;  %v7770_v50 = vld [vmem:[%s9621_s30 + $0x1] ss:$0 sm:$0xff] }
 0x1c5   : > { %8699 = vmatprep.subr.mxu0 %v9550_v10 }
 0x1c6   : > { %8700 = vmatpush3.msra.mxu0 %v7750_v51  ;;  %v7793_v51 = vld [vmem:[%s9601_s8 + $0x98] sm:$0xff] }
 0x1c7   : > { %8702 = vmatmul.mubr.msk.f32.vlgmr.msra.gmra.mxu0 %vm1309_vm0, %v9819_v27  ;;  %8728 = vmatprep.subr.mxu0 %v9550_v10 }
 0x1c8   : > { %8730 = vmatprep.mubr.msk.f32.mxu0 %vm9551_vm1, %v9550_v10 }
 0x257   : > { %v1422_v52 = vpop.f32.mrf.mxu0 }
 0x258   : > { %v1423_v56 = vadd.f32 %v7730_v54, %v1422_v52  ;;  %v7792_v54 = vld [vmem:[%s9601_s8 + $0x90] sm:$0xff] }
 0x259   : > { %v8617_v53 = vpop.f32.mrf.mxu0 }
 0x25a   : > { %v1596_v60 = vmul.f32 0.25, %v1423_v56  ;;  %v7791_v56 = vld [vmem:[%s9601_s8 + $0x88] sm:$0xff] }
 0x267   : > { %v1507_v57 = vpop.f32.mrf.mxu0 }
 0x268   : > { %v1508_v58 = vadd.f32 %v7732_v55, %v1507_v57  ;;  %v7790_v57 = vld [vmem:[%s9601_s8 + $0x80] sm:$0xff] }
 0x269   : > { %v8636_v59 = vpop.f32.mrf.mxu0 }
 0x26a   : > { %8657 = vmatpush3.xpose.msk.msra.mxu1 %vm1597_vm2, %v1508_v58 }
 0x26b   : > { %8661 = vmatprep.subr.mxu1 %v9550_v10 }
 0x26d   : > { %8659 = vmatmul.mubr.msk.f32.vlgmr.msra.gmra.mxu1 %vm1597_vm2, %v1596_v60 }
 0x26e   : > { %8663 = vmatprep.mubr.msk.f32.mxu1 %vm9551_vm1, %v9550_v10 }
 0x277   : > { %v1592_v62 = vpop.f32.mrf.mxu0 }
 0x278   : > { %v1593_v63 = vadd.f32 %v7734_v61, %v1592_v62 }
 0x279   : > { %v8655_v0 = vpop.f32.mrf.mxu0 }
 0x27a   : > { %8662 = vmatpush3.msra.mxu1 %v1593_v63  ;;  %v7799_v0 = vld [vmem:[%s9616_s24 + $0x2] ss:$0 sm:$0xff] }
 0x27b   : > { %8666 = vmatprep.subr.mxu1 %v9550_v10 }
 0x287   : > { %v9894_v1 = vpop.f32.mrf.mxu0 }
 0x288   : > { %v1932_v36 = vadd.f32 %v7759_v34, %v9894_v1  ;;  %v7802_v34 = vld [vmem:[%s9606_s14 + $0x88] sm:$0xff] }
 0x289   : > { %v8703_v2 = vpop.f32.mrf.mxu0 }
 0x32d   : > { %v1670_v5 = vpop.f32.mrf.mxu1 }
 0x32e   : > { %v1671_v6 = vadd.f32 %v1670_v5, %v9897_v4 }
 0x32f   : > { %v8660_v7 = vpop.f32.mrf.mxu1 }
 0x330   : > { %v1675_v8 = vsel %vm1674_vm3, %v1671_v6, -inf }
 0x331   : > { %1676 = vmax.xlane.f32.xlu1 %v1675_v8 }
 0x3ba   : > { %v1677_v9 = vpop.xlane.xlu1 %1676 }
 0x3bb   : > { %v1678_v11 = vsub.f32 %v1671_v6, %v1677_v9 }
 0x3bd   : > { %v1679_v12 = vmul.f32 1.442695, %v1678_v11 }
 0x3bf   : > { %9398 = vpow2.f32 %v1679_v12 }
 0x3cc   : > { %v9399_v13 = vpop.eup %9398 }
 0x3cd   : > { %v1681_v14 = vsel %vm1674_vm3, %v9399_v13, 0.0 }
 0x3ce   : > { %1682 = vadd.xlane.f32.xlu1 %v1681_v14 }
 0x457   : > { %v1683_v15 = vpop.xlane.xlu1 %1682 }
 0x458   : > { %9400 = vrcp.f32 %v1683_v15  ;;  %v7776_v15 = vld [vmem:[%s9626_s6 + $0x18] sm:$0xff] }
 0x465   : > { %v9401_v16 = vpop.eup %9400 }
 0x466   : > { %v1685_v17 = vmul.f32 %v9401_v16, %v9399_v13  ;;  %v7775_v16 = vld [vmem:[%s9626_s6 + $0x10] sm:$0xff] }
 0x468   : > { %8664 = vmatmul.mubr.msk.f32.vlgmr.msra.gmra.mxu1 %vm1674_vm3, %v1685_v17  ;;  %v7786_v17 = vld [vmem:[%s10987_s3 + $0xb8] sm:$0xff] }
 0x469   : > { %8667 = vmatpush3.msra.mxu1 %v7746_v18  ;;  %8682 = vmatprep.mubr.msk.f32.mxu1 %vm9551_vm1, %v9550_v10 }
 0x46a   : > { %8668 = vmatprep.subr.mxu1 %v9550_v10 }
 0x46b   : > { %8669 = vmatpush3.msra.mxu1 %v7745_v19  ;;  %v7785_v19 = vld [vmem:[%s10987_s3 + $0xb0] sm:$0xff] }
 0x46c   : > { %8670 = vmatprep.subr.mxu1 %v9550_v10 }
 0x46d   : > { %8671 = vmatpush3.msra.mxu1 %v7744_v20 }
 0x46e   : > { %8672 = vmatprep.subr.mxu1 %v9550_v10 }
 0x46f   : > { %8673 = vmatpush3.msra.mxu1 %v7743_v21  ;;  %v7784_v21 = vld [vmem:[%s10987_s3 + $0xa8] sm:$0xff] }
 0x470   : > { %8674 = vmatprep.subr.mxu1 %v9550_v10 }
 0x471   : > { %8675 = vmatpush3.msra.mxu1 %v7742_v22  ;;  %v7783_v22 = vld [vmem:[%s10987_s3 + $0xa0] sm:$0xff] }
 0x472   : > { %8676 = vmatprep.subr.mxu1 %v9550_v10 }
 0x473   : > { %8677 = vmatpush3.msra.mxu1 %v7741_v23  ;;  %v7782_v23 = vld [vmem:[%s10987_s3 + $0x98] sm:$0xff] }
 0x474   : > { %8678 = vmatprep.subr.mxu1 %v9550_v10 }
 0x475   : > { %8679 = vmatpush3.msra.mxu1 %v7740_v24  ;;  %v7781_v24 = vld [vmem:[%s10987_s3 + $0x90] sm:$0xff] }
 0x476   : > { %8680 = vmatprep.subr.mxu1 %v9550_v10 }
 0x477   : > { %8681 = vmatpush3.msra.mxu1 %v7739_v25  ;;  %v7780_v25 = vld [vmem:[%s10987_s3 + $0x88] sm:$0xff] }
 0x478   : > { %8683 = vmatmul.mubr.msk.f32.vlgmr.msra.gmra.mxu1 %vm1309_vm0, %v9819_v27  ;;  %8704 = vmatprep.subr.mxu1 %v9550_v10 }
 0x479   : > { %8705 = vmatpush3.msra.mxu1 %v7768_v26  ;;  %8720 = vmatprep.mubr.msk.f32.mxu1 %vm9551_vm1, %v9550_v10  ;;  %v7779_v26 = vld [vmem:[%s10987_s3 + $0x80] sm:$0xff] }
 0x47a   : > { %8706 = vmatprep.subr.mxu1 %v9550_v10 }
 0x47b   : > { %8707 = vmatpush3.msra.mxu1 %v7767_v28  ;;  %v7808_v28 = vld [vmem:[%s9606_s14 + $0xb8] sm:$0xff] }
 0x47c   : > { %8708 = vmatprep.subr.mxu1 %v9550_v10 }
 0x47d   : > { %8709 = vmatpush3.msra.mxu1 %v7766_v29  ;;  %v7807_v29 = vld [vmem:[%s9606_s14 + $0xb0] sm:$0xff] }
 0x47e   : > { %8710 = vmatprep.subr.mxu1 %v9550_v10 }
 0x47f   : > { %8711 = vmatpush3.msra.mxu1 %v7765_v30  ;;  %v7806_v30 = vld [vmem:[%s9606_s14 + $0xa8] sm:$0xff] }
 0x480   : > { %8712 = vmatprep.subr.mxu1 %v9550_v10 }
 0x481   : > { %8713 = vmatpush3.msra.mxu1 %v7764_v31  ;;  %v7805_v31 = vld [vmem:[%s9606_s14 + $0xa0] sm:$0xff] }
 0x482   : > { %8714 = vmatprep.subr.mxu1 %v9550_v10 }
 0x483   : > { %8715 = vmatpush3.msra.mxu1 %v7763_v32  ;;  %v7804_v32 = vld [vmem:[%s9606_s14 + $0x98] sm:$0xff] }
 0x484   : > { %8716 = vmatprep.subr.mxu1 %v9550_v10 }
 0x485   : > { %8717 = vmatpush3.msra.mxu1 %v7762_v33  ;;  %v7803_v33 = vld [vmem:[%s9606_s14 + $0x90] sm:$0xff] }
 0x486   : > { %8718 = vmatprep.subr.mxu1 %v9550_v10 }
 0x487   : > { %8719 = vmatpush3.msra.mxu1 %v7761_v35  ;;  %v7801_v35 = vld [vmem:[%s9606_s14 + $0x80] sm:$0xff] }
 0x488   : > { %8721 = vmatmul.mubr.msk.f32.vlgmr.msra.gmra.mxu1 %vm1309_vm0, %v9819_v27  ;;  %8723 = vmatprep.subr.mxu1 %v9550_v10 }
 0x489   : > { %8724 = vmatpush3.xpose.msk.msra.mxu1 %vm1597_vm2, %v1932_v36  ;;  %8725 = vmatprep.mubr.msk.f32.mxu1 %vm9551_vm1, %v9550_v10  ;;  %v7836_v36 = vld [vmem:[%s9601_s8 + $0xf8] sm:$0xff] }
 0x48a   : > { %8740 = vmatprep.subr.mxu1 %v9550_v10 }
 0x528   : > { %v1755_v37 = vpop.f32.mrf.mxu1 }
 0x52a   : > { %v8665_v38 = vpop.f32.mrf.mxu1 }
 0x52b   : > { %v7834_v38 = vld [vmem:[%s9601_s8 + $0xe8] sm:$0xff] }
 0x538   : > { %v1844_v40 = vpop.f32.mrf.mxu1 }
 0x539   : > { %v1845_v41 = vadd.f32 %v7748_v39, %v1844_v40  ;;  %v7833_v39 = vld [vmem:[%s9601_s8 + $0xe0] sm:$0xff]  ;;  %v7832_v40 = vld [vmem:[%s9601_s8 + $0xd8] sm:$0xff] }
 0x53a   : > { %v8684_v42 = vpop.f32.mrf.mxu1 }
 0x53b   : > { %v2022_v43 = vmul.f32 0.25, %v1845_v41  ;;  %v7831_v41 = vld [vmem:[%s9601_s8 + $0xd0] sm:$0xff]  ;;  %v7830_v42 = vld [vmem:[%s9601_s8 + $0xc8] sm:$0xff] }
 0x53d   : > { %8726 = vmatmul.mubr.msk.f32.vlgmr.msra.gmra.mxu1 %vm1597_vm2, %v2022_v43  ;;  %v7829_v43 = vld [vmem:[%s9601_s8 + $0xc0] sm:$0xff] }
 0x53e   : > { %8741 = vmatpush3.msra.mxu1 %v1760_v44  ;;  %8744 = vmatprep.mubr.msk.f32.mxu1 %vm9551_vm1, %v9550_v10 }
 0x53f   : > { %8742 = vmatprep.subr.mxu1 %v9550_v10 }
 0x540   : > { %8743 = vmatpush3.msra.mxu1 %v1759_v45 }
 0x541   : > { %8766 = vmatprep.subr.mxu1 %v9550_v10  ;;  %8745 = vmatmul.mubr.msk.f32.vlgmr.msra.gmra.mxu1 %vm1597_vm2, %v1755_v37  ;;  %v7835_v37 = vld [vmem:[%s9601_s8 + $0xf0] sm:$0xff] }
 0x542   : > { %8767 = vmatpush3.msra.mxu1 %v7797_v46  ;;  %8782 = vmatprep.mubr.msk.f32.mxu1 %vm9551_vm1, %v9550_v10  ;;  %v7788_v46 = vld [vmem:[%s9611_s19 + $0x2] ss:$0 sm:$0xff] }
 0x543   : > { %8768 = vmatprep.subr.mxu1 %v9550_v10 }
 0x544   : > { %8769 = vmatpush3.msra.mxu1 %v7796_v47 }
 0x545   : > { %8770 = vmatprep.subr.mxu1 %v9550_v10 }
 0x546   : > { %8771 = vmatpush3.msra.mxu1 %v7795_v48 }
 0x547   : > { %8772 = vmatprep.subr.mxu1 %v9550_v10 }
 0x548   : > { %8773 = vmatpush3.msra.mxu1 %v7794_v49  ;;  %v2018_v52 = vpop.f32.mrf.mxu1 }
 0x549   : > { %v2019_v53 = vadd.f32 %v7770_v50, %v2018_v52  ;;  %8774 = vmatprep.subr.mxu1 %v9550_v10 }
 0x54a   : > { %8775 = vmatpush3.msra.mxu1 %v7793_v51  ;;  %v8722_v55 = vpop.f32.mrf.mxu1  ;;  %v7810_v51 = vld [vmem:[%s9621_s30 + $0x2] ss:$0 sm:$0xff] }
 0x54b   : > { %8776 = vmatprep.subr.mxu1 %v9550_v10  ;;  %8729 = vmatpush3.msra.mxu0 %v2019_v53  ;;  %v7838_v55 = vld [vmem:[%s9616_s24 + $0x3] ss:$0 sm:$0xff] }
 0x54c   : > { %8777 = vmatpush3.msra.mxu1 %v7792_v54  ;;  %8733 = vmatprep.subr.mxu0 %v9550_v10 }
 0x54d   : > { %8778 = vmatprep.subr.mxu1 %v9550_v10 }
 0x54e   : > { %8779 = vmatpush3.msra.mxu1 %v7791_v56 }
 0x54f   : > { %8780 = vmatprep.subr.mxu1 %v9550_v10 }
 0x550   : > { %8781 = vmatpush3.msra.mxu1 %v7790_v57 }
 0x551   : > { %8783 = vmatmul.mubr.msk.f32.vlgmr.msra.gmra.mxu1 %vm1309_vm0, %v9819_v27  ;;  %8804 = vmatprep.subr.mxu1 %v9550_v10 }
 0x552   : > { %8806 = vmatprep.mubr.msk.f32.mxu1 %vm9551_vm1, %v9550_v10 }
 0x5fd   : > { %v2095_v58 = vpop.f32.mrf.mxu1 }
 0x5fe   : > { %v2096_v59 = vadd.f32 %v2095_v58, %v9897_v4 }
 0x5ff   : > { %v8727_v60 = vpop.f32.mrf.mxu1 }
 0x600   : > { %v2099_v61 = vsel %vm1674_vm3, %v2096_v59, -inf }
 0x601   : > { %2100 = vmax.xlane.f32.xlu0 %v2099_v61  ;;  %v9984_v62 = vpop.f32.mrf.mxu1 }
 0x603   : > { %v8746_v63 = vpop.f32.mrf.mxu1 }
 0x611   : > { %v2502_v1 = vpop.f32.mrf.mxu1 }
 0x612   : > { %v2503_v2 = vadd.f32 %v7799_v0, %v2502_v1 }
 0x613   : > { %v8784_v5 = vpop.f32.mrf.mxu1 }
 0x614   : > { %8805 = vmatpush3.xpose.msk.msra.mxu1 %vm1597_vm2, %v2503_v2 }
 0x615   : > { %8809 = vmatprep.subr.mxu1 %v9550_v10 }
 0x68a   : > { %v2101_v6 = vpop.xlane.xlu0 %2100 }
 0x68b   : > { %v2102_v7 = vsub.f32 %v2096_v59, %v2101_v6 }
 0x68d   : > { %v2103_v8 = vmul.f32 1.442695, %v2102_v7 }
 0x68f   : > { %9402 = vpow2.f32 %v2103_v8 }
 0x69c   : > { %v9403_v9 = vpop.eup %9402 }
 0x69d   : > { %v2105_v11 = vsel %vm1674_vm3, %v9403_v9, 0.0 }
 0x69e   : > { %2106 = vadd.xlane.f32.xlu1 %v2105_v11  ;;  %v7816_v11 = vld [vmem:[%s9626_s6 + $0x28] sm:$0xff] }
 0x727   : > { %v2107_v12 = vpop.xlane.xlu1 %2106 }
 0x728   : > { %9404 = vrcp.f32 %v2107_v12  ;;  %v7815_v12 = vld [vmem:[%s9626_s6 + $0x20] sm:$0xff] }
 0x735   : > { %v9405_v13 = vpop.eup %9404 }
 0x736   : > { %v2109_v14 = vmul.f32 %v9405_v13, %v9403_v9  ;;  %v7825_v13 = vld [vmem:[%s10987_s3 + $0xf8] sm:$0xff] }
 0x738   : > { %8731 = vmatmul.mubr.msk.f32.vlgmr.msra.gmra.mxu0 %vm1674_vm3, %v2109_v14 }
 0x739   : > { %8734 = vmatpush3.msra.mxu0 %v7776_v15  ;;  %8737 = vmatprep.mubr.msk.f32.mxu0 %vm9551_vm1, %v9550_v10  ;;  %v7824_v15 = vld [vmem:[%s10987_s3 + $0xf0] sm:$0xff] }
 0x73a   : > { %8735 = vmatprep.subr.mxu0 %v9550_v10 }
 0x73b   : > { %8736 = vmatpush3.msra.mxu0 %v7775_v16 }
 0x73c   : > { %8747 = vmatprep.subr.mxu0 %v9550_v10 }
 0x7f8   : > { %v2179_v18 = vpop.f32.mrf.mxu0 }
 0x7f9   : > { %8738 = vmatmul.mubr.msk.f32.vlgmr.msra.gmra.mxu0 %vm1597_vm2, %v2179_v18  ;;  %v7822_v18 = vld [vmem:[%s10987_s3 + $0xe0] sm:$0xff] }
 0x7fa   : > { %8748 = vmatpush3.msra.mxu0 %v7786_v17  ;;  %v8732_v20 = vpop.f32.mrf.mxu0  ;;  %8763 = vmatprep.mubr.msk.f32.mxu0 %vm9551_vm1, %v9550_v10  ;;  %v7823_v17 = vld [vmem:[%s10987_s3 + $0xe8] sm:$0xff] }
 0x7fb   : > { %8749 = vmatprep.subr.mxu0 %v9550_v10  ;;  %v7820_v20 = vld [vmem:[%s10987_s3 + $0xd0] sm:$0xff] }
 0x7fc   : > { %8750 = vmatpush3.msra.mxu0 %v7785_v19  ;;  %v7821_v19 = vld [vmem:[%s10987_s3 + $0xd8] sm:$0xff] }
 0x7fd   : > { %8751 = vmatprep.subr.mxu0 %v9550_v10 }
 0x7fe   : > { %8752 = vmatpush3.msra.mxu0 %v7784_v21  ;;  %v7819_v21 = vld [vmem:[%s10987_s3 + $0xc8] sm:$0xff] }
 0x7ff   : > { %8753 = vmatprep.subr.mxu0 %v9550_v10 }
 0x800   : > { %8754 = vmatpush3.msra.mxu0 %v7783_v22  ;;  %v7818_v22 = vld [vmem:[%s10987_s3 + $0xc0] sm:$0xff] }
 0x801   : > { %8755 = vmatprep.subr.mxu0 %v9550_v10 }
 0x802   : > { %8756 = vmatpush3.msra.mxu0 %v7782_v23  ;;  %v7847_v23 = vld [vmem:[%s9606_s14 + $0xf8] sm:$0xff] }
 0x803   : > { %8757 = vmatprep.subr.mxu0 %v9550_v10 }
 0x804   : > { %8758 = vmatpush3.msra.mxu0 %v7781_v24  ;;  %v7846_v24 = vld [vmem:[%s9606_s14 + $0xf0] sm:$0xff] }
 0x805   : > { %8759 = vmatprep.subr.mxu0 %v9550_v10 }
 0x806   : > { %8760 = vmatpush3.msra.mxu0 %v7780_v25  ;;  %v7845_v25 = vld [vmem:[%s9606_s14 + $0xe8] sm:$0xff] }
 0x807   : > { %8761 = vmatprep.subr.mxu0 %v9550_v10 }
 0x808   : > { %8762 = vmatpush3.msra.mxu0 %v7779_v26  ;;  %v7844_v26 = vld [vmem:[%s9606_s14 + $0xe0] sm:$0xff] }
 0x809   : > { %8764 = vmatmul.mubr.msk.f32.vlgmr.msra.gmra.mxu0 %vm1309_vm0, %v9819_v27  ;;  %8785 = vmatprep.subr.mxu0 %v9550_v10 }
 0x80a   : > { %8786 = vmatpush3.msra.mxu0 %v7808_v28  ;;  %8801 = vmatprep.mubr.msk.f32.mxu0 %vm9551_vm1, %v9550_v10  ;;  %v7843_v28 = vld [vmem:[%s9606_s14 + $0xd8] sm:$0xff] }
 0x80b   : > { %8787 = vmatprep.subr.mxu0 %v9550_v10 }
 0x80c   : > { %8788 = vmatpush3.msra.mxu0 %v7807_v29  ;;  %v7842_v29 = vld [vmem:[%s9606_s14 + $0xd0] sm:$0xff] }
 0x80d   : > { %8789 = vmatprep.subr.mxu0 %v9550_v10 }
 0x80e   : > { %8790 = vmatpush3.msra.mxu0 %v7806_v30  ;;  %v7841_v30 = vld [vmem:[%s9606_s14 + $0xc8] sm:$0xff] }
 0x80f   : > { %8791 = vmatprep.subr.mxu0 %v9550_v10 }
 0x810   : > { %8792 = vmatpush3.msra.mxu0 %v7805_v31  ;;  %v7840_v31 = vld [vmem:[%s9606_s14 + $0xc0] sm:$0xff] }
 0x811   : > { %8793 = vmatprep.subr.mxu0 %v9550_v10 }
 0x812   : > { %8794 = vmatpush3.msra.mxu0 %v7804_v32 }
 0x813   : > { %8795 = vmatprep.subr.mxu0 %v9550_v10 }
 0x814   : > { %8796 = vmatpush3.msra.mxu0 %v7803_v33 }
 0x815   : > { %8797 = vmatprep.subr.mxu0 %v9550_v10 }
 0x816   : > { %8798 = vmatpush3.msra.mxu0 %v7802_v34 }
 0x817   : > { %8799 = vmatprep.subr.mxu0 %v9550_v10 }
 0x818   : > { %8800 = vmatpush3.msra.mxu0 %v7801_v35 }
 0x819   : > { %8802 = vmatmul.mubr.msk.f32.vlgmr.msra.gmra.mxu0 %vm1309_vm0, %v9819_v27  ;;  %8840 = vmatprep.subr.mxu0 %v9550_v10 }
 0x81a   : > { %8841 = vmatpush3.msra.mxu0 %v7836_v36  ;;  %8856 = vmatprep.mubr.msk.f32.mxu0 %vm9551_vm1, %v9550_v10  ;;  %v7827_v36 = vld [vmem:[%s9611_s19 + $0x3] ss:$0 sm:$0xff] }
 0x81b   : > { %8842 = vmatprep.subr.mxu0 %v9550_v10 }
 0x81c   : > { %8843 = vmatpush3.msra.mxu0 %v7835_v37 }
 0x81d   : > { %8844 = vmatprep.subr.mxu0 %v9550_v10 }
 0x81e   : > { %8845 = vmatpush3.msra.mxu0 %v7834_v38 }
 0x81f   : > { %8846 = vmatprep.subr.mxu0 %v9550_v10 }
 0x820   : > { %8847 = vmatpush3.msra.mxu0 %v7833_v39 }
 0x821   : > { %8848 = vmatprep.subr.mxu0 %v9550_v10 }
 0x822   : > { %8849 = vmatpush3.msra.mxu0 %v7832_v40 }
 0x823   : > { %8850 = vmatprep.subr.mxu0 %v9550_v10 }
 0x824   : > { %8851 = vmatpush3.msra.mxu0 %v7831_v41  ;;  %v7849_v41 = vld [vmem:[%s9621_s30 + $0x3] ss:$0 sm:$0xff] }
 0x825   : > { %8852 = vmatprep.subr.mxu0 %v9550_v10 }
 0x826   : > { %8853 = vmatpush3.msra.mxu0 %v7830_v42 }
 0x827   : > { %8854 = vmatprep.subr.mxu0 %v9550_v10 }
 0x828   : > { %8855 = vmatpush3.msra.mxu0 %v7829_v43 }
 0x829   : > { %8857 = vmatmul.mubr.msk.f32.vlgmr.msra.gmra.mxu0 %vm1309_vm0, %v9819_v27  ;;  %8878 = vmatprep.subr.mxu0 %v9550_v10 }
 0x82a   : > { %8880 = vmatprep.mubr.msk.f32.mxu0 %vm9551_vm1, %v9550_v10 }
 0x8b9   : > { %v10060_v44 = vpop.f32.mrf.mxu0 }
 0x8ba   : > { %v2329_v32 = vadd.f32 %v9984_v62, %v10060_v44 }
 0x8bb   : > { %v8739_v45 = vpop.f32.mrf.mxu0 }
 0x8c9   : > { %v2415_v47 = vpop.f32.mrf.mxu0 }
 0x8ca   : > { %v2416_v48 = vadd.f32 %v7788_v46, %v2415_v47 }
 0x8cb   : > { %v8765_v49 = vpop.f32.mrf.mxu0 }
 0x8cc   : > { %v2593_v50 = vmul.f32 0.25, %v2416_v48 }
 0x8ce   : > { %8807 = vmatmul.mubr.msk.f32.vlgmr.msra.gmra.mxu1 %vm1597_vm2, %v2593_v50 }
 0x8cf   : > { %8811 = vmatprep.mubr.msk.f32.mxu1 %vm9551_vm1, %v9550_v10 }
 0x8d9   : > { %v2589_v52 = vpop.f32.mrf.mxu0 }
 0x8da   : > { %v2590_v53 = vadd.f32 %v7810_v51, %v2589_v52 }
 0x8db   : > { %v8803_v54 = vpop.f32.mrf.mxu0 }
 0x8dc   : > { %8810 = vmatpush3.msra.mxu1 %v2590_v53 }
 0x8dd   : > { %8814 = vmatprep.subr.mxu1 %v9550_v10 }
 0x8e9   : > { %v3001_v56 = vpop.f32.mrf.mxu0 }
 0x8ea   : > { %v3002_v57 = vadd.f32 %v7838_v55, %v3001_v56  ;;  %v7855_v55 = vld [vmem:[%s9626_s6 + $0x38] sm:$0xff] }
 0x8eb   : > { %v8858_v58 = vpop.f32.mrf.mxu0 }
 0x8ec   : > { %8879 = vmatpush3.xpose.msk.msra.mxu0 %vm1597_vm2, %v3002_v57 }
 0x8ed   : > { %8883 = vmatprep.subr.mxu0 %v9550_v10 }
 0x98e   : > { %v2666_v59 = vpop.f32.mrf.mxu1 }
 0x98f   : > { %v2667_v60 = vadd.f32 %v2666_v59, %v9897_v4 }
 0x990   : > { %v8808_v61 = vpop.f32.mrf.mxu1 }
 0x991   : > { %v2670_v63 = vsel %vm1674_vm3, %v2667_v60, -inf }
 0x992   : > { %2671 = vmax.xlane.f32.xlu0 %v2670_v63 }
 0xa1b   : > { %v2672_v0 = vpop.xlane.xlu0 %2671 }
 0xa1c   : > { %v2673_v1 = vsub.f32 %v2667_v60, %v2672_v0  ;;  %v7857_v60 = vld [vmem:[%s9631_s12] ss:$0 sm:$0xff] }
 0xa1e   : > { %v2674_v2 = vmul.f32 1.442695, %v2673_v1 }
 0xa20   : > { %9406 = vpow2.f32 %v2674_v2 }
 0xa2d   : > { %v9407_v5 = vpop.eup %9406 }
 0xa2e   : > { %v2676_v6 = vsel %vm1674_vm3, %v9407_v5, 0.0 }
 0xa2f   : > { %2677 = vadd.xlane.f32.xlu1 %v2676_v6 }
 0xab8   : > { %v2678_v7 = vpop.xlane.xlu1 %2677 }
 0xab9   : > { %9408 = vrcp.f32 %v2678_v7 }
 0xac6   : > { %v9409_v8 = vpop.eup %9408 }
 0xac7   : > { %v2680_v9 = vmul.f32 %v9409_v8, %v9407_v5 }
 0xac9   : > { %8812 = vmatmul.mubr.msk.f32.vlgmr.msra.gmra.mxu1 %vm1674_vm3, %v2680_v9  ;;  %v3382_v9 = vld [vmem:[%s10989_s26 + $0x70] sm:$0xff] }
 0xaca   : > { %8815 = vmatpush3.msra.mxu1 %v7816_v11  ;;  %8818 = vmatprep.mubr.msk.f32.mxu1 %vm9551_vm1, %v9550_v10  ;;  %v3381_v11 = vld [vmem:[%s10989_s26 + $0x68] sm:$0xff] }
 0xacb   : > { %8816 = vmatprep.subr.mxu1 %v9550_v10 }
 0xacc   : > { %8817 = vmatpush3.msra.mxu1 %v7815_v12  ;;  %v3380_v12 = vld [vmem:[%s10989_s26 + $0x60] sm:$0xff] }
 0xacd   : > { %8821 = vmatprep.subr.mxu1 %v9550_v10 }
 0xb89   : > { %v2750_v14 = vpop.f32.mrf.mxu1 }
 0xb8a   : > { %8819 = vmatmul.mubr.msk.f32.vlgmr.msra.gmra.mxu1 %vm1597_vm2, %v2750_v14  ;;  %v3378_v14 = vld [vmem:[%s10989_s26 + $0x50] sm:$0xff] }
 0xb8b   : > { %8822 = vmatpush3.msra.mxu1 %v7825_v13  ;;  %v8813_v16 = vpop.f32.mrf.mxu1  ;;  %8837 = vmatprep.mubr.msk.f32.mxu1 %vm9551_vm1, %v9550_v10  ;;  %v3379_v13 = vld [vmem:[%s10989_s26 + $0x58] sm:$0xff] }
 0xb8c   : > { %8823 = vmatprep.subr.mxu1 %v9550_v10  ;;  %v3376_v16 = vld [vmem:[%s10989_s26 + $0x40] sm:$0xff] }
 0xb8d   : > { %8824 = vmatpush3.msra.mxu1 %v7824_v15  ;;  %v3377_v15 = vld [vmem:[%s10989_s26 + $0x48] sm:$0xff] }
 0xb8e   : > { %8825 = vmatprep.subr.mxu1 %v9550_v10 }
 0xb8f   : > { %8826 = vmatpush3.msra.mxu1 %v7823_v17  ;;  %v3375_v17 = vld [vmem:[%s10989_s26 + $0x38] sm:$0xff] }
 0xb90   : > { %8827 = vmatprep.subr.mxu1 %v9550_v10 }
 0xb91   : > { %8828 = vmatpush3.msra.mxu1 %v7822_v18  ;;  %v3374_v18 = vld [vmem:[%s10989_s26 + $0x30] sm:$0xff] }
 0xb92   : > { %8829 = vmatprep.subr.mxu1 %v9550_v10 }
 0xb93   : > { %8830 = vmatpush3.msra.mxu1 %v7821_v19  ;;  %v3373_v19 = vld [vmem:[%s10989_s26 + $0x28] sm:$0xff] }
 0xb94   : > { %8831 = vmatprep.subr.mxu1 %v9550_v10 }
 0xb95   : > { %8832 = vmatpush3.msra.mxu1 %v7820_v20  ;;  %v3372_v20 = vld [vmem:[%s10989_s26 + $0x20] sm:$0xff] }
 0xb96   : > { %8833 = vmatprep.subr.mxu1 %v9550_v10 }
 0xb97   : > { %8834 = vmatpush3.msra.mxu1 %v7819_v21  ;;  %v3371_v21 = vld [vmem:[%s10989_s26 + $0x18] sm:$0xff] }
 0xb98   : > { %8835 = vmatprep.subr.mxu1 %v9550_v10 }
 0xb99   : > { %8836 = vmatpush3.msra.mxu1 %v7818_v22  ;;  %v3370_v22 = vld [vmem:[%s10989_s26 + $0x10] sm:$0xff] }
 0xb9a   : > { %8838 = vmatmul.mubr.msk.f32.vlgmr.msra.gmra.mxu1 %vm1309_vm0, %v9819_v27  ;;  %8859 = vmatprep.subr.mxu1 %v9550_v10 }
 0xb9b   : > { %8860 = vmatpush3.msra.mxu1 %v7847_v23  ;;  %8875 = vmatprep.mubr.msk.f32.mxu1 %vm9551_vm1, %v9550_v10  ;;  %v3369_v23 = vld [vmem:[%s10989_s26 + $0x8] sm:$0xff] }
 0xb9c   : > { %8861 = vmatprep.subr.mxu1 %v9550_v10 }
 0xb9d   : > { %8862 = vmatpush3.msra.mxu1 %v7846_v24  ;;  %v3368_v24 = vld [vmem:[%s10989_s26] sm:$0xff] }
 0xb9e   : > { %8863 = vmatprep.subr.mxu1 %v9550_v10 }
 0xb9f   : > { %8864 = vmatpush3.msra.mxu1 %v7845_v25 }
 0xba0   : > { %8865 = vmatprep.subr.mxu1 %v9550_v10 }
 0xba1   : > { %8866 = vmatpush3.msra.mxu1 %v7844_v26 }
 0xba2   : > { %8867 = vmatprep.subr.mxu1 %v9550_v10 }
 0xba3   : > { %8868 = vmatpush3.msra.mxu1 %v7843_v28 }
 0xba4   : > { %8869 = vmatprep.subr.mxu1 %v9550_v10 }
 0xba5   : > { %8870 = vmatpush3.msra.mxu1 %v7842_v29 }
 0xba6   : > { %8871 = vmatprep.subr.mxu1 %v9550_v10 }
 0xba7   : > { %8872 = vmatpush3.msra.mxu1 %v7841_v30  ;;  %v7858_v30 = vld [vmem:[%s10990_s1] ss:$0 sm:$0xff] }
 0xba8   : > { %8873 = vmatprep.subr.mxu1 %v9550_v10 }
 0xba9   : > { %8874 = vmatpush3.msra.mxu1 %v7840_v31 }
 0xbaa   : > { %8876 = vmatmul.mubr.msk.f32.vlgmr.msra.gmra.mxu1 %vm1309_vm0, %v9819_v27 }
 0xc4a   : > { %v2826_v33 = vpop.f32.mrf.mxu1 }
 0xc4b   : > { %v2830_v34 = vadd.f32 %v2826_v33, %v2329_v32  ;;  %v7859_v32 = vld [vmem:[%s10991_s28] ss:$0 sm:$0xff] }
 0xc4c   : > { %v8820_v35 = vpop.f32.mrf.mxu1 }
 0xc4d   : > { %v3517_v35 = vld [vmem:[%s10992_s2 + $0xf8] sm:$0xff] }
 0xc4e   : > { %8255 = vmatprep.subr.mxu1 %v3517_v35 }
 0xc5a   : > { %v2914_v37 = vpop.f32.mrf.mxu1 }
 0xc5b   : > { %v2915_v38 = vadd.f32 %v7827_v36, %v2914_v37  ;;  %v3501_v36 = vld [vmem:[%s10992_s2 + $0x78] sm:$0xff]  ;;  %v3516_v37 = vld [vmem:[%s10992_s2 + $0xf0] sm:$0xff] }
 0xc5c   : > { %v8839_v39 = vpop.f32.mrf.mxu1  ;;  %8256 = vmatpush3.msra.mxu1 %v3501_v36 }
 0xc5d   : > { %v3092_v40 = vmul.f32 0.25, %v2915_v38  ;;  %8257 = vmatprep.subr.mxu1 %v3516_v37  ;;  %v3500_v38 = vld [vmem:[%s10992_s2 + $0x70] sm:$0xff]  ;;  %v3515_v39 = vld [vmem:[%s10992_s2 + $0xe8] sm:$0xff] }
 0xc5e   : > { %8258 = vmatpush3.msra.mxu1 %v3500_v38 }
 0xc5f   : > { %8881 = vmatmul.mubr.msk.f32.vlgmr.msra.gmra.mxu0 %vm1597_vm2, %v3092_v40  ;;  %8259 = vmatprep.subr.mxu1 %v3515_v39  ;;  %v3499_v40 = vld [vmem:[%s10992_s2 + $0x68] sm:$0xff] }
 0xc60   : > { %8885 = vmatprep.mubr.msk.f32.mxu0 %vm9551_vm1, %v9550_v10  ;;  %8260 = vmatpush3.msra.mxu1 %v3499_v40  ;;  %v7875_v40 = vld [vmem:[%s10987_s3 + $0x138] sm:$0xff] }
 0xc6a   : > { %v3088_v42 = vpop.f32.mrf.mxu1 }
 0xc6b   : > { %v3089_v43 = vadd.f32 %v7849_v41, %v3088_v42  ;;  %v3514_v41 = vld [vmem:[%s10992_s2 + $0xe0] sm:$0xff] }
 0xc6c   : > { %v8877_v27 = vpop.f32.mrf.mxu1  ;;  %8261 = vmatprep.subr.mxu1 %v3514_v41  ;;  %v3498_v42 = vld [vmem:[%s10992_s2 + $0x60] sm:$0xff]  ;;  %v7874_v41 = vld [vmem:[%s10987_s3 + $0x130] sm:$0xff] }
 0xc6d   : > { %8884 = vmatpush3.msra.mxu0 %v3089_v43  ;;  %8262 = vmatpush3.msra.mxu1 %v3498_v42  ;;  %v3513_v43 = vld [vmem:[%s10992_s2 + $0xd8] sm:$0xff]  ;;  %v7896_v42 = vld [vmem:[%s9606_s14 + $0x130] sm:$0xff] }
 0xc6e   : > { %8888 = vmatprep.subr.mxu0 %v9550_v10  ;;  %8263 = vmatprep.subr.mxu1 %v3513_v43  ;;  %v3497_v27 = vld [vmem:[%s10992_s2 + $0x58] sm:$0xff]  ;;  %v7873_v43 = vld [vmem:[%s10987_s3 + $0x128] sm:$0xff] }
 0xc6f   : > { %8264 = vmatpush3.msra.mxu1 %v3497_v27  ;;  %v7895_v27 = vld [vmem:[%s9606_s14 + $0x128] sm:$0xff] }
 0xd1f   : > { %v3165_v62 = vpop.f32.mrf.mxu0 }
 0xd20   : > { %v3166_v44 = vadd.f32 %v3165_v62, %v9897_v4  ;;  %v7854_v4 = vld [vmem:[%s9626_s6 + $0x30] sm:$0xff] }
 0xd21   : > { %v8882_v45 = vpop.f32.mrf.mxu0  ;;  %v3512_v62 = vld [vmem:[%s10992_s2 + $0xd0] sm:$0xff] }
 0xd22   : > { %v3169_v46 = vsel %vm1674_vm3, %v3166_v44, -inf  ;;  %8265 = vmatprep.subr.mxu1 %v3512_v62  ;;  %v3511_v45 = vld [vmem:[%s10992_s2 + $0xc8] sm:$0xff]  ;;  %v7872_v62 = vld [vmem:[%s10987_s3 + $0x120] sm:$0xff] }
 0xd23   : > { %3170 = vmax.xlane.f32.xlu0 %v3169_v46  ;;  %v3495_v46 = vld [vmem:[%s10992_s2 + $0x48] sm:$0xff] }
 0xdac   : > { %v3171_v47 = vpop.xlane.xlu0 %3170 }
 0xdad   : > { %v3172_v48 = vsub.f32 %v3166_v44, %v3171_v47  ;;  %v3496_v44 = vld [vmem:[%s10992_s2 + $0x50] sm:$0xff]  ;;  %v3510_v47 = vld [vmem:[%s10992_s2 + $0xc0] sm:$0xff] }
 0xdae   : > { %8266 = vmatpush3.msra.mxu1 %v3496_v44  ;;  %v7894_v44 = vld [vmem:[%s9606_s14 + $0x120] sm:$0xff] }
 0xdaf   : > { %v3173_v49 = vmul.f32 1.442695, %v3172_v48  ;;  %8267 = vmatprep.subr.mxu1 %v3511_v45  ;;  %v3494_v48 = vld [vmem:[%s10992_s2 + $0x40] sm:$0xff]  ;;  %v7871_v45 = vld [vmem:[%s10987_s3 + $0x118] sm:$0xff] }
 0xdb0   : > { %8268 = vmatpush3.msra.mxu1 %v3495_v46  ;;  %v7893_v46 = vld [vmem:[%s9606_s14 + $0x118] sm:$0xff] }
 0xdb1   : > { %9410 = vpow2.f32 %v3173_v49  ;;  %8269 = vmatprep.subr.mxu1 %v3510_v47  ;;  %v3509_v49 = vld [vmem:[%s10992_s2 + $0xb8] sm:$0xff]  ;;  %v7870_v47 = vld [vmem:[%s10987_s3 + $0x110] sm:$0xff] }
 0xdb2   : > { %8270 = vmatpush3.msra.mxu1 %v3494_v48  ;;  %v7892_v48 = vld [vmem:[%s9606_s14 + $0x110] sm:$0xff] }
 0xdb3   : > { %8271 = vmatprep.subr.mxu1 %v3509_v49  ;;  %v7869_v49 = vld [vmem:[%s10987_s3 + $0x108] sm:$0xff] }
 0xdbe   : > { %v9411_v50 = vpop.eup %9410 }
 0xdbf   : > { %v3175_v51 = vsel %vm1674_vm3, %v9411_v50, 0.0 }
 0xdc0   : > { %3176 = vadd.xlane.f32.xlu1 %v3175_v51  ;;  %v3508_v51 = vld [vmem:[%s10992_s2 + $0xb0] sm:$0xff] }
 0xe49   : > { %v3177_v52 = vpop.xlane.xlu1 %3176 }
 0xe4a   : > { %9412 = vrcp.f32 %v3177_v52  ;;  %v3492_v52 = vld [vmem:[%s10992_s2 + $0x30] sm:$0xff] }
 0xe57   : > { %v9413_v53 = vpop.eup %9412 }
 0xe58   : > { %v3179_v54 = vmul.f32 %v9413_v53, %v9411_v50  ;;  %v3493_v50 = vld [vmem:[%s10992_s2 + $0x38] sm:$0xff]  ;;  %v3507_v53 = vld [vmem:[%s10992_s2 + $0xa8] sm:$0xff] }
 0xe59   : > { %8272 = vmatpush3.msra.mxu1 %v3493_v50  ;;  %v7891_v50 = vld [vmem:[%s9606_s14 + $0x108] sm:$0xff] }
 0xe5a   : > { %8886 = vmatmul.mubr.msk.f32.vlgmr.msra.gmra.mxu0 %vm1674_vm3, %v3179_v54  ;;  %8273 = vmatprep.subr.mxu1 %v3508_v51  ;;  %v3491_v54 = vld [vmem:[%s10992_s2 + $0x28] sm:$0xff]  ;;  %v7868_v51 = vld [vmem:[%s10987_s3 + $0x100] sm:$0xff] }
 0xe5b   : > { %8889 = vmatpush3.msra.mxu0 %v7855_v55  ;;  %8892 = vmatprep.mubr.msk.f32.mxu0 %vm9551_vm1, %v9550_v10  ;;  %v3506_v55 = vld [vmem:[%s10992_s2 + $0xa0] sm:$0xff] }
 0xe5c   : > { %8890 = vmatprep.subr.mxu0 %v9550_v10  ;;  %8274 = vmatpush3.msra.mxu1 %v3492_v52  ;;  %v7890_v52 = vld [vmem:[%s9606_s14 + $0x100] sm:$0xff] }
 0xe5d   : > { %8891 = vmatpush3.msra.mxu0 %v7854_v4  ;;  %8275 = vmatprep.subr.mxu1 %v3507_v53  ;;  %v3490_v4 = vld [vmem:[%s10992_s2 + $0x20] sm:$0xff] }
 0xe5e   : > { %8276 = vmatpush3.msra.mxu1 %v3491_v54 }
 0xe5f   : > { %8277 = vmatprep.subr.mxu1 %v3506_v55 }
 0xe60   : > { %8278 = vmatpush3.msra.mxu1 %v3490_v4 }
 0xf1a   : > { %v3249_v56 = vpop.f32.mrf.mxu0 }
 0xf1b   : > { %8893 = vmatmul.mubr.msk.f32.vlgmr.msra.gmra.mxu0 %vm1597_vm2, %v3249_v56  ;;  %v3505_v56 = vld [vmem:[%s10992_s2 + $0x98] sm:$0xff] }
 0xf1c   : > { %v8887_v57 = vpop.f32.mrf.mxu0  ;;  %3463 = vmatprep.mubr.f32.mxu0 %v9550_v10  ;;  %8279 = vmatprep.subr.mxu1 %v3505_v56  ;;  %v7866_v56 = vld [vmem:[%s9586_s25 + $0x1] ss:$0 sm:$0xff] }
 0xf1d   : > { %v3489_v57 = vld [vmem:[%s10992_s2 + $0x18] sm:$0xff] }
 0xf1e   : > { %8280 = vmatpush3.msra.mxu1 %v3489_v57 }
 0xfdb   : > { %v3325_v58 = vpop.f32.mrf.mxu0 }
 0xfdc   : > { %v3329_v59 = vadd.f32 %v3325_v58, %v2830_v34  ;;  %v3504_v58 = vld [vmem:[%s10992_s2 + $0x90] sm:$0xff] }
 0xfdd   : > { %v8894_v61 = vpop.f32.mrf.mxu0  ;;  %8281 = vmatprep.subr.mxu1 %v3504_v58  ;;  %v7867_v58 = vld [vmem:[%s9591_s29 + $0x1] ss:$0 sm:$0xff] }
 0xfde   : > { %v3330_v63 = vadd.f32 %v3329_v59, %v9789_v3  ;;  %v3383_v3 = vld [vmem:[%s10989_s26 + $0x78] sm:$0xff]  ;;  %v3488_v59 = vld [vmem:[%s10992_s2 + $0x10] sm:$0xff]  ;;  %v3487_v61 = vld [vmem:[%s10992_s2 + $0x8] sm:$0xff] }
 0xfdf   : > { %3415 = vmatprep.subr.mxu0 %v3383_v3  ;;  %8282 = vmatpush3.msra.mxu1 %v3488_v59 }
 0xfe0   : > { %v10142_v0 = vadd.f32 %v7857_v60, %v3330_v63  ;;  %3416 = vmatpush1.msra.mxu0 %v3382_v9  ;;  %v3503_v60 = vld [vmem:[%s10992_s2 + $0x88] sm:$0xff]  ;;  %v3502_v63 = vld [vmem:[%s10992_s2 + $0x80] sm:$0xff] }
 0xfe1   : > { %3417 = vmatprep.subr.mxu0 %v3381_v11  ;;  %8283 = vmatprep.subr.mxu1 %v3503_v60 }
 0xfe2   : > { %v3341_v1 = vsel %vm1309_vm0, %v10142_v0, 0.0  ;;  %3418 = vmatpush1.msra.mxu0 %v3380_v12  ;;  %8284 = vmatpush3.msra.mxu1 %v3487_v61  ;;  %v7886_v61 = vld [vmem:[%s9601_s8 + $0x138] sm:$0xff] }
 0xfe3   : > { %3342 = vadd.xlane.f32.xlu0 %v3341_v1  ;;  %3419 = vmatprep.subr.mxu0 %v3379_v13  ;;  %v3486_v1 = vld [vmem:[%s10992_s2] sm:$0xff] }
 0xfe4   : > { %3420 = vmatpush1.msra.mxu0 %v3378_v14  ;;  %8285 = vmatprep.subr.mxu1 %v3502_v63  ;;  %v7885_v63 = vld [vmem:[%s9601_s8 + $0x130] sm:$0xff] }
 0xfe5   : > { %3421 = vmatprep.subr.mxu0 %v3377_v15  ;;  %8286 = vmatpush3.msra.mxu1 %v3486_v1  ;;  %v7884_v1 = vld [vmem:[%s9601_s8 + $0x128] sm:$0xff] }
 0xfe6   : > { %3422 = vmatpush1.msra.mxu0 %v3376_v16  ;;  %8933 = vmatprep.subr.mxu1 %v9550_v10 }
 0xfe7   : > { %3423 = vmatprep.subr.mxu0 %v3375_v17 }
 0xfe8   : > { %3424 = vmatpush1.msra.mxu0 %v3374_v18 }
 0xfe9   : > { %3425 = vmatprep.subr.mxu0 %v3373_v19 }
 0xfea   : > { %3426 = vmatpush1.msra.mxu0 %v3372_v20 }
 0xfeb   : > { %3427 = vmatprep.subr.mxu0 %v3371_v21 }
 0xfec   : > { %3428 = vmatpush1.msra.mxu0 %v3370_v22 }
 0xfed   : > { %3429 = vmatprep.subr.mxu0 %v3369_v23 }
 0xfee   : > { %3430 = vmatpush1.msra.mxu0 %v3368_v24 }
 0xfef   : > { %8895 = vmatprep.subr.mxu0 %v9550_v10 }
0x106c   : > { %v3343_v2 = vpop.xlane.xlu0 %3342 }
0x106d   : > { %v3344_v5 = vmul.f32 0.015625, %v3343_v2  ;;  %v3386_v2 = vlaneseq }
0x106f   : > { %v3345_v6 = vsub.f32 %v10142_v0, %v3344_v5  ;;  %v3387_v5 = vshrl.u32 %v3386_v2, 7  ;;  %v7883_v2 = vld [vmem:[%s9601_s8 + $0x120] sm:$0xff] }
0x1071   : > { %v3346_v7 = vmul.f32 %v3345_v6, %v3345_v6 }
0x1073   : > { %v3347_v8 = vsel %vm1309_vm0, %v3346_v7, 0.0  ;;  %v3384_v7 = vld [vmem:[%s10993_s10] sm:$0x3] }
0x1074   : > { %3348 = vadd.xlane.f32.xlu1 %v3347_v8  ;;  %v10206_v8 = vsub.s32 1, %v3387_v5 }
0x1076   : > { %v3393_v9 = vrot.slane %v3384_v7, %v10206_v8 }
0x10fd   : > { %v3349_v25 = vpop.xlane.xlu1 %3348 }
0x10fe   : > { %v3350_v26 = vmul.f32 0.015625, %v3349_v25 }
0x1100   : > { %v3351_v28 = vadd.f32 1e-05, %v3350_v26 }
0x1102   : > { %9414 = vrsqrt.f32 %v3351_v28 }
0x110f   : > { %v9415_v29 = vpop.eup %9414 }
0x1110   : > { %v3353_v31 = vmul.f32 %v9415_v29, %v3345_v6  ;;  %v10203_v6 = vsub.s32 0, %v3387_v5  ;;  %v7882_v5 = vld [vmem:[%s9601_s8 + $0x118] sm:$0xff] }
0x1112   : > { %v3360_v33 = vmul.f32 %v7858_v30, %v3353_v31  ;;  %v3389_v3 = vrot.slane %v3384_v7, %v10203_v6  ;;  %v7863_v31 = vld [vmem:[%s10994_s7] ss:$0 sm:$0xff]  ;;  %v7881_v7 = vld [vmem:[%s9601_s8 + $0x110] sm:$0xff] }
0x1114   : > { %v3367_v34 = vadd.f32 %v7859_v32, %v3360_v33 }
0x1116   : > { %7860 = vmatmul.mubr.msk.f32.vlgmr.msra.gmra.mxu0 %vm1309_vm0, %v3367_v34 }
0x1117   : > { %8911 = vmatprep.mubr.msk.f32.mxu0 %vm9551_vm1, %v9550_v10  ;;  %8896 = vmatpush3.msra.mxu0 %v7875_v40  ;;  %v7929_v40 = vld [vmem:[%s9606_s14 + $0x148] sm:$0xff] }
0x1118   : > { %8897 = vmatprep.subr.mxu0 %v9550_v10 }
0x1119   : > { %8898 = vmatpush3.msra.mxu0 %v7874_v41  ;;  %v7953_v41 = vld [vmem:[%s10987_s3 + $0x1b8] sm:$0xff] }
0x111a   : > { %8899 = vmatprep.subr.mxu0 %v9550_v10 }
0x111b   : > { %8900 = vmatpush3.msra.mxu0 %v7873_v43  ;;  %v7951_v43 = vld [vmem:[%s10987_s3 + $0x1a8] sm:$0xff] }
0x111c   : > { %8901 = vmatprep.subr.mxu0 %v9550_v10 }
0x111d   : > { %8902 = vmatpush3.msra.mxu0 %v7872_v62  ;;  %v7949_v62 = vld [vmem:[%s10987_s3 + $0x198] sm:$0xff] }
0x111e   : > { %8903 = vmatprep.subr.mxu0 %v9550_v10 }
0x111f   : > { %8904 = vmatpush3.msra.mxu0 %v7871_v45  ;;  %v7947_v45 = vld [vmem:[%s10987_s3 + $0x188] sm:$0xff] }
0x1120   : > { %8905 = vmatprep.subr.mxu0 %v9550_v10 }
0x1121   : > { %8906 = vmatpush3.msra.mxu0 %v7870_v47  ;;  %v7975_v47 = vld [vmem:[%s9606_s14 + $0x1b8] sm:$0xff] }
0x1122   : > { %8907 = vmatprep.subr.mxu0 %v9550_v10 }
0x1123   : > { %8908 = vmatpush3.msra.mxu0 %v7869_v49  ;;  %v7973_v49 = vld [vmem:[%s9606_s14 + $0x1a8] sm:$0xff] }
0x1124   : > { %8909 = vmatprep.subr.mxu0 %v9550_v10 }
0x1125   : > { %8910 = vmatpush3.msra.mxu0 %v7868_v51  ;;  %v7971_v51 = vld [vmem:[%s9606_s14 + $0x198] sm:$0xff] }
0x1126   : > { %8914 = vmatprep.subr.mxu0 %v9550_v10 }
0x11d6   : > { %v3465_v11 = vpop.f32.mrf.mxu0 }
0x11d7   : > { %v3466_v12 = vadd.f32 %v3465_v11, %v3389_v3  ;;  %v7880_v3 = vld [vmem:[%s9601_s8 + $0x108] sm:$0xff]  ;;  %v7899_v11 = vld [vmem:[%s9621_s30 + $0x4] ss:$0 sm:$0xff] }
0x11d8   : > { %v3467_v13 = vpop.f32.mrf.mxu0 }
0x11d9   : > { %v7861_v14 = vmul.f32 -1.702, %v3466_v12  ;;  %v3468_v15 = vadd.f32 %v3467_v13, %v3393_v9  ;;  %v7879_v9 = vld [vmem:[%s9601_s8 + $0x100] sm:$0xff] }
0x11db   : > { %v3474_v16 = vmul.f32 1.442695, %v7861_v14  ;;  %v7862_v17 = vmul.f32 -1.702, %v3468_v15 }
0x11dd   : > { %9416 = vpow2.f32 %v3474_v16  ;;  %v3476_v18 = vmul.f32 1.442695, %v7862_v17  ;;  %v7877_v17 = vld [vmem:[%s9611_s19 + $0x4] ss:$0 sm:$0xff] }
0x11df   : > { %9418 = vpow2.f32 %v3476_v18  ;;  %v7888_v18 = vld [vmem:[%s9616_s24 + $0x4] ss:$0 sm:$0xff] }
0x11ea   : > { %v9417_v19 = vpop.eup %9416 }
0x11eb   : > { %v3478_v20 = vadd.f32 1.0, %v9417_v19 }
0x11ec   : > { %v9419_v21 = vpop.eup %9418 }
0x11ed   : > { %v3479_v22 = vadd.f32 1.0, %v9419_v21  ;;  %9420 = vrcp.f32 %v3478_v20 }
0x11ef   : > { %9422 = vrcp.f32 %v3479_v22 }
0x11fa   : > { %v9421_v23 = vpop.eup %9420 }
0x11fb   : > { %v3484_v26 = vmul.f32 %v9421_v23, %v3466_v12 }
0x11fc   : > { %v9423_v24 = vpop.eup %9422 }
0x11fd   : > { %v3485_v25 = vmul.f32 %v9423_v24, %v3468_v15  ;;  %v7913_v24 = vld [vmem:[%s10987_s3 + $0x178] sm:$0xff] }
0x11ff   : > { %3582 = vmatprep.mubr.f32.mxu1 %v3485_v25  ;;  %v7912_v25 = vld [vmem:[%s10987_s3 + $0x170] sm:$0xff] }
0x1200   : > { %3583 = vmatmul.mubr.f32.vlgmr.msra.gmra.mxu1 %v3484_v26  ;;  %v7911_v26 = vld [vmem:[%s10987_s3 + $0x168] sm:$0xff] }
0x1201   : > { %8949 = vmatprep.mubr.msk.f32.mxu1 %vm9551_vm1, %v9550_v10 }
0x12c0   : > { %v8287_v28 = vpop.f32.mrf.mxu1 }
0x12c2   : > { %v8288_v29 = vpop.f32.mrf.mxu1 }
0x12c3   : > { %v8289_v30 = vadd.f32 %v8288_v29, %v8287_v28  ;;  %v7910_v28 = vld [vmem:[%s10987_s3 + $0x160] sm:$0xff]  ;;  %v7909_v29 = vld [vmem:[%s10987_s3 + $0x158] sm:$0xff] }
0x12c5   : > { %v3588_v32 = vadd.f32 %v8289_v30, %v10142_v0  ;;  %v7897_v0 = vld [vmem:[%s9606_s14 + $0x138] sm:$0xff]  ;;  %v7908_v30 = vld [vmem:[%s10987_s3 + $0x150] sm:$0xff] }
0x12c6   : > { %8934 = vmatpush3.msra.mxu1 %v7897_v0  ;;  %v7928_v0 = vld [vmem:[%s9606_s14 + $0x140] sm:$0xff] }
0x12c7   : > { %v10214_v33 = vadd.f32 %v7863_v31, %v3588_v32  ;;  %8935 = vmatprep.subr.mxu1 %v9550_v10  ;;  %v7907_v31 = vld [vmem:[%s10987_s3 + $0x148] sm:$0xff]  ;;  %v7906_v32 = vld [vmem:[%s10987_s3 + $0x140] sm:$0xff] }
0x12c8   : > { %8936 = vmatpush3.msra.mxu1 %v7896_v42  ;;  %v7952_v42 = vld [vmem:[%s10987_s3 + $0x1b0] sm:$0xff] }
0x12c9   : > { %v3601_v34 = vsel %vm1309_vm0, %v10214_v33, 0.0  ;;  %8937 = vmatprep.subr.mxu1 %v9550_v10 }
0x12ca   : > { %3602 = vadd.xlane.f32.xlu0 %v3601_v34  ;;  %8938 = vmatpush3.msra.mxu1 %v7895_v27  ;;  %v7935_v34 = vld [vmem:[%s9606_s14 + $0x178] sm:$0xff]  ;;  %v7950_v27 = vld [vmem:[%s10987_s3 + $0x1a0] sm:$0xff] }
0x12cb   : > { %8939 = vmatprep.subr.mxu1 %v9550_v10 }
0x12cc   : > { %8940 = vmatpush3.msra.mxu1 %v7894_v44  ;;  %v7948_v44 = vld [vmem:[%s10987_s3 + $0x190] sm:$0xff] }
0x12cd   : > { %8941 = vmatprep.subr.mxu1 %v9550_v10 }
0x12ce   : > { %8942 = vmatpush3.msra.mxu1 %v7893_v46  ;;  %v7946_v46 = vld [vmem:[%s10987_s3 + $0x180] sm:$0xff] }
0x12cf   : > { %8943 = vmatprep.subr.mxu1 %v9550_v10 }
0x12d0   : > { %8944 = vmatpush3.msra.mxu1 %v7892_v48  ;;  %v7974_v48 = vld [vmem:[%s9606_s14 + $0x1b0] sm:$0xff] }
0x12d1   : > { %8945 = vmatprep.subr.mxu1 %v9550_v10 }
0x12d2   : > { %8946 = vmatpush3.msra.mxu1 %v7891_v50  ;;  %v7972_v50 = vld [vmem:[%s9606_s14 + $0x1a0] sm:$0xff] }
0x12d3   : > { %8947 = vmatprep.subr.mxu1 %v9550_v10 }
0x12d4   : > { %8948 = vmatpush3.msra.mxu1 %v7890_v52  ;;  %v7970_v52 = vld [vmem:[%s9606_s14 + $0x190] sm:$0xff] }
0x12d5   : > { %8957 = vmatprep.subr.mxu1 %v9550_v10 }
0x1353   : > { %v3603_v35 = vpop.xlane.xlu0 %3602 }
0x1354   : > { %v3604_v36 = vmul.f32 0.015625, %v3603_v35  ;;  %v7934_v35 = vld [vmem:[%s9606_s14 + $0x170] sm:$0xff] }
0x1356   : > { %v3605_v37 = vsub.f32 %v10214_v33, %v3604_v36  ;;  %v7933_v36 = vld [vmem:[%s9606_s14 + $0x168] sm:$0xff] }
0x1358   : > { %v3606_v38 = vmul.f32 %v3605_v37, %v3605_v37 }
0x135a   : > { %v3607_v39 = vsel %vm1309_vm0, %v3606_v38, 0.0  ;;  %v7931_v38 = vld [vmem:[%s9606_s14 + $0x158] sm:$0xff] }
0x135b   : > { %3608 = vadd.xlane.f32.xlu1 %v3607_v39  ;;  %v7930_v39 = vld [vmem:[%s9606_s14 + $0x150] sm:$0xff] }
0x13e4   : > { %v3609_v53 = vpop.xlane.xlu1 %3608 }
0x13e5   : > { %v3610_v54 = vmul.f32 0.015625, %v3609_v53  ;;  %v7969_v53 = vld [vmem:[%s9606_s14 + $0x188] sm:$0xff] }
0x13e7   : > { %v3611_v55 = vadd.f32 1e-05, %v3610_v54  ;;  %v7968_v54 = vld [vmem:[%s9606_s14 + $0x180] sm:$0xff] }
0x13e9   : > { %9424 = vrsqrt.f32 %v3611_v55  ;;  %v8003_v55 = vld [vmem:[%s9601_s8 + $0x1f8] sm:$0xff] }
0x13f6   : > { %v9425_v4 = vpop.eup %9424 }
0x13f7   : > { %v3613_v57 = vmul.f32 %v9425_v4, %v3605_v37  ;;  %v7932_v37 = vld [vmem:[%s9606_s14 + $0x160] sm:$0xff]  ;;  %v8002_v4 = vld [vmem:[%s9601_s8 + $0x1f0] sm:$0xff] }
0x13f9   : > { %v3620_v59 = vmul.f32 %v7866_v56, %v3613_v57  ;;  %v8001_v56 = vld [vmem:[%s9601_s8 + $0x1e8] sm:$0xff]  ;;  %v8000_v57 = vld [vmem:[%s9601_s8 + $0x1e0] sm:$0xff] }
0x13fb   : > { %v10254_v60 = vadd.f32 %v7867_v58, %v3620_v59  ;;  %v7999_v58 = vld [vmem:[%s9601_s8 + $0x1d8] sm:$0xff]  ;;  %v7998_v59 = vld [vmem:[%s9601_s8 + $0x1d0] sm:$0xff] }
0x13fd   : > { %8912 = vmatmul.mubr.msk.f32.vlgmr.msra.gmra.mxu0 %vm1309_vm0, %v10254_v60  ;;  %8950 = vmatmul.mubr.msk.f32.vlgmr.msra.gmra.mxu1 %vm1309_vm0, %v10254_v60 }
0x13fe   : > { %8915 = vmatpush3.msra.mxu0 %v7886_v61  ;;  %8930 = vmatprep.mubr.msk.f32.mxu0 %vm9551_vm1, %v9550_v10  ;;  %v7997_v61 = vld [vmem:[%s9601_s8 + $0x1c8] sm:$0xff] }
0x13ff   : > { %8916 = vmatprep.subr.mxu0 %v9550_v10  ;;  %8959 = vmatprep.mubr.msk.f32.mxu1 %vm9551_vm1, %v9550_v10 }
0x1400   : > { %8917 = vmatpush3.msra.mxu0 %v7885_v63  ;;  %v7996_v63 = vld [vmem:[%s9601_s8 + $0x1c0] sm:$0xff] }
0x1401   : > { %8918 = vmatprep.subr.mxu0 %v9550_v10 }
0x1402   : > { %8919 = vmatpush3.msra.mxu0 %v7884_v1 }
0x1403   : > { %8920 = vmatprep.subr.mxu0 %v9550_v10 }
0x1404   : > { %8921 = vmatpush3.msra.mxu0 %v7883_v2  ;;  %v10394_v2 = vld [vmem:[%s9571_s13] sm:$0xff] }
0x1405   : > { %8922 = vmatprep.subr.mxu0 %v9550_v10 }
0x1406   : > { %8923 = vmatpush3.msra.mxu0 %v7882_v5 }
0x1407   : > { %8924 = vmatprep.subr.mxu0 %v9550_v10 }
0x1408   : > { %8925 = vmatpush3.msra.mxu0 %v7881_v7 }
0x1409   : > { %8926 = vmatprep.subr.mxu0 %v9550_v10 }
0x140a   : > { %8927 = vmatpush3.msra.mxu0 %v7880_v3 }
0x140b   : > { %8928 = vmatprep.subr.mxu0 %v9550_v10 }
0x140c   : > { %8929 = vmatpush3.msra.mxu0 %v7879_v9 }
0x140d   : > { %8931 = vmatmul.mubr.msk.f32.vlgmr.msra.gmra.mxu0 %vm1309_vm0, %v10254_v60  ;;  %8952 = vmatprep.subr.mxu0 %v9550_v10 }
0x140e   : > { %8954 = vmatprep.mubr.msk.f32.mxu0 %vm9551_vm1, %v9550_v10 }
0x14bd   : > { %v3714_v12 = vpop.f32.mrf.mxu0  ;;  %v3888_v13 = vpop.f32.mrf.mxu1 }
0x14be   : > { %v3889_v14 = vadd.f32 %v7899_v11, %v3888_v13  ;;  %v3715_v19 = vadd.f32 %v7877_v17, %v3714_v12 }
0x14bf   : > { %v8913_v15 = vpop.f32.mrf.mxu0  ;;  %v8951_v16 = vpop.f32.mrf.mxu1 }
0x14c0   : > { %8958 = vmatpush3.msra.mxu1 %v3889_v14  ;;  %v3892_v23 = vmul.f32 0.25, %v3715_v19 }
0x14c1   : > { %8981 = vmatprep.subr.mxu1 %v9550_v10 }
0x14cd   : > { %v3801_v20 = vpop.f32.mrf.mxu0 }
0x14ce   : > { %v3802_v21 = vadd.f32 %v7888_v18, %v3801_v20  ;;  %v8005_v18 = vld [vmem:[%s9616_s24 + $0x7] ss:$0 sm:$0xff] }
0x14cf   : > { %v8932_v22 = vpop.f32.mrf.mxu0 }
0x14d0   : > { %8953 = vmatpush3.xpose.msk.msra.mxu0 %vm1597_vm2, %v3802_v21 }
0x14d1   : > { %8962 = vmatprep.subr.mxu0 %v9550_v10 }
0x14d3   : > { %8955 = vmatmul.mubr.msk.f32.vlgmr.msra.gmra.mxu0 %vm1597_vm2, %v3892_v23 }
0x14d4   : > { %8963 = vmatpush3.msra.mxu0 %v7913_v24  ;;  %8978 = vmatprep.mubr.msk.f32.mxu0 %vm9551_vm1, %v9550_v10 }
0x14d5   : > { %8964 = vmatprep.subr.mxu0 %v9550_v10 }
0x14d6   : > { %8965 = vmatpush3.msra.mxu0 %v7912_v25 }
0x14d7   : > { %8966 = vmatprep.subr.mxu0 %v9550_v10 }
0x14d8   : > { %8967 = vmatpush3.msra.mxu0 %v7911_v26 }
0x14d9   : > { %8968 = vmatprep.subr.mxu0 %v9550_v10 }
0x14da   : > { %8969 = vmatpush3.msra.mxu0 %v7910_v28 }
0x14db   : > { %8970 = vmatprep.subr.mxu0 %v9550_v10 }
0x14dc   : > { %8971 = vmatpush3.msra.mxu0 %v7909_v29 }
0x14dd   : > { %8972 = vmatprep.subr.mxu0 %v9550_v10 }
0x14de   : > { %8973 = vmatpush3.msra.mxu0 %v7908_v30 }
0x14df   : > { %8974 = vmatprep.subr.mxu0 %v9550_v10 }
0x14e0   : > { %8975 = vmatpush3.msra.mxu0 %v7907_v31  ;;  %v7924_v31 = vld [vmem:[%s9601_s8 + $0x178] sm:$0xff] }
0x14e1   : > { %8976 = vmatprep.subr.mxu0 %v9550_v10 }
0x14e2   : > { %8977 = vmatpush3.msra.mxu0 %v7906_v32  ;;  %v7923_v32 = vld [vmem:[%s9601_s8 + $0x170] sm:$0xff] }
0x14e3   : > { %8979 = vmatmul.mubr.msk.f32.vlgmr.msra.gmra.mxu0 %vm1309_vm0, %v10254_v60  ;;  %9000 = vmatprep.subr.mxu0 %v9550_v10 }
0x14e4   : > { %9001 = vmatpush3.msra.mxu0 %v7935_v34  ;;  %9016 = vmatprep.mubr.msk.f32.mxu0 %vm9551_vm1, %v9550_v10  ;;  %v7922_v34 = vld [vmem:[%s9601_s8 + $0x168] sm:$0xff] }
0x14e5   : > { %9002 = vmatprep.subr.mxu0 %v9550_v10 }
0x14e6   : > { %9003 = vmatpush3.msra.mxu0 %v7934_v35  ;;  %v7921_v35 = vld [vmem:[%s9601_s8 + $0x160] sm:$0xff] }
0x14e7   : > { %9004 = vmatprep.subr.mxu0 %v9550_v10 }
0x14e8   : > { %9005 = vmatpush3.msra.mxu0 %v7933_v36  ;;  %v7920_v36 = vld [vmem:[%s9601_s8 + $0x158] sm:$0xff] }
0x14e9   : > { %9006 = vmatprep.subr.mxu0 %v9550_v10 }
0x14ea   : > { %9007 = vmatpush3.msra.mxu0 %v7932_v37  ;;  %v7919_v37 = vld [vmem:[%s9601_s8 + $0x150] sm:$0xff] }
0x14eb   : > { %9008 = vmatprep.subr.mxu0 %v9550_v10 }
0x14ec   : > { %9009 = vmatpush3.msra.mxu0 %v7931_v38  ;;  %v7918_v38 = vld [vmem:[%s9601_s8 + $0x148] sm:$0xff] }
0x14ed   : > { %9010 = vmatprep.subr.mxu0 %v9550_v10 }
0x14ee   : > { %9011 = vmatpush3.msra.mxu0 %v7930_v39  ;;  %v7917_v39 = vld [vmem:[%s9601_s8 + $0x140] sm:$0xff] }
0x14ef   : > { %9012 = vmatprep.subr.mxu0 %v9550_v10 }
0x14f0   : > { %9013 = vmatpush3.msra.mxu0 %v7929_v40 }
0x14f1   : > { %9014 = vmatprep.subr.mxu0 %v9550_v10 }
0x14f2   : > { %9015 = vmatpush3.msra.mxu0 %v7928_v0 }
0x14f3   : > { %9017 = vmatmul.mubr.msk.f32.vlgmr.msra.gmra.mxu0 %vm1309_vm0, %v10254_v60  ;;  %9043 = vmatprep.subr.mxu0 %v9550_v10 }
0x14f4   : > { %9044 = vmatpush3.msra.mxu0 %v7953_v41  ;;  %9059 = vmatprep.mubr.msk.f32.mxu0 %vm9551_vm1, %v9550_v10  ;;  %v7915_v41 = vld [vmem:[%s9611_s19 + $0x5] ss:$0 sm:$0xff] }
0x14f5   : > { %9045 = vmatprep.subr.mxu0 %v9550_v10 }
0x14f6   : > { %9046 = vmatpush3.msra.mxu0 %v7952_v42  ;;  %v7926_v42 = vld [vmem:[%s9616_s24 + $0x5] ss:$0 sm:$0xff] }
0x14f7   : > { %9047 = vmatprep.subr.mxu0 %v9550_v10 }
0x14f8   : > { %9048 = vmatpush3.msra.mxu0 %v7951_v43 }
0x14f9   : > { %9049 = vmatprep.subr.mxu0 %v9550_v10 }
0x14fa   : > { %9050 = vmatpush3.msra.mxu0 %v7950_v27 }
0x14fb   : > { %9051 = vmatprep.subr.mxu0 %v9550_v10 }
0x14fc   : > { %9052 = vmatpush3.msra.mxu0 %v7949_v62 }
0x14fd   : > { %9053 = vmatprep.subr.mxu0 %v9550_v10 }
0x14fe   : > { %9054 = vmatpush3.msra.mxu0 %v7948_v44  ;;  %v7937_v44 = vld [vmem:[%s9621_s30 + $0x5] ss:$0 sm:$0xff] }
0x14ff   : > { %9055 = vmatprep.subr.mxu0 %v9550_v10 }
0x1500   : > { %9056 = vmatpush3.msra.mxu0 %v7947_v45 }
0x1501   : > { %9057 = vmatprep.subr.mxu0 %v9550_v10 }
0x1502   : > { %9058 = vmatpush3.msra.mxu0 %v7946_v46 }
0x1503   : > { %9060 = vmatmul.mubr.msk.f32.vlgmr.msra.gmra.mxu0 %vm1309_vm0, %v10254_v60  ;;  %9081 = vmatprep.subr.mxu0 %v9550_v10 }
0x1504   : > { %9082 = vmatpush3.msra.mxu0 %v7975_v47  ;;  %9097 = vmatprep.mubr.msk.f32.mxu0 %vm9551_vm1, %v9550_v10 }
0x1505   : > { %9083 = vmatprep.subr.mxu0 %v9550_v10 }
0x1506   : > { %9084 = vmatpush3.msra.mxu0 %v7974_v48 }
0x1507   : > { %9085 = vmatprep.subr.mxu0 %v9550_v10 }
0x1508   : > { %9086 = vmatpush3.msra.mxu0 %v7973_v49 }
0x1509   : > { %9087 = vmatprep.subr.mxu0 %v9550_v10 }
0x150a   : > { %9088 = vmatpush3.msra.mxu0 %v7972_v50 }
0x150b   : > { %9089 = vmatprep.subr.mxu0 %v9550_v10 }
0x150c   : > { %9090 = vmatpush3.msra.mxu0 %v7971_v51 }
0x150d   : > { %9091 = vmatprep.subr.mxu0 %v9550_v10 }
0x150e   : > { %9092 = vmatpush3.msra.mxu0 %v7970_v52 }
0x150f   : > { %9093 = vmatprep.subr.mxu0 %v9550_v10 }
0x1510   : > { %9094 = vmatpush3.msra.mxu0 %v7969_v53 }
0x1511   : > { %9095 = vmatprep.subr.mxu0 %v9550_v10 }
0x1512   : > { %9096 = vmatpush3.msra.mxu0 %v7968_v54 }
0x1513   : > { %9098 = vmatmul.mubr.msk.f32.vlgmr.msra.gmra.mxu0 %vm1309_vm0, %v10254_v60  ;;  %9136 = vmatprep.subr.mxu0 %v9550_v10 }
0x1514   : > { %9137 = vmatpush3.msra.mxu0 %v8003_v55  ;;  %9152 = vmatprep.mubr.msk.f32.mxu0 %vm9551_vm1, %v9550_v10 }
0x1515   : > { %9138 = vmatprep.subr.mxu0 %v9550_v10 }
0x1516   : > { %9139 = vmatpush3.msra.mxu0 %v8002_v4 }
0x1517   : > { %9140 = vmatprep.subr.mxu0 %v9550_v10 }
0x1518   : > { %9141 = vmatpush3.msra.mxu0 %v8001_v56 }
0x1519   : > { %9142 = vmatprep.subr.mxu0 %v9550_v10 }
0x151a   : > { %9143 = vmatpush3.msra.mxu0 %v8000_v57 }
0x151b   : > { %9144 = vmatprep.subr.mxu0 %v9550_v10 }
0x151c   : > { %9145 = vmatpush3.msra.mxu0 %v7999_v58 }
0x151d   : > { %9146 = vmatprep.subr.mxu0 %v9550_v10 }
0x151e   : > { %9147 = vmatpush3.msra.mxu0 %v7998_v59  ;;  %v7943_v59 = vld [vmem:[%s9626_s6 + $0x58] sm:$0xff] }
0x151f   : > { %9148 = vmatprep.subr.mxu0 %v9550_v10 }
0x1520   : > { %9149 = vmatpush3.msra.mxu0 %v7997_v61  ;;  %v7942_v61 = vld [vmem:[%s9626_s6 + $0x50] sm:$0xff] }
0x1521   : > { %9150 = vmatprep.subr.mxu0 %v9550_v10 }
0x1522   : > { %9151 = vmatpush3.msra.mxu0 %v7996_v63  ;;  %v7905_v63 = vld [vmem:[%s9626_s6 + $0x48] sm:$0xff] }
0x1523   : > { %9153 = vmatmul.mubr.msk.f32.vlgmr.msra.gmra.mxu0 %vm1309_vm0, %v10254_v60  ;;  %9174 = vmatprep.subr.mxu0 %v9550_v10 }
0x1524   : > { %9176 = vmatprep.mubr.msk.f32.mxu0 %vm9551_vm1, %v9550_v10 }
0x1593   : > { %v3965_v1 = vpop.f32.mrf.mxu0 }
0x1594   : > { %v3966_v5 = vadd.f32 %v10394_v2, %v3965_v1 }
0x1595   : > { %v8956_v7 = vpop.f32.mrf.mxu0 }
0x1596   : > { %v3969_v3 = vsel %vm1674_vm3, %v3966_v5, -inf }
0x1597   : > { %3970 = vmax.xlane.f32.xlu0 %v3969_v3  ;;  %v7964_v3 = vld [vmem:[%s9601_s8 + $0x1b8] sm:$0xff] }
0x15a3   : > { %v4139_v9 = vpop.f32.mrf.mxu0 }
0x15a4   : > { %v4140_v43 = vadd.f32 %v7915_v41, %v4139_v9  ;;  %v7963_v9 = vld [vmem:[%s9601_s8 + $0x1b0] sm:$0xff] }
0x15a5   : > { %v8980_v11 = vpop.f32.mrf.mxu0 }
0x15a6   : > { %v4317_v46 = vmul.f32 0.25, %v4140_v43  ;;  %v7962_v11 = vld [vmem:[%s9601_s8 + $0x1a8] sm:$0xff] }
0x15b3   : > { %v10398_v12 = vpop.f32.mrf.mxu0 }
0x15b4   : > { %v4314_v47 = vadd.f32 %v7937_v44, %v10398_v12  ;;  %v7961_v12 = vld [vmem:[%s9601_s8 + $0x1a0] sm:$0xff]  ;;  %v7992_v44 = vld [vmem:[%s10987_s3 + $0x1f8] sm:$0xff] }
0x15b5   : > { %v9018_v13 = vpop.f32.mrf.mxu0 }
0x15b6   : > { %v7960_v13 = vld [vmem:[%s9601_s8 + $0x198] sm:$0xff] }
0x15c3   : > { %v10400_v14 = vpop.f32.mrf.mxu0 }
0x15c5   : > { %v9061_v15 = vpop.f32.mrf.mxu0 }
0x15c6   : > { %v7959_v15 = vld [vmem:[%s9601_s8 + $0x190] sm:$0xff] }
0x15d3   : > { %v10402_v16 = vpop.f32.mrf.mxu0 }
0x15d5   : > { %v9099_v17 = vpop.f32.mrf.mxu0 }
0x15d6   : > { %v7958_v17 = vld [vmem:[%s9601_s8 + $0x188] sm:$0xff] }
0x15e3   : > { %v5296_v19 = vpop.f32.mrf.mxu0 }
0x15e4   : > { %v5297_v20 = vadd.f32 %v8005_v18, %v5296_v19  ;;  %v7957_v18 = vld [vmem:[%s9601_s8 + $0x180] sm:$0xff] }
0x15e5   : > { %v9154_v21 = vpop.f32.mrf.mxu0 }
0x15e6   : > { %9175 = vmatpush3.xpose.msk.msra.mxu0 %vm1597_vm2, %v5297_v20 }
0x15e7   : > { %9179 = vmatprep.subr.mxu0 %v9550_v10 }
0x1620   : > { %v3971_v22 = vpop.xlane.xlu0 %3970 }
0x1621   : > { %v3972_v23 = vsub.f32 %v3966_v5, %v3971_v22  ;;  %v7904_v5 = vld [vmem:[%s9626_s6 + $0x40] sm:$0xff] }
0x1623   : > { %v3973_v24 = vmul.f32 1.442695, %v3972_v23 }
0x1625   : > { %9426 = vpow2.f32 %v3973_v24  ;;  %v7955_v24 = vld [vmem:[%s9611_s19 + $0x6] ss:$0 sm:$0xff] }
0x1632   : > { %v9427_v25 = vpop.eup %9426 }
0x1633   : > { %v3975_v26 = vsel %vm1674_vm3, %v9427_v25, 0.0 }
0x1634   : > { %3976 = vadd.xlane.f32.xlu1 %v3975_v26  ;;  %v4711_v26 = vadd.f32 %v7955_v24, %v10400_v14 }
0x16bd   : > { %v3977_v28 = vpop.xlane.xlu1 %3976 }
0x16be   : > { %9428 = vrcp.f32 %v3977_v28 }
0x16cb   : > { %v9429_v29 = vpop.eup %9428 }
0x16cc   : > { %v3979_v30 = vmul.f32 %v9429_v29, %v9427_v25  ;;  %v7966_v25 = vld [vmem:[%s9616_s24 + $0x6] ss:$0 sm:$0xff] }
0x16ce   : > { %8960 = vmatmul.mubr.msk.f32.vlgmr.msra.gmra.mxu1 %vm1674_vm3, %v3979_v30  ;;  %v7977_v30 = vld [vmem:[%s9621_s30 + $0x6] ss:$0 sm:$0xff] }
0x16cf   : > { %8982 = vmatpush3.msra.mxu1 %v7924_v31  ;;  %8997 = vmatprep.mubr.msk.f32.mxu1 %vm9551_vm1, %v9550_v10 }
0x16d0   : > { %8983 = vmatprep.subr.mxu1 %v9550_v10 }
0x16d1   : > { %8984 = vmatpush3.msra.mxu1 %v7923_v32  ;;  %v4888_v32 = vmul.f32 0.25, %v4711_v26 }
0x16d2   : > { %8985 = vmatprep.subr.mxu1 %v9550_v10 }
0x16d3   : > { %8986 = vmatpush3.msra.mxu1 %v7922_v34  ;;  %v4885_v34 = vadd.f32 %v7977_v30, %v10402_v16 }
0x16d4   : > { %8987 = vmatprep.subr.mxu1 %v9550_v10 }
0x16d5   : > { %8988 = vmatpush3.msra.mxu1 %v7921_v35 }
0x16d6   : > { %8989 = vmatprep.subr.mxu1 %v9550_v10 }
0x16d7   : > { %8990 = vmatpush3.msra.mxu1 %v7920_v36 }
0x16d8   : > { %8991 = vmatprep.subr.mxu1 %v9550_v10 }
0x16d9   : > { %8992 = vmatpush3.msra.mxu1 %v7919_v37 }
0x16da   : > { %8993 = vmatprep.subr.mxu1 %v9550_v10 }
0x16db   : > { %8994 = vmatpush3.msra.mxu1 %v7918_v38 }
0x16dc   : > { %8995 = vmatprep.subr.mxu1 %v9550_v10 }
0x16dd   : > { %8996 = vmatpush3.msra.mxu1 %v7917_v39 }
0x16de   : > { %8998 = vmatmul.mubr.msk.f32.vlgmr.msra.gmra.mxu1 %vm1309_vm0, %v10254_v60  ;;  %9019 = vmatprep.subr.mxu1 %v9550_v10 }
0x16df   : > { %9021 = vmatprep.mubr.msk.f32.mxu1 %vm9551_vm1, %v9550_v10 }
0x178e   : > { %v4049_v40 = vpop.f32.mrf.mxu1 }
0x1790   : > { %v8961_v0 = vpop.f32.mrf.mxu1 }
0x179e   : > { %v4226_v27 = vpop.f32.mrf.mxu1 }
0x179f   : > { %v4227_v62 = vadd.f32 %v7926_v42, %v4226_v27  ;;  %v7983_v27 = vld [vmem:[%s9626_s6 + $0x68] sm:$0xff] }
0x17a0   : > { %v8999_v45 = vpop.f32.mrf.mxu1 }
0x17a1   : > { %9020 = vmatpush3.xpose.msk.msra.mxu1 %vm1597_vm2, %v4227_v62  ;;  %v7982_v62 = vld [vmem:[%s9626_s6 + $0x60] sm:$0xff] }
0x17a2   : > { %9024 = vmatprep.subr.mxu1 %v9550_v10 }
0x17a4   : > { %9022 = vmatmul.mubr.msk.f32.vlgmr.msra.gmra.mxu1 %vm1597_vm2, %v4317_v46  ;;  %v7991_v46 = vld [vmem:[%s10987_s3 + $0x1f0] sm:$0xff] }
0x17a5   : > { %9025 = vmatpush3.msra.mxu1 %v4314_v47  ;;  %9026 = vmatprep.mubr.msk.f32.mxu1 %vm9551_vm1, %v9550_v10 }
0x17a6   : > { %9029 = vmatprep.subr.mxu1 %v9550_v10 }
0x1864   : > { %v4390_v48 = vpop.f32.mrf.mxu1 }
0x1865   : > { %v4391_v49 = vadd.f32 %v10394_v2, %v4390_v48  ;;  %v7990_v48 = vld [vmem:[%s10987_s3 + $0x1e8] sm:$0xff] }
0x1866   : > { %v9023_v50 = vpop.f32.mrf.mxu1 }
0x1867   : > { %v4394_v51 = vsel %vm1674_vm3, %v4391_v49, -inf  ;;  %v7988_v50 = vld [vmem:[%s10987_s3 + $0x1d8] sm:$0xff] }
0x1868   : > { %4395 = vmax.xlane.f32.xlu0 %v4394_v51  ;;  %v7987_v51 = vld [vmem:[%s10987_s3 + $0x1d0] sm:$0xff] }
0x18f1   : > { %v4396_v52 = vpop.xlane.xlu0 %4395 }
0x18f2   : > { %v4397_v53 = vsub.f32 %v4391_v49, %v4396_v52  ;;  %v7989_v49 = vld [vmem:[%s10987_s3 + $0x1e0] sm:$0xff]  ;;  %v7986_v52 = vld [vmem:[%s10987_s3 + $0x1c8] sm:$0xff] }
0x18f4   : > { %v4398_v54 = vmul.f32 1.442695, %v4397_v53  ;;  %v7985_v53 = vld [vmem:[%s10987_s3 + $0x1c0] sm:$0xff]  ;;  %s11008_s3 = sld [smem:[#allocation26_spill]] }
0x18f6   : > { %9430 = vpow2.f32 %v4398_v54  ;;  %v8014_v54 = vld [vmem:[%s9606_s14 + $0x1f8] sm:$0xff] }
0x1903   : > { %v9431_v55 = vpop.eup %9430 }
0x1904   : > { %v4400_v4 = vsel %vm1674_vm3, %v9431_v55, 0.0 }
0x1905   : > { %4401 = vadd.xlane.f32.xlu1 %v4400_v4  ;;  %v8012_v4 = vld [vmem:[%s9606_s14 + $0x1e8] sm:$0xff] }
0x198e   : > { %v4402_v56 = vpop.xlane.xlu1 %4401 }
0x198f   : > { %9432 = vrcp.f32 %v4402_v56  ;;  %v8011_v56 = vld [vmem:[%s9606_s14 + $0x1e0] sm:$0xff] }
0x199c   : > { %v9433_v57 = vpop.eup %9432 }
0x199d   : > { %v4404_v58 = vmul.f32 %v9433_v57, %v9431_v55  ;;  %v8013_v55 = vld [vmem:[%s9606_s14 + $0x1f0] sm:$0xff]  ;;  %v8010_v57 = vld [vmem:[%s9606_s14 + $0x1d8] sm:$0xff] }
0x199f   : > { %9027 = vmatmul.mubr.msk.f32.vlgmr.msra.gmra.mxu1 %vm1674_vm3, %v4404_v58  ;;  %v8009_v58 = vld [vmem:[%s9606_s14 + $0x1d0] sm:$0xff] }
0x19a0   : > { %9030 = vmatpush3.msra.mxu1 %v7943_v59  ;;  %9033 = vmatprep.mubr.msk.f32.mxu1 %vm9551_vm1, %v9550_v10  ;;  %v8008_v59 = vld [vmem:[%s9606_s14 + $0x1c8] sm:$0xff] }
0x19a1   : > { %9031 = vmatprep.subr.mxu1 %v9550_v10 }
0x19a2   : > { %9032 = vmatpush3.msra.mxu1 %v7942_v61  ;;  %v8007_v61 = vld [vmem:[%s9606_s14 + $0x1c0] sm:$0xff] }
0x19a3   : > { %9036 = vmatprep.subr.mxu1 %v9550_v10 }
0x1a5f   : > { %v4474_v1 = vpop.f32.mrf.mxu1 }
0x1a60   : > { %9034 = vmatmul.mubr.msk.f32.vlgmr.msra.gmra.mxu1 %vm1597_vm2, %v4474_v1 }
0x1a61   : > { %9037 = vmatpush3.msra.mxu1 %v7905_v63  ;;  %v9028_v7 = vpop.f32.mrf.mxu1  ;;  %9040 = vmatprep.mubr.msk.f32.mxu1 %vm9551_vm1, %v9550_v10 }
0x1a62   : > { %9038 = vmatprep.subr.mxu1 %v9550_v10  ;;  %v7994_v7 = vld [vmem:[%s9611_s19 + $0x7] ss:$0 sm:$0xff] }
0x1a63   : > { %9039 = vmatpush3.msra.mxu1 %v7904_v5 }
0x1a64   : > { %9062 = vmatprep.subr.mxu1 %v9550_v10  ;;  %9041 = vmatmul.mubr.msk.f32.vlgmr.msra.gmra.mxu1 %vm1597_vm2, %v4049_v40 }
0x1a65   : > { %9063 = vmatpush3.msra.mxu1 %v7964_v3  ;;  %9078 = vmatprep.mubr.msk.f32.mxu1 %vm9551_vm1, %v9550_v10 }
0x1a66   : > { %9064 = vmatprep.subr.mxu1 %v9550_v10 }
0x1a67   : > { %9065 = vmatpush3.msra.mxu1 %v7963_v9 }
0x1a68   : > { %9066 = vmatprep.subr.mxu1 %v9550_v10 }
0x1a69   : > { %9067 = vmatpush3.msra.mxu1 %v7962_v11 }
0x1a6a   : > { %9068 = vmatprep.subr.mxu1 %v9550_v10 }
0x1a6b   : > { %9069 = vmatpush3.msra.mxu1 %v7961_v12 }
0x1a6c   : > { %9070 = vmatprep.subr.mxu1 %v9550_v10 }
0x1a6d   : > { %9071 = vmatpush3.msra.mxu1 %v7960_v13  ;;  %v8016_v13 = vld [vmem:[%s9621_s30 + $0x7] ss:$0 sm:$0xff] }
0x1a6e   : > { %9072 = vmatprep.subr.mxu1 %v9550_v10 }
0x1a6f   : > { %9073 = vmatpush3.msra.mxu1 %v7959_v15 }
0x1a70   : > { %9074 = vmatprep.subr.mxu1 %v9550_v10 }
0x1a71   : > { %9075 = vmatpush3.msra.mxu1 %v7958_v17 }
0x1a72   : > { %9076 = vmatprep.subr.mxu1 %v9550_v10 }
0x1a73   : > { %9077 = vmatpush3.msra.mxu1 %v7957_v18 }
0x1a74   : > { %9079 = vmatmul.mubr.msk.f32.vlgmr.msra.gmra.mxu1 %vm1309_vm0, %v10254_v60  ;;  %9100 = vmatprep.subr.mxu1 %v9550_v10 }
0x1a75   : > { %9102 = vmatprep.mubr.msk.f32.mxu1 %vm9551_vm1, %v9550_v10 }
0x1b20   : > { %v4550_v19 = vpop.f32.mrf.mxu1 }
0x1b22   : > { %v9035_v20 = vpop.f32.mrf.mxu1 }
0x1b24   : > { %v4623_v21 = vpop.f32.mrf.mxu1 }
0x1b25   : > { %v10481_v22 = vadd.f32 %v4623_v21, %v4550_v19 }
0x1b26   : > { %v9042_v23 = vpop.f32.mrf.mxu1 }
0x1b34   : > { %v4797_v28 = vpop.f32.mrf.mxu1 }
0x1b35   : > { %v4798_v29 = vadd.f32 %v7966_v25, %v4797_v28 }
0x1b36   : > { %v9080_v31 = vpop.f32.mrf.mxu1 }
0x1b37   : > { %9101 = vmatpush3.xpose.msk.msra.mxu1 %vm1597_vm2, %v4798_v29  ;;  %v8022_v31 = vld [vmem:[%s9626_s6 + $0x78] sm:$0xff] }
0x1b38   : > { %9105 = vmatprep.subr.mxu1 %v9550_v10 }
0x1b3a   : > { %9103 = vmatmul.mubr.msk.f32.vlgmr.msra.gmra.mxu1 %vm1597_vm2, %v4888_v32 }
0x1b3b   : > { %9106 = vmatpush3.msra.mxu1 %v4885_v34  ;;  %9107 = vmatprep.mubr.msk.f32.mxu1 %vm9551_vm1, %v9550_v10 }
0x1b3c   : > { %9110 = vmatprep.subr.mxu1 %v9550_v10 }
0x1bfa   : > { %v4961_v14 = vpop.f32.mrf.mxu1 }
0x1bfb   : > { %v4962_v35 = vadd.f32 %v10394_v2, %v4961_v14 }
0x1bfc   : > { %v9104_v36 = vpop.f32.mrf.mxu1 }
0x1bfd   : > { %v4965_v37 = vsel %vm1674_vm3, %v4962_v35, -inf  ;;  %v8025_v36 = vld [vmem:[%s9631_s12 + $0x1] ss:$0 sm:$0xff] }
0x1bfe   : > { %4966 = vmax.xlane.f32.xlu0 %v4965_v37 }
0x1c87   : > { %v4967_v38 = vpop.xlane.xlu0 %4966 }
0x1c88   : > { %v4968_v39 = vsub.f32 %v4962_v35, %v4967_v38 }
0x1c8a   : > { %v4969_v16 = vmul.f32 1.442695, %v4968_v39 }
0x1c8c   : > { %9434 = vpow2.f32 %v4969_v16 }
0x1c99   : > { %v9435_v40 = vpop.eup %9434 }
0x1c9a   : > { %v4971_v0 = vsel %vm1674_vm3, %v9435_v40, 0.0 }
0x1c9b   : > { %4972 = vadd.xlane.f32.xlu1 %v4971_v0 }
0x1d24   : > { %v4973_v41 = vpop.xlane.xlu1 %4972 }
0x1d25   : > { %9436 = vrcp.f32 %v4973_v41 }
0x1d32   : > { %v9437_v42 = vpop.eup %9436 }
0x1d33   : > { %v4975_v43 = vmul.f32 %v9437_v42, %v9435_v40 }
0x1d35   : > { %9108 = vmatmul.mubr.msk.f32.vlgmr.msra.gmra.mxu1 %vm1674_vm3, %v4975_v43 }
0x1d36   : > { %9111 = vmatpush3.msra.mxu1 %v7983_v27  ;;  %9114 = vmatprep.mubr.msk.f32.mxu1 %vm9551_vm1, %v9550_v10  ;;  %v8044_v27 = vld [vmem:[%s10989_s26 + $0xf0] sm:$0xff] }
0x1d37   : > { %9112 = vmatprep.subr.mxu1 %v9550_v10 }
0x1d38   : > { %9113 = vmatpush3.msra.mxu1 %v7982_v62  ;;  %v8043_v62 = vld [vmem:[%s10989_s26 + $0xe8] sm:$0xff] }
0x1d39   : > { %9117 = vmatprep.subr.mxu1 %v9550_v10 }
0x1df5   : > { %v5045_v45 = vpop.f32.mrf.mxu1 }
0x1df6   : > { %9115 = vmatmul.mubr.msk.f32.vlgmr.msra.gmra.mxu1 %vm1597_vm2, %v5045_v45  ;;  %v8041_v45 = vld [vmem:[%s10989_s26 + $0xd8] sm:$0xff] }
0x1df7   : > { %9118 = vmatpush3.msra.mxu1 %v7992_v44  ;;  %v9109_v47 = vpop.f32.mrf.mxu1  ;;  %9133 = vmatprep.mubr.msk.f32.mxu1 %vm9551_vm1, %v9550_v10  ;;  %v8042_v44 = vld [vmem:[%s10989_s26 + $0xe0] sm:$0xff] }
0x1df8   : > { %9119 = vmatprep.subr.mxu1 %v9550_v10  ;;  %v8039_v47 = vld [vmem:[%s10989_s26 + $0xc8] sm:$0xff] }
0x1df9   : > { %9120 = vmatpush3.msra.mxu1 %v7991_v46  ;;  %v8040_v46 = vld [vmem:[%s10989_s26 + $0xd0] sm:$0xff] }
0x1dfa   : > { %9121 = vmatprep.subr.mxu1 %v9550_v10 }
0x1dfb   : > { %9122 = vmatpush3.msra.mxu1 %v7990_v48  ;;  %v8038_v48 = vld [vmem:[%s10989_s26 + $0xc0] sm:$0xff] }
0x1dfc   : > { %9123 = vmatprep.subr.mxu1 %v9550_v10 }
0x1dfd   : > { %9124 = vmatpush3.msra.mxu1 %v7989_v49  ;;  %v8037_v49 = vld [vmem:[%s10989_s26 + $0xb8] sm:$0xff] }
0x1dfe   : > { %9125 = vmatprep.subr.mxu1 %v9550_v10 }
0x1dff   : > { %9126 = vmatpush3.msra.mxu1 %v7988_v50  ;;  %v8036_v50 = vld [vmem:[%s10989_s26 + $0xb0] sm:$0xff] }
0x1e00   : > { %9127 = vmatprep.subr.mxu1 %v9550_v10 }
0x1e01   : > { %9128 = vmatpush3.msra.mxu1 %v7987_v51  ;;  %v8035_v51 = vld [vmem:[%s10989_s26 + $0xa8] sm:$0xff] }
0x1e02   : > { %9129 = vmatprep.subr.mxu1 %v9550_v10 }
0x1e03   : > { %9130 = vmatpush3.msra.mxu1 %v7986_v52  ;;  %v8034_v52 = vld [vmem:[%s10989_s26 + $0xa0] sm:$0xff] }
0x1e04   : > { %9131 = vmatprep.subr.mxu1 %v9550_v10 }
0x1e05   : > { %9132 = vmatpush3.msra.mxu1 %v7985_v53  ;;  %v8033_v53 = vld [vmem:[%s10989_s26 + $0x98] sm:$0xff] }
0x1e06   : > { %9134 = vmatmul.mubr.msk.f32.vlgmr.msra.gmra.mxu1 %vm1309_vm0, %v10254_v60  ;;  %9155 = vmatprep.subr.mxu1 %v9550_v10 }
0x1e07   : > { %9156 = vmatpush3.msra.mxu1 %v8014_v54  ;;  %9171 = vmatprep.mubr.msk.f32.mxu1 %vm9551_vm1, %v9550_v10  ;;  %v8032_v54 = vld [vmem:[%s10989_s26 + $0x90] sm:$0xff] }
0x1e08   : > { %9157 = vmatprep.subr.mxu1 %v9550_v10 }
0x1e09   : > { %9158 = vmatpush3.msra.mxu1 %v8013_v55  ;;  %v8031_v55 = vld [vmem:[%s10989_s26 + $0x88] sm:$0xff] }
0x1e0a   : > { %9159 = vmatprep.subr.mxu1 %v9550_v10 }
0x1e0b   : > { %9160 = vmatpush3.msra.mxu1 %v8012_v4  ;;  %v8030_v4 = vld [vmem:[%s10989_s26 + $0x80] sm:$0xff] }
0x1e0c   : > { %9161 = vmatprep.subr.mxu1 %v9550_v10 }
0x1e0d   : > { %9162 = vmatpush3.msra.mxu1 %v8011_v56 }
0x1e0e   : > { %9163 = vmatprep.subr.mxu1 %v9550_v10 }
0x1e0f   : > { %9164 = vmatpush3.msra.mxu1 %v8010_v57 }
0x1e10   : > { %9165 = vmatprep.subr.mxu1 %v9550_v10 }
0x1e11   : > { %9166 = vmatpush3.msra.mxu1 %v8009_v58 }
0x1e12   : > { %9167 = vmatprep.subr.mxu1 %v9550_v10 }
0x1e13   : > { %9168 = vmatpush3.msra.mxu1 %v8008_v59 }
0x1e14   : > { %9169 = vmatprep.subr.mxu1 %v9550_v10 }
0x1e15   : > { %9170 = vmatpush3.msra.mxu1 %v8007_v61  ;;  %v8028_v61 = vld [vmem:[%s10990_s1 + $0x1] ss:$0 sm:$0xff]  ;;  %s11001_s1 = sld [smem:[#allocation16_spill]] }
0x1e16   : > { %9172 = vmatmul.mubr.msk.f32.vlgmr.msra.gmra.mxu1 %vm1309_vm0, %v10254_v60 }
0x1eb6   : > { %v5121_v63 = vpop.f32.mrf.mxu1 }
0x1eb7   : > { %v5125_v1 = vadd.f32 %v5121_v63, %v10481_v22 }
0x1eb8   : > { %v9116_v5 = vpop.f32.mrf.mxu1 }
0x1ec6   : > { %v5209_v3 = vpop.f32.mrf.mxu1 }
0x1ec7   : > { %v5210_v9 = vadd.f32 %v7994_v7, %v5209_v3  ;;  %v8081_v3 = vld [vmem:[%s10992_s2 + $0x1f8] sm:$0xff] }
0x1ec8   : > { %v9135_v11 = vpop.f32.mrf.mxu1  ;;  %8426 = vmatprep.subr.mxu1 %v8081_v3 }
0x1ec9   : > { %v5387_v12 = vmul.f32 0.25, %v5210_v9  ;;  %v8065_v9 = vld [vmem:[%s10992_s2 + $0x178] sm:$0xff]  ;;  %v8080_v11 = vld [vmem:[%s10992_s2 + $0x1f0] sm:$0xff] }
0x1eca   : > { %8427 = vmatpush3.msra.mxu1 %v8065_v9 }
0x1ecb   : > { %9177 = vmatmul.mubr.msk.f32.vlgmr.msra.gmra.mxu0 %vm1597_vm2, %v5387_v12  ;;  %8428 = vmatprep.subr.mxu1 %v8080_v11  ;;  %v8064_v12 = vld [vmem:[%s10992_s2 + $0x170] sm:$0xff]  ;;  %v8083_v11 = vld [vmem:[%s10994_s7 + $0x1] ss:$0 sm:$0xff] }
0x1ecc   : > { %9181 = vmatprep.mubr.msk.f32.mxu0 %vm9551_vm1, %v9550_v10  ;;  %8429 = vmatpush3.msra.mxu1 %v8064_v12 }
0x1ed6   : > { %v5383_v15 = vpop.f32.mrf.mxu1 }
0x1ed7   : > { %v5384_v17 = vadd.f32 %v8016_v13, %v5383_v15  ;;  %v8079_v13 = vld [vmem:[%s10992_s2 + $0x1e8] sm:$0xff] }
0x1ed8   : > { %v9173_v18 = vpop.f32.mrf.mxu1  ;;  %8430 = vmatprep.subr.mxu1 %v8079_v13  ;;  %v8063_v15 = vld [vmem:[%s10992_s2 + $0x168] sm:$0xff] }
0x1ed9   : > { %9180 = vmatpush3.msra.mxu0 %v5384_v17  ;;  %8431 = vmatpush3.msra.mxu1 %v8063_v15  ;;  %v8078_v17 = vld [vmem:[%s10992_s2 + $0x1e0] sm:$0xff]  ;;  %v6366_v15 = vld [vmem:[%s10996_s16 + $0x38] sm:$0xff] }
0x1eda   : > { %9184 = vmatprep.subr.mxu0 %v9550_v10  ;;  %8432 = vmatprep.subr.mxu1 %v8078_v17  ;;  %v8062_v18 = vld [vmem:[%s10992_s2 + $0x160] sm:$0xff]  ;;  %v6365_v17 = vld [vmem:[%s10996_s16 + $0x30] sm:$0xff] }
0x1edb   : > { %8433 = vmatpush3.msra.mxu1 %v8062_v18 }
0x1f8b   : > { %v5460_v60 = vpop.f32.mrf.mxu0 }
0x1f8c   : > { %v5461_v19 = vadd.f32 %v10394_v2, %v5460_v60  ;;  %v8021_v2 = vld [vmem:[%s9626_s6 + $0x70] sm:$0xff]  ;;  %v8077_v60 = vld [vmem:[%s10992_s2 + $0x1d8] sm:$0xff] }
0x1f8d   : > { %v9178_v20 = vpop.f32.mrf.mxu0  ;;  %8434 = vmatprep.subr.mxu1 %v8077_v60  ;;  %v6044_v60 = vld [vmem:[%s10997_s15 + $0x38] sm:$0xff] }
0x1f8e   : > { %v5464_v21 = vsel %vm1674_vm3, %v5461_v19, -inf  ;;  %v8076_v20 = vld [vmem:[%s10992_s2 + $0x1d0] sm:$0xff] }
0x1f8f   : > { %5465 = vmax.xlane.f32.xlu0 %v5464_v21  ;;  %v8060_v21 = vld [vmem:[%s10992_s2 + $0x150] sm:$0xff] }
0x2018   : > { %v5466_v22 = vpop.xlane.xlu0 %5465 }
0x2019   : > { %v5467_v23 = vsub.f32 %v5461_v19, %v5466_v22  ;;  %v8061_v19 = vld [vmem:[%s10992_s2 + $0x158] sm:$0xff]  ;;  %v8075_v22 = vld [vmem:[%s10992_s2 + $0x1c8] sm:$0xff] }
0x201a   : > { %8435 = vmatpush3.msra.mxu1 %v8061_v19  ;;  %v6364_v19 = vld [vmem:[%s10996_s16 + $0x28] sm:$0xff] }
0x201b   : > { %v5468_v24 = vmul.f32 1.442695, %v5467_v23  ;;  %8436 = vmatprep.subr.mxu1 %v8076_v20  ;;  %v8059_v23 = vld [vmem:[%s10992_s2 + $0x148] sm:$0xff]  ;;  %v6043_v20 = vld [vmem:[%s10997_s15 + $0x30] sm:$0xff] }
0x201c   : > { %8437 = vmatpush3.msra.mxu1 %v8060_v21  ;;  %v6363_v21 = vld [vmem:[%s10996_s16 + $0x20] sm:$0xff] }
0x201d   : > { %9438 = vpow2.f32 %v5468_v24  ;;  %8438 = vmatprep.subr.mxu1 %v8075_v22  ;;  %v8074_v24 = vld [vmem:[%s10992_s2 + $0x1c0] sm:$0xff]  ;;  %v6042_v22 = vld [vmem:[%s10997_s15 + $0x28] sm:$0xff] }
0x201e   : > { %8439 = vmatpush3.msra.mxu1 %v8059_v23  ;;  %v6362_v23 = vld [vmem:[%s10996_s16 + $0x18] sm:$0xff] }
0x201f   : > { %8440 = vmatprep.subr.mxu1 %v8074_v24  ;;  %v6041_v24 = vld [vmem:[%s10997_s15 + $0x20] sm:$0xff] }
0x202a   : > { %v9439_v25 = vpop.eup %9438 }
0x202b   : > { %v5470_v26 = vsel %vm1674_vm3, %v9439_v25, 0.0 }
0x202c   : > { %5471 = vadd.xlane.f32.xlu1 %v5470_v26  ;;  %v8073_v26 = vld [vmem:[%s10992_s2 + $0x1b8] sm:$0xff] }
0x20b5   : > { %v5472_v28 = vpop.xlane.xlu1 %5471 }
0x20b6   : > { %9440 = vrcp.f32 %v5472_v28  ;;  %v8057_v28 = vld [vmem:[%s10992_s2 + $0x138] sm:$0xff] }
0x20c3   : > { %v9441_v29 = vpop.eup %9440 }
0x20c4   : > { %v5474_v30 = vmul.f32 %v9441_v29, %v9439_v25  ;;  %v8058_v25 = vld [vmem:[%s10992_s2 + $0x140] sm:$0xff]  ;;  %v8072_v29 = vld [vmem:[%s10992_s2 + $0x1b0] sm:$0xff] }
0x20c5   : > { %8441 = vmatpush3.msra.mxu1 %v8058_v25  ;;  %v6361_v25 = vld [vmem:[%s10996_s16 + $0x10] sm:$0xff] }
0x20c6   : > { %9182 = vmatmul.mubr.msk.f32.vlgmr.msra.gmra.mxu0 %vm1674_vm3, %v5474_v30  ;;  %8442 = vmatprep.subr.mxu1 %v8073_v26  ;;  %v8056_v30 = vld [vmem:[%s10992_s2 + $0x130] sm:$0xff]  ;;  %v6040_v26 = vld [vmem:[%s10997_s15 + $0x18] sm:$0xff] }
0x20c7   : > { %9185 = vmatpush3.msra.mxu0 %v8022_v31  ;;  %9188 = vmatprep.mubr.msk.f32.mxu0 %vm9551_vm1, %v9550_v10  ;;  %v8071_v31 = vld [vmem:[%s10992_s2 + $0x1a8] sm:$0xff] }
0x20c8   : > { %9186 = vmatprep.subr.mxu0 %v9550_v10  ;;  %8443 = vmatpush3.msra.mxu1 %v8057_v28  ;;  %v6360_v28 = vld [vmem:[%s10996_s16 + $0x8] sm:$0xff] }
0x20c9   : > { %9187 = vmatpush3.msra.mxu0 %v8021_v2  ;;  %8444 = vmatprep.subr.mxu1 %v8072_v29  ;;  %v8055_v2 = vld [vmem:[%s10992_s2 + $0x128] sm:$0xff]  ;;  %v6039_v29 = vld [vmem:[%s10997_s15 + $0x10] sm:$0xff] }
0x20ca   : > { %8445 = vmatpush3.msra.mxu1 %v8056_v30  ;;  %v6359_v30 = vld [vmem:[%s10996_s16] sm:$0xff] }
0x20cb   : > { %8446 = vmatprep.subr.mxu1 %v8071_v31  ;;  %v6038_v31 = vld [vmem:[%s10997_s15 + $0x8] sm:$0xff] }
0x20cc   : > { %8447 = vmatpush3.msra.mxu1 %v8055_v2  ;;  %v6037_v2 = vld [vmem:[%s10997_s15] sm:$0xff] }
0x2186   : > { %v5544_v32 = vpop.f32.mrf.mxu0 }
0x2187   : > { %9189 = vmatmul.mubr.msk.f32.vlgmr.msra.gmra.mxu0 %vm1597_vm2, %v5544_v32  ;;  %v8070_v32 = vld [vmem:[%s10992_s2 + $0x1a0] sm:$0xff] }
0x2188   : > { %v9183_v34 = vpop.f32.mrf.mxu0  ;;  %5763 = vmatprep.mubr.f32.mxu0 %v9550_v10  ;;  %8448 = vmatprep.subr.mxu1 %v8070_v32 }
0x2189   : > { %v8054_v34 = vld [vmem:[%s10992_s2 + $0x120] sm:$0xff] }
0x218a   : > { %8449 = vmatpush3.msra.mxu1 %v8054_v34 }
0x2247   : > { %v5620_v14 = vpop.f32.mrf.mxu0 }
0x2248   : > { %v5624_v35 = vadd.f32 %v5620_v14, %v5125_v1  ;;  %v8029_v1 = vld [vmem:[%s10991_s28 + $0x1] ss:$0 sm:$0xff]  ;;  %v8069_v14 = vld [vmem:[%s10992_s2 + $0x198] sm:$0xff] }
0x2249   : > { %v9190_v37 = vpop.f32.mrf.mxu0  ;;  %8450 = vmatprep.subr.mxu1 %v8069_v14 }
0x224a   : > { %v5625_v38 = vadd.f32 %v5624_v35, %v10214_v33  ;;  %v8045_v33 = vld [vmem:[%s10989_s26 + $0xf8] sm:$0xff]  ;;  %v8052_v37 = vld [vmem:[%s10992_s2 + $0x110] sm:$0xff] }
0x224b   : > { %5715 = vmatprep.subr.mxu0 %v8045_v33  ;;  %v8053_v35 = vld [vmem:[%s10992_s2 + $0x118] sm:$0xff] }
0x224c   : > { %v10564_v39 = vadd.f32 %v8025_v36, %v5625_v38  ;;  %5716 = vmatpush1.msra.mxu0 %v8044_v27  ;;  %8451 = vmatpush3.msra.mxu1 %v8053_v35  ;;  %v8068_v36 = vld [vmem:[%s10992_s2 + $0x190] sm:$0xff]  ;;  %v8067_v38 = vld [vmem:[%s10992_s2 + $0x188] sm:$0xff] }
0x224d   : > { %5717 = vmatprep.subr.mxu0 %v8043_v62  ;;  %8452 = vmatprep.subr.mxu1 %v8068_v36 }
0x224e   : > { %v5639_v16 = vsel %vm1309_vm0, %v10564_v39, 0.0  ;;  %5718 = vmatpush1.msra.mxu0 %v8042_v44  ;;  %8453 = vmatpush3.msra.mxu1 %v8052_v37 }
0x224f   : > { %5640 = vadd.xlane.f32.xlu0 %v5639_v16  ;;  %5719 = vmatprep.subr.mxu0 %v8041_v45  ;;  %v8051_v16 = vld [vmem:[%s10992_s2 + $0x108] sm:$0xff] }
0x2250   : > { %5720 = vmatpush1.msra.mxu0 %v8040_v46  ;;  %8454 = vmatprep.subr.mxu1 %v8067_v38 }
0x2251   : > { %5721 = vmatprep.subr.mxu0 %v8039_v47  ;;  %8455 = vmatpush3.msra.mxu1 %v8051_v16 }
0x2252   : > { %5722 = vmatpush1.msra.mxu0 %v8038_v48 }
0x2253   : > { %5723 = vmatprep.subr.mxu0 %v8037_v49 }
0x2254   : > { %5724 = vmatpush1.msra.mxu0 %v8036_v50 }
0x2255   : > { %5725 = vmatprep.subr.mxu0 %v8035_v51 }
0x2256   : > { %5726 = vmatpush1.msra.mxu0 %v8034_v52 }
0x2257   : > { %5727 = vmatprep.subr.mxu0 %v8033_v53 }
0x2258   : > { %5728 = vmatpush1.msra.mxu0 %v8032_v54 }
0x2259   : > { %5729 = vmatprep.subr.mxu0 %v8031_v55 }
0x225a   : > { %5730 = vmatpush1.msra.mxu0 %v8030_v4 }
0x225b   : > { %9191 = vmatprep.subr.mxu0 %v9550_v10 }
0x22d8   : > { %v5641_v40 = vpop.xlane.xlu0 %5640 }
0x22d9   : > { %v5642_v0 = vmul.f32 0.015625, %v5641_v40  ;;  %v8066_v40 = vld [vmem:[%s10992_s2 + $0x180] sm:$0xff] }
0x22da   : > { %8456 = vmatprep.subr.mxu1 %v8066_v40 }
0x22db   : > { %v5643_v41 = vsub.f32 %v10564_v39, %v5642_v0  ;;  %v8050_v0 = vld [vmem:[%s10992_s2 + $0x100] sm:$0xff]  ;;  %s11007_s2 = sld [smem:[#allocation23_spill]] }
0x22dc   : > { %8457 = vmatpush3.msra.mxu1 %v8050_v0 }
0x22dd   : > { %v5644_v42 = vmul.f32 %v5643_v41, %v5643_v41  ;;  %9215 = vmatprep.subr.mxu1 %v9550_v10 }
0x22df   : > { %v5645_v43 = vsel %vm1309_vm0, %v5644_v42, 0.0 }
0x22e0   : > { %5646 = vadd.xlane.f32.xlu1 %v5645_v43 }
0x2369   : > { %v5647_v56 = vpop.xlane.xlu1 %5646 }
0x236a   : > { %v5648_v57 = vmul.f32 0.015625, %v5647_v56  ;;  %v6122_v56 = vld [vmem:[%s10995_s11 + $0x38] sm:$0xff] }
0x236c   : > { %v5649_v58 = vadd.f32 1e-05, %v5648_v57  ;;  %v6121_v57 = vld [vmem:[%s10995_s11 + $0x30] sm:$0xff] }
0x236e   : > { %9442 = vrsqrt.f32 %v5649_v58  ;;  %v6120_v58 = vld [vmem:[%s10995_s11 + $0x28] sm:$0xff] }
0x237b   : > { %v9443_v59 = vpop.eup %9442 }
0x237c   : > { %v5651_v63 = vmul.f32 %v9443_v59, %v5643_v41  ;;  %v8046_v41 = vld [vmem:[%s10993_s10 + $0x2] sm:$0x3] }
0x237d   : > { %v5689_v42 = vrot.slane %v8046_v41, %v10203_v6  ;;  %v5693_v43 = vrot.slane %v8046_v41, %v10206_v8  ;;  %v6119_v59 = vld [vmem:[%s10995_s11 + $0x20] sm:$0xff] }
0x237e   : > { %v5658_v5 = vmul.f32 %v8028_v61, %v5651_v63  ;;  %v6118_v61 = vld [vmem:[%s10995_s11 + $0x18] sm:$0xff]  ;;  %v6117_v63 = vld [vmem:[%s10995_s11 + $0x10] sm:$0xff] }
0x2380   : > { %v5665_v7 = vadd.f32 %v8029_v1, %v5658_v5  ;;  %v6116_v1 = vld [vmem:[%s10995_s11 + $0x8] sm:$0xff]  ;;  %v6115_v5 = vld [vmem:[%s10995_s11] sm:$0xff] }
0x2382   : > { %8047 = vmatmul.mubr.msk.f32.vlgmr.msra.gmra.mxu0 %vm1309_vm0, %v5665_v7 }
0x2383   : > { %9193 = vmatprep.mubr.msk.f32.mxu0 %vm9551_vm1, %v9550_v10 }
0x2442   : > { %v5765_v33 = vpop.f32.mrf.mxu0 }
0x2443   : > { %v5766_v27 = vadd.f32 %v5765_v33, %v5689_v42 }
0x2444   : > { %v5767_v62 = vpop.f32.mrf.mxu0 }
0x2445   : > { %v8048_v44 = vmul.f32 -1.702, %v5766_v27  ;;  %v5768_v45 = vadd.f32 %v5767_v62, %v5693_v43 }
0x2447   : > { %v5774_v46 = vmul.f32 1.442695, %v8048_v44  ;;  %v8049_v47 = vmul.f32 -1.702, %v5768_v45 }
0x2449   : > { %9444 = vpow2.f32 %v5774_v46  ;;  %v5776_v48 = vmul.f32 1.442695, %v8049_v47 }
0x244b   : > { %9446 = vpow2.f32 %v5776_v48 }
0x2456   : > { %v9445_v49 = vpop.eup %9444 }
0x2457   : > { %v5778_v50 = vadd.f32 1.0, %v9445_v49 }
0x2458   : > { %v9447_v51 = vpop.eup %9446 }
0x2459   : > { %v5779_v52 = vadd.f32 1.0, %v9447_v51  ;;  %9448 = vrcp.f32 %v5778_v50 }
0x245b   : > { %9450 = vrcp.f32 %v5779_v52 }
0x2466   : > { %v9449_v53 = vpop.eup %9448 }
0x2467   : > { %v5784_v4 = vmul.f32 %v9449_v53, %v5766_v27 }
0x2468   : > { %v9451_v54 = vpop.eup %9450 }
0x2469   : > { %v5785_v55 = vmul.f32 %v9451_v54, %v5768_v45 }
0x246b   : > { %5883 = vmatprep.mubr.f32.mxu1 %v5785_v55 }
0x246c   : > { %5884 = vmatmul.mubr.f32.vlgmr.msra.gmra.mxu1 %v5784_v4 }
0x246d   : > { %9216 = vmatpush3.msra.mxu1 %v6122_v56  ;;  %9231 = vmatprep.mubr.msk.f32.mxu1 %vm9551_vm1, %v9550_v10 }
0x246e   : > { %9217 = vmatprep.subr.mxu1 %v9550_v10 }
0x246f   : > { %9218 = vmatpush3.msra.mxu1 %v6121_v57  ;;  %v6288_v57 = vld [vmem:[%s10998_s18 + $0x38] sm:$0xff] }
0x2470   : > { %9219 = vmatprep.subr.mxu1 %v9550_v10 }
0x2471   : > { %9220 = vmatpush3.msra.mxu1 %v6120_v58  ;;  %v6287_v58 = vld [vmem:[%s10998_s18 + $0x30] sm:$0xff] }
0x2472   : > { %9221 = vmatprep.subr.mxu1 %v9550_v10 }
0x2473   : > { %9222 = vmatpush3.msra.mxu1 %v6119_v59  ;;  %v6286_v59 = vld [vmem:[%s10998_s18 + $0x28] sm:$0xff] }
0x2474   : > { %9223 = vmatprep.subr.mxu1 %v9550_v10 }
0x2475   : > { %9224 = vmatpush3.msra.mxu1 %v6118_v61  ;;  %v6285_v61 = vld [vmem:[%s10998_s18 + $0x20] sm:$0xff] }
0x2476   : > { %9225 = vmatprep.subr.mxu1 %v9550_v10 }
0x2477   : > { %9226 = vmatpush3.msra.mxu1 %v6117_v63  ;;  %v6284_v63 = vld [vmem:[%s10998_s18 + $0x18] sm:$0xff] }
0x2478   : > { %9227 = vmatprep.subr.mxu1 %v9550_v10 }
0x2479   : > { %9228 = vmatpush3.msra.mxu1 %v6116_v1  ;;  %v6283_v1 = vld [vmem:[%s10998_s18 + $0x10] sm:$0xff] }
0x247a   : > { %9229 = vmatprep.subr.mxu1 %v9550_v10 }
0x247b   : > { %9230 = vmatpush3.msra.mxu1 %v6115_v5  ;;  %v6282_v5 = vld [vmem:[%s10998_s18 + $0x8] sm:$0xff] }
0x247c   : > { %9258 = vmatprep.subr.mxu1 %v9550_v10 }
0x252c   : > { %v8458_v7 = vpop.f32.mrf.mxu1 }
0x252e   : > { %v8459_v3 = vpop.f32.mrf.mxu1 }
0x252f   : > { %v8460_v9 = vadd.f32 %v8459_v3, %v8458_v7  ;;  %v6281_v7 = vld [vmem:[%s10998_s18] sm:$0xff] }
0x2530   : > { %v8087_v3 = vld [vmem:[%s10999_s22] ss:$0 sm:$0xff]  ;;  %s11002_s22 = sld [smem:[#allocation20_spill]] }
0x2531   : > { %v5889_v12 = vadd.f32 %v8460_v9, %v10564_v39 }
0x2533   : > { %v10648_v13 = vadd.f32 %v8083_v11, %v5889_v12 }
0x2535   : > { %9192 = vmatpush3.xpose.msk.msra.mxu0 %vm1309_vm0, %v10648_v13  ;;  %9232 = vmatmul.mubr.msk.f32.vlgmr.msra.gmra.mxu1 %vm1309_vm0, %v10648_v13  ;;  %v5972_v18 = vmul.f32 %v10648_v13, %v10648_v13 }
0x2536   : > { %9259 = vmatpush3.msra.mxu1 %v6366_v15  ;;  %9196 = vmatprep.subr.mxu0 %v9550_v10 }
0x2537   : > { %9260 = vmatprep.subr.mxu1 %v9550_v10  ;;  %v5973_v39 = vsel %vm1309_vm0, %v5972_v18, 0.0  ;;  %9274 = vmatprep.mubr.msk.f32.mxu1 %vm9551_vm1, %v9550_v10 }
0x2538   : > { %9261 = vmatpush3.msra.mxu1 %v6365_v17  ;;  %5974 = vadd.xlane.f32.xlu0 %v5973_v39  ;;  %v10738_v39 = vld [vmem:[%s11000_s20] sm:$0xff]  ;;  %s11003_s20 = sld [smem:[#allocation19_spill]] }
0x2539   : > { %9262 = vmatprep.subr.mxu1 %v9550_v10  ;;  %9194 = vmatmul.mubr.msk.f32.vlgmr.msra.gmra.mxu0 %vm1309_vm0, %v10648_v13 }
0x253a   : > { %9197 = vmatpush3.msra.mxu0 %v6044_v60  ;;  %9263 = vmatpush3.msra.mxu1 %v6364_v19 }
0x253b   : > { %9198 = vmatprep.subr.mxu0 %v9550_v10  ;;  %9264 = vmatprep.subr.mxu1 %v9550_v10 }
0x253c   : > { %9199 = vmatpush3.msra.mxu0 %v6043_v20  ;;  %9265 = vmatpush3.msra.mxu1 %v6363_v21  ;;  %v6527_v20 = vld [vmem:[%s11001_s1 + $0x10] sm:$0xff] }
0x253d   : > { %9200 = vmatprep.subr.mxu0 %v9550_v10  ;;  %9266 = vmatprep.subr.mxu1 %v9550_v10 }
0x253e   : > { %9201 = vmatpush3.msra.mxu0 %v6042_v22  ;;  %9267 = vmatpush3.msra.mxu1 %v6362_v23  ;;  %v6526_v22 = vld [vmem:[%s11001_s1 + $0x8] sm:$0xff] }
0x253f   : > { %9202 = vmatprep.subr.mxu0 %v9550_v10  ;;  %9268 = vmatprep.subr.mxu1 %v9550_v10 }
0x2540   : > { %9203 = vmatpush3.msra.mxu0 %v6041_v24  ;;  %9269 = vmatpush3.msra.mxu1 %v6361_v25  ;;  %v6525_v24 = vld [vmem:[%s11001_s1] sm:$0xff] }
0x2541   : > { %9204 = vmatprep.subr.mxu0 %v9550_v10  ;;  %9270 = vmatprep.subr.mxu1 %v9550_v10 }
0x2542   : > { %9205 = vmatpush3.msra.mxu0 %v6040_v26  ;;  %9271 = vmatpush3.msra.mxu1 %v6360_v28  ;;  %v6684_v28 = vld [vmem:[%s11002_s22 + $0x18] sm:$0xff] }
0x2543   : > { %9206 = vmatprep.subr.mxu0 %v9550_v10  ;;  %9272 = vmatprep.subr.mxu1 %v9550_v10 }
0x2544   : > { %9207 = vmatpush3.msra.mxu0 %v6039_v29  ;;  %9273 = vmatpush3.msra.mxu1 %v6359_v30  ;;  %v6683_v29 = vld [vmem:[%s11002_s22 + $0x10] sm:$0xff]  ;;  %v6682_v30 = vld [vmem:[%s11002_s22 + $0x8] sm:$0xff] }
0x2545   : > { %9208 = vmatprep.subr.mxu0 %v9550_v10  ;;  %9275 = vmatmul.mubr.msk.f32.vlgmr.msra.gmra.mxu1 %vm1309_vm0, %v10648_v13 }
0x2546   : > { %9209 = vmatpush3.msra.mxu0 %v6038_v31  ;;  %9212 = vmatprep.mubr.msk.f32.mxu0 %vm9551_vm1, %v9550_v10  ;;  %v6681_v31 = vld [vmem:[%s11002_s22] sm:$0xff] }
0x2547   : > { %9210 = vmatprep.subr.mxu0 %v9550_v10  ;;  %9293 = vmatprep.subr.mxu1 %v9550_v10 }
0x2548   : > { %9211 = vmatpush3.msra.mxu0 %v6037_v2  ;;  %9295 = vmatprep.mubr.msk.f32.mxu1 %vm9551_vm1, %v9550_v10  ;;  %v8092_v2 = vld [vmem:[%s11003_s20] ss:$0 sm:$0xff]  ;;  %s11005_s20 = sld [smem:[#allocation22_spill]] }
0x2549   : > { %9213 = vmatmul.mubr.msk.f32.vlgmr.msra.gmra.mxu0 %vm1309_vm0, %v10648_v13  ;;  %9234 = vmatprep.subr.mxu0 %v9550_v10 }
0x254a   : > { %9236 = vmatprep.mubr.msk.f32.mxu0 %vm9551_vm1, %v9550_v10 }
0x25c1   : > { %v5975_v32 = vpop.xlane.xlu0 %5974 }
0x25c2   : > { %9452 = vrsqrt.f32 %v5975_v32  ;;  %vm5978_vm4 = vcmp.eq.f32.partialorder %v5975_v32, inf  ;;  %v5981_v35 = vand.u32 2147483648, %v5975_v32  ;;  %vm5980_vm5 = vcmp.eq.f32.partialorder %v5975_v32, 0.0 }
0x25cf   : > { %v9453_v34 = vpop.eup %9452 }
0x25d0   : > { %v5977_v14 = vmul.f32 %v9453_v34, %v5975_v32 }
0x25d2   : > { %v5979_v36 = vsel %vm5978_vm4, %v5975_v32, %v5977_v14 }
0x25d3   : > { %v5982_v37 = vsel %vm5980_vm5, %v5981_v35, %v5979_v36 }
0x25d4   : > { %5983 = vxpose.xlu1.b32.start.end [1/1] (short) (narrow) %v5982_v37, 8 }
0x25f5   : > { %v6196_v38 = vpop.f32.mrf.mxu1 }
0x25f6   : > { %v6197_v9 = vadd.f32 %v8087_v3, %v6196_v38 }
0x25f7   : > { %v9233_v16 = vpop.f32.mrf.mxu1 }
0x25f9   : > { %v5968_v40 = vpop.f32.mrf.mxu0 }
0x25fb   : > { %v9195_v0 = vpop.f32.mrf.mxu0 }
0x2605   : > { %v10704_v41 = vpop.f32.mrf.mxu1 }
0x2606   : > { %v6441_v32 = vadd.f32 %v8092_v2, %v10704_v41 }
0x2607   : > { %v9276_v42 = vpop.f32.mrf.mxu1 }
0x2609   : > { %v6111_v43 = vpop.f32.mrf.mxu0 }
0x260a   : > { %9235 = vmatpush3.msra.mxu0 %v6111_v43 }
0x260b   : > { %v9214_v33 = vpop.f32.mrf.mxu0  ;;  %9239 = vmatprep.subr.mxu0 %v9550_v10 }
0x2650   : > { %v5999_v27 = vpop.trf.xlu1 }
0x2651   : > { %v6018_v62 = vrot.slane %v5999_v27, %v10203_v6 }
0x2653   : > { %v6019_v44 = vmul.f32 %v6018_v62, %v5982_v37 }
0x2655   : > { %v6020_v45 = vadd.f32 1e-20, %v6019_v44 }
0x2657   : > { %9454 = vrcp.f32 %v6020_v45 }
0x2664   : > { %v9455_v46 = vpop.eup %9454 }
0x2665   : > { %v6022_v47 = vmul.f32 %v9455_v46, %v5968_v40 }
0x2667   : > { %vm6023_vm6 = vcmp.gt.f32.partialorder %v6022_v47, 0.7 }
0x2668   : > { %v6024_v48 = vsel %vm6023_vm6, %v6022_v47, 0.0 }
0x2669   : > { %v6025_v49 = vsel %vm1674_vm3, %v6024_v48, -inf }
0x266a   : > { %6026 = vmax.xlane.f32.xlu0 %v6025_v49 }
0x26f3   : > { %v6027_v50 = vpop.xlane.xlu0 %6026 }
0x26f4   : > { %v6028_v51 = vsub.f32 %v6024_v48, %v6027_v50 }
0x26f6   : > { %v6029_v52 = vmul.f32 1.442695, %v6028_v51 }
0x26f8   : > { %9456 = vpow2.f32 %v6029_v52 }
0x2705   : > { %v9457_v53 = vpop.eup %9456 }
0x2706   : > { %v6031_v54 = vsel %vm1674_vm3, %v9457_v53, 0.0 }
0x2707   : > { %6032 = vadd.xlane.f32.xlu0 %v6031_v54 }
0x2790   : > { %v6033_v55 = vpop.xlane.xlu0 %6032 }
0x2791   : > { %9458 = vrcp.f32 %v6033_v55  ;;  %v6843_v55 = vld [vmem:[%s11005_s20 + $0x18] sm:$0xff] }
0x279e   : > { %v9459_v4 = vpop.eup %9458 }
0x279f   : > { %v10710_v56 = vmul.f32 %v9459_v4, %v9457_v53  ;;  %v6842_v4 = vld [vmem:[%s11005_s20 + $0x10] sm:$0xff] }
0x27a1   : > { %9237 = vmatmul.mubr.msk.f32.vlgmr.msra.gmra.mxu0 %vm1674_vm3, %v10710_v56 }
0x27a2   : > { %9240 = vmatpush3.msra.mxu0 %v6288_v57  ;;  %9255 = vmatprep.mubr.msk.f32.mxu0 %vm9551_vm1, %v9550_v10  ;;  %v6840_v57 = vld [vmem:[%s11005_s20] sm:$0xff] }
0x27a3   : > { %9241 = vmatprep.subr.mxu0 %v9550_v10 }
0x27a4   : > { %9242 = vmatpush3.msra.mxu0 %v6287_v58 }
0x27a5   : > { %9243 = vmatprep.subr.mxu0 %v9550_v10 }
0x27a6   : > { %9244 = vmatpush3.msra.mxu0 %v6286_v59 }
0x27a7   : > { %9245 = vmatprep.subr.mxu0 %v9550_v10 }
0x27a8   : > { %9246 = vmatpush3.msra.mxu0 %v6285_v61 }
0x27a9   : > { %9247 = vmatprep.subr.mxu0 %v9550_v10 }
0x27aa   : > { %9248 = vmatpush3.msra.mxu0 %v6284_v63 }
0x27ab   : > { %9249 = vmatprep.subr.mxu0 %v9550_v10 }
0x27ac   : > { %9250 = vmatpush3.msra.mxu0 %v6283_v1 }
0x27ad   : > { %9251 = vmatprep.subr.mxu0 %v9550_v10 }
0x27ae   : > { %9252 = vmatpush3.msra.mxu0 %v6282_v5 }
0x27af   : > { %9253 = vmatprep.subr.mxu0 %v9550_v10 }
0x27b0   : > { %9254 = vmatpush3.msra.mxu0 %v6281_v7 }
0x27b1   : > { %9256 = vmatmul.mubr.msk.f32.vlgmr.msra.gmra.mxu0 %vm1309_vm0, %v10648_v13  ;;  %9277 = vmatprep.subr.mxu0 %v9550_v10  ;;  %v6528_v13 = vld [vmem:[%s11001_s1 + $0x18] sm:$0xff]  ;;  %s11004_s1 = sld [smem:[#allocation21_spill]] }
0x27b2   : > { %9279 = vmatprep.mubr.msk.f32.mxu0 %vm9551_vm1, %v9550_v10 }
0x27b7   : > { %v6839_v43 = vld [vmem:[%s11004_s1 + $0x18] sm:$0xff]  ;;  %v6838_v33 = vld [vmem:[%s11004_s1 + $0x10] sm:$0xff]  ;;  %v6837_v27 = vld [vmem:[%s11004_s1 + $0x8] sm:$0xff] }
0x27b8   : > { %v6836_v62 = vld [vmem:[%s11004_s1] sm:$0xff]  ;;  %s11006_s1 = sld [smem:[#allocation24_spill]] }
0x27be   : > { %v7013_v58 = vld [vmem:[%s11006_s1 + $0x78] sm:$0xff] }
0x2861   : > { %v6269_v11 = vpop.f32.mrf.mxu0 }
0x2862   : > { %v6270_v12 = vadd.f32 %v6269_v11, %v6197_v9 }
0x2863   : > { %v9238_v15 = vpop.f32.mrf.mxu0 }
0x2864   : > { %v8090_v17 = vmul.f32 -1.702, %v6270_v12 }
0x2866   : > { %v6275_v18 = vmul.f32 1.442695, %v8090_v17  ;;  %v7012_v17 = vld [vmem:[%s11006_s1 + $0x70] sm:$0xff] }
0x2868   : > { %9460 = vpow2.f32 %v6275_v18  ;;  %v7011_v18 = vld [vmem:[%s11006_s1 + $0x68] sm:$0xff] }
0x2871   : > { %v6355_v60 = vpop.f32.mrf.mxu0 }
0x2872   : > { %9278 = vmatpush3.msra.mxu0 %v6355_v60  ;;  %v7009_v60 = vld [vmem:[%s11006_s1 + $0x58] sm:$0xff] }
0x2873   : > { %v9257_v19 = vpop.f32.mrf.mxu0  ;;  %9280 = vmatmul.mubr.msk.f32.vlgmr.msra.gmra.mxu0 %vm1674_vm3, %v10738_v39  ;;  %9282 = vmatprep.subr.mxu0 %v9550_v10 }
0x2874   : > { %9283 = vmatpush3.msra.mxu0 %v6528_v13  ;;  %9290 = vmatprep.mubr.msk.f32.mxu0 %vm9551_vm1, %v9550_v10  ;;  %v7008_v13 = vld [vmem:[%s11006_s1 + $0x50] sm:$0xff]  ;;  %v7007_v19 = vld [vmem:[%s11006_s1 + $0x48] sm:$0xff] }
0x2875   : > { %v9461_v21 = vpop.eup %9460  ;;  %9284 = vmatprep.subr.mxu0 %v9550_v10 }
0x2876   : > { %v6277_v23 = vadd.f32 1.0, %v9461_v21  ;;  %9285 = vmatpush3.msra.mxu0 %v6527_v20  ;;  %v7006_v20 = vld [vmem:[%s11006_s1 + $0x40] sm:$0xff]  ;;  %v7005_v21 = vld [vmem:[%s11006_s1 + $0x38] sm:$0xff] }
0x2877   : > { %9286 = vmatprep.subr.mxu0 %v9550_v10 }
0x2878   : > { %9462 = vrcp.f32 %v6277_v23  ;;  %9287 = vmatpush3.msra.mxu0 %v6526_v22  ;;  %v7004_v22 = vld [vmem:[%s11006_s1 + $0x30] sm:$0xff]  ;;  %v7003_v23 = vld [vmem:[%s11006_s1 + $0x28] sm:$0xff] }
0x2879   : > { %9288 = vmatprep.subr.mxu0 %v9550_v10 }
0x287a   : > { %9289 = vmatpush3.msra.mxu0 %v6525_v24  ;;  %v7002_v24 = vld [vmem:[%s11006_s1 + $0x20] sm:$0xff] }
0x287b   : > { %9298 = vmatprep.subr.mxu0 %v9550_v10 }
0x2885   : > { %v9463_v25 = vpop.eup %9462 }
0x2886   : > { %v6280_v26 = vmul.f32 %v9463_v25, %v6270_v12  ;;  %v7001_v25 = vld [vmem:[%s11006_s1 + $0x18] sm:$0xff] }
0x2888   : > { %9291 = vmatmul.mubr.msk.f32.vlgmr.msra.gmra.mxu0 %vm6529_vm7, %v6280_v26 }
0x2889   : > { %9306 = vmatprep.mubr.msk.f32.mxu0 %vm9551_vm1, %v9550_v10  ;;  %9299 = vmatpush3.msra.mxu0 %v6684_v28  ;;  %v6999_v28 = vld [vmem:[%s11006_s1 + $0x8] sm:$0xff] }
0x288a   : > { %9300 = vmatprep.subr.mxu0 %v9550_v10 }
0x288b   : > { %9301 = vmatpush3.msra.mxu0 %v6683_v29  ;;  %v6998_v29 = vld [vmem:[%s11006_s1] sm:$0xff] }
0x288c   : > { %9302 = vmatprep.subr.mxu0 %v9550_v10 }
0x288d   : > { %9303 = vmatpush3.msra.mxu0 %v6682_v30 }
0x288e   : > { %9304 = vmatprep.subr.mxu0 %v9550_v10 }
0x288f   : > { %9305 = vmatpush3.msra.mxu0 %v6681_v31  ;;  %v8104_v31 = vld [vmem:[%s11007_s2] ss:$0 sm:$0xff]  ;;  %s11009_s2 = sld [smem:[#allocation25_spill]] }
0x2890   : > { %9325 = vmatprep.subr.mxu0 %v9550_v10 }
0x2933   : > { %v6513_v34 = vpop.f32.mrf.mxu0 }
0x2934   : > { %v6514_v14 = vadd.f32 %v6513_v34, %v6441_v32 }
0x2935   : > { %v9281_v35 = vpop.f32.mrf.mxu0 }
0x2936   : > { %v8095_v36 = vmul.f32 -1.702, %v6514_v14  ;;  %v7131_v35 = vld [vmem:[%s11008_s3 + $0x78] sm:$0xff] }
0x2938   : > { %v6519_v37 = vmul.f32 1.442695, %v8095_v36  ;;  %v7146_v36 = vld [vmem:[%s11008_s3 + $0xf0] sm:$0xff] }
0x293a   : > { %9464 = vpow2.f32 %v6519_v37  ;;  %v7130_v37 = vld [vmem:[%s11008_s3 + $0x70] sm:$0xff] }
0x2947   : > { %v9465_v38 = vpop.eup %9464 }
0x2948   : > { %v6521_v16 = vadd.f32 1.0, %v9465_v38  ;;  %v6599_v40 = vpop.f32.mrf.mxu0  ;;  %v7145_v38 = vld [vmem:[%s11008_s3 + $0xe8] sm:$0xff] }
0x2949   : > { %9294 = vmatpush3.msra.mxu1 %v6599_v40  ;;  %v7144_v40 = vld [vmem:[%s11008_s3 + $0xe0] sm:$0xff] }
0x294a   : > { %9466 = vrcp.f32 %v6521_v16  ;;  %v9292_v0 = vpop.f32.mrf.mxu0  ;;  %9296 = vmatmul.mubr.msk.f32.vlgmr.msra.gmra.mxu1 %vm1674_vm3, %v10710_v56  ;;  %9309 = vmatprep.subr.mxu1 %v9550_v10  ;;  %v6841_v56 = vld [vmem:[%s11005_s20 + $0x8] sm:$0xff] }
0x294b   : > { %9311 = vmatprep.mubr.msk.f32.mxu1 %vm9551_vm1, %v9550_v10  ;;  %v7129_v16 = vld [vmem:[%s11008_s3 + $0x68] sm:$0xff]  ;;  %v7128_v0 = vld [vmem:[%s11008_s3 + $0x60] sm:$0xff] }
0x2957   : > { %v9467_v41 = vpop.eup %9466 }
0x2958   : > { %v6524_v42 = vmul.f32 %v9467_v41, %v6514_v14  ;;  %v7147_v14 = vld [vmem:[%s11008_s3 + $0xf8] sm:$0xff] }
0x2959   : > { %v7143_v41 = vld [vmem:[%s11008_s3 + $0xd8] sm:$0xff] }
0x295a   : > { %9307 = vmatmul.mubr.msk.f32.vlgmr.msra.gmra.mxu0 %vm6529_vm7, %v6524_v42 }
0x295b   : > { %9333 = vmatprep.mubr.msk.f32.mxu0 %vm9551_vm1, %v9550_v10  ;;  %9326 = vmatpush3.msra.mxu0 %v6839_v43  ;;  %v7142_v43 = vld [vmem:[%s11008_s3 + $0xd0] sm:$0xff] }
0x295c   : > { %9327 = vmatprep.subr.mxu0 %v9550_v10 }
0x295d   : > { %9328 = vmatpush3.msra.mxu0 %v6838_v33  ;;  %v7126_v33 = vld [vmem:[%s11008_s3 + $0x50] sm:$0xff] }
0x295e   : > { %9329 = vmatprep.subr.mxu0 %v9550_v10 }
0x295f   : > { %9330 = vmatpush3.msra.mxu0 %v6837_v27  ;;  %v7141_v27 = vld [vmem:[%s11008_s3 + $0xc8] sm:$0xff] }
0x2960   : > { %9331 = vmatprep.subr.mxu0 %v9550_v10 }
0x2961   : > { %9332 = vmatpush3.msra.mxu0 %v6836_v62  ;;  %v7125_v62 = vld [vmem:[%s11008_s3 + $0x48] sm:$0xff] }
0x2962   : > { %8527 = vmatprep.subr.mxu0 %v7147_v14  ;;  %v9552_v14 = vmov 0  }
0x2963   : > { %9395 = vset.pattern.permute.xlu0 %v9552_v14  ;;  %v7408_v14 = vld [vmem:[%s9759_s27 + $0xa0] sm:$0xff] }
0x2a0a   : > { %v6669_v44 = vpop.f32.mrf.mxu1 }
0x2a0b   : > { %v6670_v45 = vadd.f32 %v6669_v44, %v6280_v26  ;;  %v7000_v26 = vld [vmem:[%s11006_s1 + $0x10] sm:$0xff]  ;;  %v7140_v44 = vld [vmem:[%s11008_s3 + $0xc0] sm:$0xff] }
0x2a0c   : > { %v9297_v46 = vpop.f32.mrf.mxu1 }
0x2a0d   : > { %v8098_v47 = vmul.f32 -1.702, %v6670_v45  ;;  %v7139_v46 = vld [vmem:[%s11008_s3 + $0xb8] sm:$0xff] }
0x2a0f   : > { %v6675_v48 = vmul.f32 1.442695, %v8098_v47  ;;  %v7123_v47 = vld [vmem:[%s11008_s3 + $0x38] sm:$0xff] }
0x2a11   : > { %9468 = vpow2.f32 %v6675_v48  ;;  %v7138_v48 = vld [vmem:[%s11008_s3 + $0xb0] sm:$0xff] }
0x2a1a   : > { %v6754_v49 = vpop.f32.mrf.mxu0 }
0x2a1b   : > { %9310 = vmatpush3.msra.mxu1 %v6754_v49  ;;  %v7122_v49 = vld [vmem:[%s11008_s3 + $0x30] sm:$0xff] }
0x2a1c   : > { %v9308_v50 = vpop.f32.mrf.mxu0  ;;  %9312 = vmatmul.mubr.msk.f32.vlgmr.msra.gmra.mxu1 %vm1674_vm3, %v10738_v39  ;;  %9314 = vmatprep.subr.mxu1 %v9550_v10  ;;  %v7010_v39 = vld [vmem:[%s11006_s1 + $0x60] sm:$0xff]  ;;  %s11010_s1 = sld [smem:[#allocation27_spill]] }
0x2a1d   : > { %9322 = vmatprep.mubr.msk.f32.mxu1 %vm9551_vm1, %v9550_v10  ;;  %9315 = vmatpush3.msra.mxu1 %v6843_v55  ;;  %v7137_v50 = vld [vmem:[%s11008_s3 + $0xa8] sm:$0xff]  ;;  %v7119_v55 = vld [vmem:[%s11008_s3 + $0x18] sm:$0xff] }
0x2a1e   : > { %v9469_v51 = vpop.eup %9468  ;;  %9316 = vmatprep.subr.mxu1 %v9550_v10 }
0x2a1f   : > { %v6677_v52 = vadd.f32 1.0, %v9469_v51  ;;  %9317 = vmatpush3.msra.mxu1 %v6842_v4  ;;  %v7121_v51 = vld [vmem:[%s11008_s3 + $0x28] sm:$0xff]  ;;  %v7134_v4 = vld [vmem:[%s11008_s3 + $0x90] sm:$0xff] }
0x2a20   : > { %9318 = vmatprep.subr.mxu1 %v9550_v10 }
0x2a21   : > { %9470 = vrcp.f32 %v6677_v52  ;;  %9319 = vmatpush3.msra.mxu1 %v6841_v56  ;;  %v7136_v52 = vld [vmem:[%s11008_s3 + $0xa0] sm:$0xff]  ;;  %v7118_v56 = vld [vmem:[%s11008_s3 + $0x10] sm:$0xff] }
0x2a22   : > { %9320 = vmatprep.subr.mxu1 %v9550_v10 }
0x2a23   : > { %9321 = vmatpush3.msra.mxu1 %v6840_v57  ;;  %v7133_v57 = vld [vmem:[%s11008_s3 + $0x88] sm:$0xff] }
0x2a24   : > { %7045 = vmatprep.subr.mxu1 %v7013_v58  ;;  %v7117_v58 = vld [vmem:[%s11008_s3 + $0x8] sm:$0xff] }
0x2a2e   : > { %v9471_v53 = vpop.eup %9470 }
0x2a2f   : > { %v6680_v54 = vmul.f32 %v9471_v53, %v6670_v45  ;;  %v7124_v45 = vld [vmem:[%s11008_s3 + $0x40] sm:$0xff] }
0x2a30   : > { %v7120_v53 = vld [vmem:[%s11008_s3 + $0x20] sm:$0xff] }
0x2a31   : > { %9334 = vmatmul.mubr.msk.f32.vlgmr.msra.gmra.mxu0 %vm6529_vm7, %v6680_v54  ;;  %v7135_v54 = vld [vmem:[%s11008_s3 + $0x98] sm:$0xff] }
0x2a32   : > { %8528 = vmatpush3.msra.mxu0 %v7131_v35  ;;  %v8110_v35 = vld [vmem:[#allocation2] ss:$0 sm:$0xff] }
0x2a33   : > { %8529 = vmatprep.subr.mxu0 %v7146_v36 }
0x2a34   : > { %8530 = vmatpush3.msra.mxu0 %v7130_v37 }
0x2a35   : > { %8531 = vmatprep.subr.mxu0 %v7145_v38 }
0x2a36   : > { %8532 = vmatpush3.msra.mxu0 %v7129_v16 }
0x2a37   : > { %8533 = vmatprep.subr.mxu0 %v7144_v40 }
0x2a38   : > { %8534 = vmatpush3.msra.mxu0 %v7128_v0 }
0x2a39   : > { %8535 = vmatprep.subr.mxu0 %v7143_v41 }
0x2adc   : > { %v6824_v59 = vpop.f32.mrf.mxu1 }
0x2add   : > { %v6825_v61 = vadd.f32 %v6824_v59, %v6524_v42  ;;  %v7127_v42 = vld [vmem:[%s11008_s3 + $0x58] sm:$0xff]  ;;  %v7132_v59 = vld [vmem:[%s11008_s3 + $0x80] sm:$0xff] }
0x2ade   : > { %v9313_v63 = vpop.f32.mrf.mxu1  ;;  %8536 = vmatpush3.msra.mxu0 %v7127_v42 }
0x2adf   : > { %v8101_v1 = vmul.f32 -1.702, %v6825_v61  ;;  %8537 = vmatprep.subr.mxu0 %v7142_v43  ;;  %v7014_v63 = vld [vmem:[%s11009_s2] sm:$0x3]  ;;  %s1298_s2 = scalar_lea.vmem %s9769_s21, %s9784_s0 }
0x2ae0   : > { %8538 = vmatpush3.msra.mxu0 %v7126_v33 }
0x2ae1   : > { %v6830_v5 = vmul.f32 1.442695, %v8101_v1  ;;  %8539 = vmatprep.subr.mxu0 %v7141_v27  ;;  %v7019_v1 = vrot.slane %v7014_v63, %v10203_v6 }
0x2ae2   : > { %8540 = vmatpush3.msra.mxu0 %v7125_v62 }
0x2ae3   : > { %9472 = vpow2.f32 %v6830_v5  ;;  %8541 = vmatprep.subr.mxu0 %v7140_v44  ;;  %v7023_v5 = vrot.slane %v7014_v63, %v10206_v8 }
0x2ae4   : > { %8542 = vmatpush3.msra.mxu0 %v7124_v45 }
0x2ae5   : > { %8543 = vmatprep.subr.mxu0 %v7139_v46  ;;  %v7285_v46 = vld [vmem:[%s11012_s5 + $0x78] sm:$0xff] }
0x2ae6   : > { %8544 = vmatpush3.msra.mxu0 %v7123_v47  ;;  %v7284_v47 = vld [vmem:[%s11012_s5 + $0x70] sm:$0xff] }
0x2ae7   : > { %8545 = vmatprep.subr.mxu0 %v7138_v48  ;;  %v7283_v48 = vld [vmem:[%s11012_s5 + $0x68] sm:$0xff] }
0x2ae8   : > { %8546 = vmatpush3.msra.mxu0 %v7122_v49  ;;  %v7282_v49 = vld [vmem:[%s11012_s5 + $0x60] sm:$0xff] }
0x2ae9   : > { %8547 = vmatprep.subr.mxu0 %v7137_v50  ;;  %v7281_v50 = vld [vmem:[%s11012_s5 + $0x58] sm:$0xff] }
0x2aea   : > { %8548 = vmatpush3.msra.mxu0 %v7121_v51  ;;  %v7280_v51 = vld [vmem:[%s11012_s5 + $0x50] sm:$0xff] }
0x2aeb   : > { %8549 = vmatprep.subr.mxu0 %v7136_v52  ;;  %v7279_v52 = vld [vmem:[%s11012_s5 + $0x48] sm:$0xff] }
0x2aec   : > { %8550 = vmatpush3.msra.mxu0 %v7120_v53  ;;  %v7278_v53 = vld [vmem:[%s11012_s5 + $0x40] sm:$0xff] }
0x2aed   : > { %8551 = vmatprep.subr.mxu0 %v7135_v54  ;;  %v7277_v54 = vld [vmem:[%s11012_s5 + $0x38] sm:$0xff] }
0x2aee   : > { %8552 = vmatpush3.msra.mxu0 %v7119_v55  ;;  %v7276_v55 = vld [vmem:[%s11012_s5 + $0x30] sm:$0xff] }
0x2aef   : > { %8553 = vmatprep.subr.mxu0 %v7134_v4  ;;  %v7275_v4 = vld [vmem:[%s11012_s5 + $0x28] sm:$0xff] }
0x2af0   : > { %v9473_v7 = vpop.eup %9472  ;;  %8554 = vmatpush3.msra.mxu0 %v7118_v56  ;;  %v7274_v56 = vld [vmem:[%s11012_s5 + $0x20] sm:$0xff] }
0x2af1   : > { %v6832_v3 = vadd.f32 1.0, %v9473_v7  ;;  %v6986_v9 = vpop.f32.mrf.mxu0  ;;  %8555 = vmatprep.subr.mxu0 %v7133_v57  ;;  %v7273_v57 = vld [vmem:[%s11012_s5 + $0x18] sm:$0xff] }
0x2af2   : > { %8556 = vmatpush3.msra.mxu0 %v7117_v58  ;;  %v7272_v58 = vld [vmem:[%s11012_s5 + $0x10] sm:$0xff] }
0x2af3   : > { %9474 = vrcp.f32 %v6832_v3  ;;  %v9335_v11 = vpop.f32.mrf.mxu0  ;;  %8557 = vmatprep.subr.mxu0 %v7132_v59  ;;  %v7271_v59 = vld [vmem:[%s11012_s5 + $0x8] sm:$0xff] }
0x2b00   : > { %v9475_v12 = vpop.eup %9474 }
0x2b01   : > { %v6835_v15 = vmul.f32 %v9475_v12, %v6825_v61  ;;  %v7116_v61 = vld [vmem:[%s11008_s3] sm:$0xff]  ;;  %s11011_s3 = sld [smem:[#allocation28_spill]] }
0x2b02   : > { %8558 = vmatpush3.msra.mxu0 %v7116_v61  ;;  %v7270_v61 = vld [vmem:[%s11012_s5] sm:$0xff] }
0x2b03   : > { %9323 = vmatmul.mubr.msk.f32.vlgmr.msra.gmra.mxu1 %vm6529_vm7, %v6835_v15  ;;  %9336 = vmatprep.subr.mxu0 %v9550_v10 }
0x2b04   : > { %7046 = vmatpush1.msra.mxu1 %v7012_v17  ;;  %7093 = vmatprep.mubr.f32.mxu1 %v9550_v10 }
0x2b05   : > { %7047 = vmatprep.subr.mxu1 %v7011_v18 }
0x2b06   : > { %7048 = vmatpush1.msra.mxu1 %v7010_v39 }
0x2b07   : > { %7049 = vmatprep.subr.mxu1 %v7009_v60 }
0x2b08   : > { %7050 = vmatpush1.msra.mxu1 %v7008_v13 }
0x2b09   : > { %7051 = vmatprep.subr.mxu1 %v7007_v19 }
0x2b0a   : > { %7052 = vmatpush1.msra.mxu1 %v7006_v20 }
0x2b0b   : > { %7053 = vmatprep.subr.mxu1 %v7005_v21 }
0x2b0c   : > { %7054 = vmatpush1.msra.mxu1 %v7004_v22 }
0x2b0d   : > { %7055 = vmatprep.subr.mxu1 %v7003_v23 }
0x2b0e   : > { %7056 = vmatpush1.msra.mxu1 %v7002_v24 }
0x2b0f   : > { %7057 = vmatprep.subr.mxu1 %v7001_v25 }
0x2b10   : > { %7058 = vmatpush1.msra.mxu1 %v7000_v26 }
0x2b11   : > { %7059 = vmatprep.subr.mxu1 %v6999_v28  ;;  %v8108_v28 = vld [vmem:[%s11010_s1] ss:$0 sm:$0xff]  ;;  %s11014_s1 = sld [smem:[#allocation30_spill]] }
0x2b12   : > { %7060 = vmatpush1.msra.mxu1 %v6998_v29 }
0x2b13   : > { %7317 = vmatprep.subr.mxu1 %v7285_v46 }
0x2bc3   : > { %v6913_v30 = vpop.f32.mrf.mxu1 }
0x2bc4   : > { %v6987_v2 = vadd.f32 %v6986_v9, %v6913_v30  ;;  %v8109_v30 = vld [vmem:[%s11011_s3] ss:$0 sm:$0xff]  ;;  %s11013_s3 = sld [smem:[#allocation5_spill]] }
0x2bc5   : > { %v9324_v32 = vpop.f32.mrf.mxu1 }
0x2bc6   : > { %v10813_v34 = vadd.f32 %v8104_v31, %v6987_v2 }
0x2bc8   : > { %8105 = vmatmul.mubr.msk.f32.vlgmr.msra.gmra.mxu1 %vm1309_vm0, %v10813_v34  ;;  %v7499_v44 = vmul.f32 %v10813_v34, %v10813_v34 }
0x2bc9   : > { %7365 = vmatprep.mubr.f32.mxu1 %v9550_v10  ;;  %7318 = vmatpush1.msra.mxu1 %v7284_v47 }
0x2bca   : > { %v7500_v45 = vsel %vm1309_vm0, %v7499_v44, 0.0  ;;  %7319 = vmatprep.subr.mxu1 %v7283_v48 }
0x2bcb   : > { %7320 = vmatpush1.msra.mxu1 %v7282_v49 }
0x2bcc   : > { %7321 = vmatprep.subr.mxu1 %v7281_v50 }
0x2bcd   : > { %7322 = vmatpush1.msra.mxu1 %v7280_v51 }
0x2bce   : > { %7323 = vmatprep.subr.mxu1 %v7279_v52 }
0x2bcf   : > { %7324 = vmatpush1.msra.mxu1 %v7278_v53 }
0x2bd0   : > { %7325 = vmatprep.subr.mxu1 %v7277_v54 }
0x2bd1   : > { %7326 = vmatpush1.msra.mxu1 %v7276_v55 }
0x2bd2   : > { %7327 = vmatprep.subr.mxu1 %v7275_v4 }
0x2bd3   : > { %7328 = vmatpush1.msra.mxu1 %v7274_v56 }
0x2bd4   : > { %7329 = vmatprep.subr.mxu1 %v7273_v57 }
0x2bd5   : > { %7330 = vmatpush1.msra.mxu1 %v7272_v58  ;;  %v8114_v58 = vld [vmem:[%s9764_s4] ss:$0 sm:$0xff] }
0x2bd6   : > { %7331 = vmatprep.subr.mxu1 %v7271_v59 }
0x2bd7   : > { %7332 = vmatpush1.msra.mxu1 %v7270_v61 }
0x2c88   : > { %v7095_v7 = vpop.f32.mrf.mxu1 }
0x2c89   : > { %v7096_v3 = vadd.f32 %v7095_v7, %v7019_v1  ;;  %v7268_v7 = vld [vmem:[%s11013_s3] sm:$0x7] }
0x2c8a   : > { %v7097_v9 = vpop.f32.mrf.mxu1 }
0x2c8b   : > { %v8106_v11 = vmul.f32 -1.702, %v7096_v3  ;;  %v7098_v12 = vadd.f32 %v7097_v9, %v7023_v5 }
0x2c8d   : > { %v7104_v15 = vmul.f32 1.442695, %v8106_v11  ;;  %v8107_v17 = vmul.f32 -1.702, %v7098_v12  ;;  %v7419_v11 = vld [vmem:[%s9759_s27 + $0xf8] sm:$0xff] }
0x2c8e   : > { %8562 = vmatprep.subr.mxu1 %v7419_v11 }
0x2c8f   : > { %9476 = vpow2.f32 %v7104_v15  ;;  %v7106_v18 = vmul.f32 1.442695, %v8107_v17  ;;  %v7418_v15 = vld [vmem:[%s9759_s27 + $0xf0] sm:$0xff] }
0x2c90   : > { %v7402_v17 = vld [vmem:[%s9759_s27 + $0x70] sm:$0xff] }
0x2c91   : > { %9478 = vpow2.f32 %v7106_v18  ;;  %v7417_v18 = vld [vmem:[%s9759_s27 + $0xe8] sm:$0xff] }
0x2c9c   : > { %v9477_v39 = vpop.eup %9476 }
0x2c9d   : > { %v7108_v60 = vadd.f32 1.0, %v9477_v39  ;;  %v7401_v39 = vld [vmem:[%s9759_s27 + $0x68] sm:$0xff] }
0x2c9e   : > { %v9479_v13 = vpop.eup %9478 }
0x2c9f   : > { %v7109_v19 = vadd.f32 1.0, %v9479_v13  ;;  %9480 = vrcp.f32 %v7108_v60  ;;  %v7416_v60 = vld [vmem:[%s9759_s27 + $0xe0] sm:$0xff] }
0x2ca0   : > { %v7400_v13 = vld [vmem:[%s9759_s27 + $0x60] sm:$0xff] }
0x2ca1   : > { %9482 = vrcp.f32 %v7109_v19  ;;  %v7415_v19 = vld [vmem:[%s9759_s27 + $0xd8] sm:$0xff] }
0x2cac   : > { %v9481_v20 = vpop.eup %9480 }
0x2cad   : > { %v7114_v23 = vmul.f32 %v9481_v20, %v7096_v3  ;;  %v7399_v20 = vld [vmem:[%s9759_s27 + $0x58] sm:$0xff] }
0x2cae   : > { %v9483_v21 = vpop.eup %9482 }
0x2caf   : > { %v7115_v22 = vmul.f32 %v9483_v21, %v7098_v12  ;;  %v7403_v12 = vld [vmem:[%s9759_s27 + $0x78] sm:$0xff]  ;;  %v7414_v21 = vld [vmem:[%s9759_s27 + $0xd0] sm:$0xff] }
0x2cb1   : > { %7212 = vmatprep.mubr.f32.mxu0 %v7115_v22  ;;  %v7398_v22 = vld [vmem:[%s9759_s27 + $0x50] sm:$0xff] }
0x2cb2   : > { %7213 = vmatmul.mubr.f32.vlgmr.msra.gmra.mxu0 %v7114_v23  ;;  %v7413_v23 = vld [vmem:[%s9759_s27 + $0xc8] sm:$0xff] }
0x2cb3   : > { %9338 = vmatprep.mubr.msk.f32.mxu0 %vm9551_vm1, %v9550_v10 }
0x2d72   : > { %v8559_v24 = vpop.f32.mrf.mxu0 }
0x2d74   : > { %v8560_v25 = vpop.f32.mrf.mxu0 }
0x2d75   : > { %v8561_v26 = vadd.f32 %v8560_v25, %v8559_v24  ;;  %v7397_v24 = vld [vmem:[%s9759_s27 + $0x48] sm:$0xff]  ;;  %v7412_v25 = vld [vmem:[%s9759_s27 + $0xc0] sm:$0xff] }
0x2d77   : > { %v7218_v29 = vadd.f32 %v8561_v26, %v10813_v34  ;;  %v7396_v26 = vld [vmem:[%s9759_s27 + $0x40] sm:$0xff] }
0x2d79   : > { %v7226_v31 = vadd.f32 %v8108_v28, %v7218_v29  ;;  %v7411_v28 = vld [vmem:[%s9759_s27 + $0xb8] sm:$0xff] }
0x2d7a   : > { %v7395_v29 = vld [vmem:[%s9759_s27 + $0x38] sm:$0xff] }
0x2d7b   : > { %v7234_v2 = vmul.f32 %v8109_v30, %v7226_v31  ;;  %v7410_v30 = vld [vmem:[%s9759_s27 + $0xb0] sm:$0xff] }
0x2d7c   : > { %v7394_v31 = vld [vmem:[%s9759_s27 + $0x30] sm:$0xff] }
0x2d7d   : > { %v7235_v32 = vsel %vm1309_vm0, %v7234_v2, 0.0  ;;  %v7409_v2 = vld [vmem:[%s9759_s27 + $0xa8] sm:$0xff] }
0x2d7e   : > { %7236 = vadd.xlane.f32.xlu0 %v7235_v32  ;;  %v7393_v32 = vld [vmem:[%s9759_s27 + $0x28] sm:$0xff] }
0x2e07   : > { %v7237_v36 = vpop.xlane.xlu0 %7236 }
0x2e08   : > { %v7245_v37 = vadd.f32 %v8110_v35, %v7237_v36  ;;  %v7392_v35 = vld [vmem:[%s9759_s27 + $0x20] sm:$0xff]  ;;  %v7407_v36 = vld [vmem:[%s9759_s27 + $0x98] sm:$0xff] }
0x2e0a   : > { %7247 = vst.msk [vmem:[%s1298_s2] sm:$0xff] %vm7246_vm8, %v7245_v37  ;;  %7250 = vperm.xlu0 %9395, %v7245_v37   ;;  %v7391_v37 = vld [vmem:[%s9759_s27 + $0x18] sm:$0xff]  ;;  %s1302_s2 = scalar_lea.vmem %s9774_s17, %s9784_s0 }
0x2e85   : > { %v7251_v10 = vpop.permute.xlu0 %7250 }
0x2e86   : > { %v7253_v38 = vmul.f32 %v7251_v10, %v10813_v34  ;;  %v7406_v10 = vld [vmem:[%s9759_s27 + $0x90] sm:$0xff] }
0x2e88   : > { %v7254_v16 = vsel %vm1309_vm0, %v7253_v38, 0.0  ;;  %v7390_v38 = vld [vmem:[%s9759_s27 + $0x10] sm:$0xff] }
0x2e89   : > { %v7255_v40 = vrot.slane %v7254_v16, 4 }
0x2e8b   : > { %v7256_v0 = vadd.f32 %v7255_v40, %v7254_v16  ;;  %v7405_v16 = vld [vmem:[%s9759_s27 + $0x88] sm:$0xff] }
0x2e8c   : > { %v7389_v40 = vld [vmem:[%s9759_s27 + $0x8] sm:$0xff] }
0x2e8d   : > { %v7257_v41 = vrot.slane %v7256_v0, 2 }
0x2e8f   : > { %v7258_v42 = vadd.f32 %v7257_v41, %v7256_v0  ;;  %v7404_v0 = vld [vmem:[%s9759_s27 + $0x80] sm:$0xff] }
0x2e90   : > { %v7388_v41 = vld [vmem:[%s9759_s27] sm:$0xff] }
0x2e91   : > { %v7259_v43 = vrot.slane %v7258_v42, 1 }
0x2e93   : > { %v7260_v33 = vadd.f32 %v7259_v43, %v7258_v42  ;;  %v7286_v42 = vld [vmem:[%s11014_s1] sm:$0x3] }
0x2e94   : > { %v7291_v43 = vrot.slane %v7286_v42, %v10203_v6 }
0x2e95   : > { %v7261_v27 = vmul.f32 %v7260_v33, %v7260_v33 }
0x2e97   : > { %v7262_v62 = vsel %vm1309_vm0, %v7261_v27, 0.0 }
0x2e98   : > { %7263 = vadd.xlane.f32.xlu1 %v7262_v62 }
0x2e9c   : > { %7501 = vadd.xlane.f32.xlu1 %v7500_v45 }
0x2f21   : > { %v7264_v63 = vpop.xlane.xlu1 %7263 }
0x2f22   : > { %v7265_v1 = vadd.f32 1e-12, %v7264_v63 }
0x2f24   : > { %9484 = vrsqrt.f32 %v7265_v1 }
0x2f31   : > { %v9485_v5 = vpop.eup %9484 }
0x2f32   : > { %v7267_v3 = vmul.f32 %v9485_v5, %v7260_v33  ;;  %v7295_v33 = vrot.slane %v7286_v42, %v10206_v8  ;;  %v7502_v5 = vpop.xlane.xlu1 %7501 }
0x2f34   : > { %v10885_v9 = vadd.f32 %v7268_v7, %v7267_v3  ;;  %v7503_v7 = vadd.f32 1e-12, %v7502_v5 }
0x2f36   : > { %8111 = vmatmul.mubr.msk.f32.vlgmr.msra.gmra.mxu1 %vm1309_vm0, %v10885_v9 }
0x2f37   : > { %8563 = vmatpush3.msra.mxu1 %v7403_v12 }
0x2f38   : > { %8564 = vmatprep.subr.mxu1 %v7418_v15 }
0x2f39   : > { %8565 = vmatpush3.msra.mxu1 %v7402_v17 }
0x2f3a   : > { %8566 = vmatprep.subr.mxu1 %v7417_v18 }
0x2f3b   : > { %8567 = vmatpush3.msra.mxu1 %v7401_v39 }
0x2f3c   : > { %8568 = vmatprep.subr.mxu1 %v7416_v60 }
0x2f3d   : > { %8569 = vmatpush3.msra.mxu1 %v7400_v13 }
0x2f3e   : > { %8570 = vmatprep.subr.mxu1 %v7415_v19 }
0x2f3f   : > { %8571 = vmatpush3.msra.mxu1 %v7399_v20 }
0x2f40   : > { %8572 = vmatprep.subr.mxu1 %v7414_v21 }
0x2f41   : > { %8573 = vmatpush3.msra.mxu1 %v7398_v22 }
0x2f42   : > { %8574 = vmatprep.subr.mxu1 %v7413_v23 }
0x2f43   : > { %8575 = vmatpush3.msra.mxu1 %v7397_v24 }
0x2f44   : > { %8576 = vmatprep.subr.mxu1 %v7412_v25 }
0x2f45   : > { %8577 = vmatpush3.msra.mxu1 %v7396_v26 }
0x2f46   : > { %8578 = vmatprep.subr.mxu1 %v7411_v28 }
0x2f47   : > { %8579 = vmatpush3.msra.mxu1 %v7395_v29 }
0x2f48   : > { %8580 = vmatprep.subr.mxu1 %v7410_v30 }
0x2f49   : > { %8581 = vmatpush3.msra.mxu1 %v7394_v31 }
0x2f4a   : > { %8582 = vmatprep.subr.mxu1 %v7409_v2 }
0x2f4b   : > { %8583 = vmatpush3.msra.mxu1 %v7393_v32 }
0x2f4c   : > { %8584 = vmatprep.subr.mxu1 %v7408_v14 }
0x2f4d   : > { %8585 = vmatpush3.msra.mxu1 %v7392_v35 }
0x2f4e   : > { %8586 = vmatprep.subr.mxu1 %v7407_v36 }
0x2f4f   : > { %8587 = vmatpush3.msra.mxu1 %v7391_v37 }
0x2f50   : > { %8588 = vmatprep.subr.mxu1 %v7406_v10 }
0x2f51   : > { %8589 = vmatpush3.msra.mxu1 %v7390_v38 }
0x2f52   : > { %8590 = vmatprep.subr.mxu1 %v7405_v16 }
0x2f53   : > { %8591 = vmatpush3.msra.mxu1 %v7389_v40 }
0x2f54   : > { %8592 = vmatprep.subr.mxu1 %v7404_v0 }
0x2f55   : > { %8593 = vmatpush3.msra.mxu1 %v7388_v41 }
0x2ff6   : > { %v7367_v27 = vpop.f32.mrf.mxu1 }
0x2ff7   : > { %v7368_v62 = vadd.f32 %v7367_v27, %v7291_v43 }
0x2ff8   : > { %v7369_v44 = vpop.f32.mrf.mxu1 }
0x2ff9   : > { %v8112_v45 = vmul.f32 -1.702, %v7368_v62  ;;  %v7370_v46 = vadd.f32 %v7369_v44, %v7295_v33 }
0x2ffb   : > { %v7376_v47 = vmul.f32 1.442695, %v8112_v45  ;;  %v8113_v48 = vmul.f32 -1.702, %v7370_v46 }
0x2ffd   : > { %9486 = vpow2.f32 %v7376_v47  ;;  %v7378_v49 = vmul.f32 1.442695, %v8113_v48 }
0x2fff   : > { %9488 = vpow2.f32 %v7378_v49 }
0x300a   : > { %v9487_v50 = vpop.eup %9486 }
0x300b   : > { %v7380_v51 = vadd.f32 1.0, %v9487_v50 }
0x300c   : > { %v9489_v52 = vpop.eup %9488 }
0x300d   : > { %v7381_v53 = vadd.f32 1.0, %v9489_v52  ;;  %9490 = vrcp.f32 %v7380_v51 }
0x300f   : > { %9492 = vrcp.f32 %v7381_v53 }
0x301a   : > { %v9491_v6 = vpop.eup %9490 }
0x301b   : > { %v7386_v55 = vmul.f32 %v9491_v6, %v7368_v62 }
0x301c   : > { %v9493_v54 = vpop.eup %9492 }
0x301d   : > { %v7387_v8 = vmul.f32 %v9493_v54, %v7370_v46 }
0x301f   : > { %7484 = vmatprep.mubr.f32.mxu1 %v7387_v8 }
0x3020   : > { %7485 = vmatmul.mubr.f32.vlgmr.msra.gmra.mxu1 %v7386_v55 }
0x30e0   : > { %v8594_v4 = vpop.f32.mrf.mxu1 }
0x30e2   : > { %v8595_v56 = vpop.f32.mrf.mxu1 }
0x30e3   : > { %v8596_v57 = vadd.f32 %v8595_v56, %v8594_v4 }
0x30e5   : > { %v7490_v59 = vadd.f32 %v8596_v57, %v10885_v9 }
0x30e7   : > { %v7498_v61 = vadd.f32 %v8114_v58, %v7490_v59 }
0x30e9   : > { %v7506_v63 = vmul.f32 %v7498_v61, %v7498_v61 }
0x30eb   : > { %v7508_v1 = vsel %vm7507_vm9, %v7506_v63, 0.0 }
0x30ec   : > { %7509 = vadd.xlane.f32.xlu0 %v7508_v1 }
0x3175   : > { %v7510_v3 = vpop.xlane.xlu0 %7509 }
0x3176   : > { %v7511_v11 = vadd.f32 1e-12, %v7510_v3 }
0x3178   : > { %9494 = vrsqrt.f32 %v7511_v11 }
0x3179   : > { %9496 = vrsqrt.f32 %v7503_v7 }
0x3185   : > { %v9495_v12 = vpop.eup %9494 }
0x3186   : > { %v9497_v15 = vpop.eup %9496  ;;  %v7513_v17 = vmul.f32 %v9495_v12, %v7498_v61 }
0x3187   : > { %v7505_v9 = vmul.f32 %v9497_v15, %v10813_v34 }
0x3188   : > { %9337 = vmatpush3.xpose.msk.msra.mxu0 %vm1309_vm0, %v7513_v17 }
0x318b   : > { %9339 = vmatmul.mubr.msk.f32.vlgmr.msra.gmra.mxu0 %vm1309_vm0, %v7505_v9 }
0x324b   : > { %v7586_v18 = vpop.f32.mrf.mxu0 }
0x324c   : > { %v7590_v39 = vmul.f32 14.285714, %v7586_v18 }
0x324d   : > { %v9340_v60 = vpop.f32.mrf.mxu0 }
0x324e   : > { %7592 = vst.msk [vmem:[%s1302_s2] sm:$0xff] %vm7591_vm10, %v7590_v39 }
0x324f PF: > { %s100_s23 = sadd.s32 1, %s9505_s23  }
0x3250   : > { %p97_p4 = scmp.ge.s32.totalorder %s100_s23, 4  }
0x3252   :  { %99 = sbr.rel (!%p97_p4) target bundleno = 83 (0x53), region = 331 }

</bundles_post_ra>
